<compile_context>
chip_gen: v7x
topology: tpu7x:2x2x1
jax: 0.10.0
libtpu: 0.0.40
codegen_flags: <defaults>
</compile_context>

<pallas_src>
import numpy as np
import jax
import jax.numpy as jnp
from jax.experimental import pallas as pl
from jax.experimental.pallas import tpu as pltpu

BN_EPS = 1e-5
HIGHEST = jax.lax.Precision.HIGHEST


def _round_up(x, m):
    return (x + m - 1) // m * m


def _make_masks(D, H, W):
    """(27, D*H*W) f32 masks: 0 where a 3x3x3 tap would read outside the volume
    (also handles wrap-around of the flattened spatial axis at row/plane edges)."""
    S = D * H * W
    n = np.arange(S)
    d, h, w = n // (H * W), (n // W) % H, n % W
    rows = []
    for kd in range(3):
        for kh in range(3):
            for kw in range(3):
                dd, dh, dw = kd - 1, kh - 1, kw - 1
                ok = ((d + dd >= 0) & (d + dd < D) &
                      (h + dh >= 0) & (h + dh < H) &
                      (w + dw >= 0) & (w + dw < W))
                rows.append(ok)
    return jnp.asarray(np.stack(rows).astype(np.float32))


def _fold_half(w3, b3, w1, b1, gamma, beta, mean, var, *, cin_pad, cout_pad):
    """Fold Conv3d(k=3)->Conv3d(k=1)->ReLU->Dropout(id)->BN(eval) of one half into a
    single bf16 matmul weight A (cout_pad, 27*cin_pad), an f32 bias and BN scale/shift."""
    # exact fold of the pointwise conv into the 3x3x3 conv
    w_eff = jnp.einsum("dhwim,mo->dhwio", w3, w1, precision=HIGHEST)   # (3,3,3,ci,co)
    b_eff = jnp.einsum("m,mo->o", b3, w1, precision=HIGHEST) + b1      # (co,)
    # exact fold of eval-mode BatchNorm into scale/shift
    scale = gamma * jax.lax.rsqrt(var + BN_EPS)
    shift = beta - mean * scale

    ci, co = w_eff.shape[3], w_eff.shape[4]
    w_eff = jnp.pad(w_eff, ((0, 0), (0, 0), (0, 0),
                            (0, cin_pad - ci), (0, cout_pad - co)))
    A = w_eff.reshape(27 * cin_pad, cout_pad).T          # (cout_pad, 27*cin_pad)

    def col(v):  # (co,) -> (cout_pad, 1) column vector (sublane orientation)
        return jnp.pad(v, (0, cout_pad - co)).reshape(cout_pad, 1).astype(jnp.float32)

    return A.astype(jnp.bfloat16), col(b_eff), col(scale), col(shift)


def _make_kernel(D, H, W, P, c1, c2):
    """c1 / c2: (16-padded) input-channel counts feeding half 1 / half 2."""
    S = D * H * W

    def build_cols(load, masks_ref, cin, col_ref):
        # im2col into bf16 VMEM: col[k*cin + c, n] = act[c, n + delta_k] (0 off-volume).
        # cin is a multiple of 16, so every bf16 store covers whole (16,128) tiles.
        for k in range(27):
            kd, kh, kw = k // 9, (k // 3) % 3, k % 3
            delta = (kd - 1) * H * W + (kh - 1) * W + (kw - 1)
            slab = load(P + delta)                         # (cin, S) shifted window
            if delta == 0:                                  # center tap: mask all-ones
                val = slab
            else:                                           # f32 multiply (v5e-safe)
                val = slab * masks_ref[k:k + 1, :]
            col_ref[k * cin:(k + 1) * cin, :] = val.astype(jnp.bfloat16)

    def half(load, cin, masks_ref, a_ref, b_ref, s_ref, t_ref, col_ref):
        build_cols(load, masks_ref, cin, col_ref)
        h = jnp.dot(a_ref[...], col_ref[0:27 * cin, :],     # bf16 x bf16 -> f32 on MXU
                    preferred_element_type=jnp.float32)
        h = jnp.maximum(h + b_ref[...], 0.0)                # conv bias + ReLU
        return h * s_ref[...] + t_ref[...]                  # folded BatchNorm (eval)

    def kernel(x_ref, masks_ref,
               a1_ref, b1_ref, s1_ref, t1_ref,
               a2_ref, b2_ref, s2_ref, t2_ref,
               out_ref, col_ref, mid_ref):
        # ---------------- half 1 ----------------
        h1 = half(lambda off: x_ref[0, :, off:off + S], c1, masks_ref,
                  a1_ref, b1_ref, s1_ref, t1_ref, col_ref)
        # Stage the flat zero-padded intermediate in VMEM (no HBM round trip).
        # Only the two P-wide halo stripes need zeroing; the interior is fully
        # overwritten each iteration.  Zeroed every step (cheap: 2 stripes) so the
        # kernel is correct even if the batch axis is split across TensorCores.
        mid_ref[:, 0:P] = jnp.zeros((c2, P), jnp.bfloat16)
        mid_ref[:, P + S:P + S + P] = jnp.zeros((c2, P), jnp.bfloat16)
        mid_ref[:, P:P + S] = h1.astype(jnp.bfloat16)
        # ---------------- half 2 ----------------
        y = half(lambda off: mid_ref[:, off:off + S], c2, masks_ref,
                 a2_ref, b2_ref, s2_ref, t2_ref, col_ref)
        out_ref[0] = y.astype(out_ref.dtype)                # (Cout, S) lane-dense store

    return kernel


def block_forward(x_ncdhw, params):
    N, Cin, D, H, W = x_ncdhw.shape
    Cout = params["half1"][2].shape[-1]
    S = D * H * W
    P = _round_up(H * W + W + 1, 128)        # flat halo, rounded up for aligned stores
    # Pad channel counts to multiples of 16 so every bf16 im2col / intermediate store
    # is (16,128)-tile aligned.  Exact: padded weight rows/cols, bias and BN
    # scale/shift are zero, so padded channels stay identically zero.
    Cip = _round_up(Cin, 16)
    Cop = _round_up(Cout, 16)

    # NCDHW -> (N, C, D*H*W) is a pure reshape (no transpose).  Pad channels and the
    # flat spatial axis by P zeros on both sides.
    x_flat = x_ncdhw.reshape(N, Cin, S).astype(jnp.float32)
    x_flat = jnp.pad(x_flat, ((0, 0), (0, Cip - Cin), (P, P)))

    masks = _make_masks(D, H, W)
    a1, b1, s1, t1 = _fold_half(*params["half1"], cin_pad=Cip, cout_pad=Cop)
    a2, b2, s2, t2 = _fold_half(*params["half2"], cin_pad=Cop, cout_pad=Cout)

    kernel = _make_kernel(D, H, W, P, Cip, Cop)

    def fixed(shape):
        r = len(shape)
        return pl.BlockSpec(shape, lambda n, _r=r: (0,) * _r)

    out = pl.pallas_call(
        kernel,
        out_shape=jax.ShapeDtypeStruct((N, Cout, S), jnp.float32),
        grid_spec=pltpu.PrefetchScalarGridSpec(
            num_scalar_prefetch=0,
            grid=(N,),
            in_specs=[
                pl.BlockSpec((1, Cip, S + 2 * P), lambda n: (n, 0, 0)),
                fixed((27, S)),
                fixed((Cop, 27 * Cip)), fixed((Cop, 1)), fixed((Cop, 1)), fixed((Cop, 1)),
                fixed((Cout, 27 * Cop)), fixed((Cout, 1)), fixed((Cout, 1)), fixed((Cout, 1)),
            ],
            out_specs=pl.BlockSpec((1, Cout, S), lambda n: (n, 0, 0)),
            scratch_shapes=[
                pltpu.VMEM((27 * max(Cip, Cop), S), jnp.bfloat16),  # bf16 im2col matrix
                pltpu.VMEM((Cop, S + 2 * P), jnp.bfloat16),         # bf16 padded intermediate
            ],
        ),
        compiler_params=pltpu.CompilerParams(
            dimension_semantics=("parallel",),
            vmem_limit_bytes=32 * 1024 * 1024,
        ),
    )(x_flat, masks, a1, b1, s1, t1, a2, b2, s2, t2)

    return out.reshape(N, Cout, D, H, W)


# ---------------- pure-JAX reference (for correctness check) ----------------
def _half_ref(x, w3, b3, w1, b1, gamma, beta, mean, var):
    dn = ("NDHWC", "DHWIO", "NDHWC")
    y = jax.lax.conv_general_dilated(x, w3, (1, 1, 1), "SAME",
                                     dimension_numbers=dn, precision=HIGHEST) + b3
    y = jax.lax.conv_general_dilated(y, w1.reshape(1, 1, 1, *w1.shape), (1, 1, 1),
                                     "SAME", dimension_numbers=dn,
                                     precision=HIGHEST) + b1
    y = jnp.maximum(y, 0.0)
    return (y - mean) * jax.lax.rsqrt(var + BN_EPS) * gamma + beta


def block_ref(x_ncdhw, params):
    x = jnp.transpose(x_ncdhw, (0, 2, 3, 4, 1)).astype(jnp.float32)
    h = _half_ref(x, *params["half1"])
    h = _half_ref(h, *params["half2"])
    return jnp.transpose(h, (0, 4, 1, 2, 3))


# ---------------- deterministic parameter init ----------------
def init_params(key, in_ch, out_ch):
    ks = jax.random.split(key, 16)

    def conv3_w(k, ci, co):
        return 0.1 * jax.random.normal(k, (3, 3, 3, ci, co), jnp.float32)

    def conv1_w(k, ci, co):
        return 0.1 * jax.random.normal(k, (ci, co), jnp.float32)

    def bias(k, c):
        return 0.05 * jax.random.normal(k, (c,), jnp.float32)

    def bn(k, c):
        k1, k2, k3, k4 = jax.random.split(k, 4)
        gamma = 1.0 + 0.1 * jax.random.normal(k1, (c,), jnp.float32)
        beta = 0.05 * jax.random.normal(k2, (c,), jnp.float32)
        mean = 0.05 * jax.random.normal(k3, (c,), jnp.float32)
        var = 0.5 + jnp.abs(jax.random.normal(k4, (c,), jnp.float32))
        return gamma, beta, mean, var

    g1, be1, m1, v1 = bn(ks[4], out_ch)
    g2, be2, m2, v2 = bn(ks[9], out_ch)
    return {
        "half1": (conv3_w(ks[0], in_ch, in_ch), bias(ks[1], in_ch),
                  conv1_w(ks[2], in_ch, out_ch), bias(ks[3], out_ch),
                  g1, be1, m1, v1),
        "half2": (conv3_w(ks[5], out_ch, out_ch), bias(ks[6], out_ch),
                  conv1_w(ks[7], out_ch, out_ch), bias(ks[8], out_ch),
                  g2, be2, m2, v2),
    }


if __name__ == "__main__":
    key = jax.random.PRNGKey(0)
    kx, kp = jax.random.split(key)

    N, Cin, Cout = 2, 4, 8
    D = H = W = 8
    x = jax.random.normal(kx, (N, Cin, D, H, W), jnp.float32)  # NCDHW like PyTorch
    params = init_params(kp, Cin, Cout)

    y = jax.block_until_ready(block_forward(x, params))
    assert y.shape == (N, Cout, D, H, W), y.shape

    y_ref = jax.block_until_ready(block_ref(x, params))
    max_err = float(jnp.max(jnp.abs(y - y_ref)))
    # bf16 im2col / weights with f32 MXU accumulation: expected max error ~1e-3.
    assert jnp.allclose(y, y_ref, atol=1e-2, rtol=1e-2), max_err

    print("KERNEL_OK")
</pallas_src>

<mosaic_0001>
module attributes {stable_mosaic.version = 11 : i64} {
  func.func @kernel(%arg0: i32, %arg1: memref<1x16x768xf32, #tpu.memory_space<vmem>>, %arg2: memref<27x512xf32, #tpu.memory_space<vmem>>, %arg3: memref<16x432xbf16, #tpu.memory_space<vmem>>, %arg4: memref<16x1xf32, #tpu.memory_space<vmem>>, %arg5: memref<16x1xf32, #tpu.memory_space<vmem>>, %arg6: memref<16x1xf32, #tpu.memory_space<vmem>>, %arg7: memref<8x432xbf16, #tpu.memory_space<vmem>>, %arg8: memref<8x1xf32, #tpu.memory_space<vmem>>, %arg9: memref<8x1xf32, #tpu.memory_space<vmem>>, %arg10: memref<8x1xf32, #tpu.memory_space<vmem>>, %arg11: memref<1x8x512xf32, #tpu.memory_space<vmem>>, %arg12: memref<432x512xbf16, #tpu.memory_space<vmem>>, %arg13: memref<16x768xbf16, #tpu.memory_space<vmem>>) attributes {dimension_semantics = [#tpu.dimension_semantics<parallel>], iteration_bounds = array<i64: 2>, scalar_prefetch = 0 : i64, scratch_operands = 2 : i64, tpu.core_type = #tpu.core_type<tc>, window_params = [{transform_indices = @transform_0, window_bounds = array<i64: 1, 16, 768>}, {pipeline_mode = #tpu.pipeline_mode<synchronous>, transform_indices = @transform_1, window_bounds = array<i64: 27, 512>}, {pipeline_mode = #tpu.pipeline_mode<synchronous>, transform_indices = @transform_2, window_bounds = array<i64: 16, 432>}, {pipeline_mode = #tpu.pipeline_mode<synchronous>, transform_indices = @transform_3, window_bounds = array<i64: 16, 1>}, {pipeline_mode = #tpu.pipeline_mode<synchronous>, transform_indices = @transform_4, window_bounds = array<i64: 16, 1>}, {pipeline_mode = #tpu.pipeline_mode<synchronous>, transform_indices = @transform_5, window_bounds = array<i64: 16, 1>}, {pipeline_mode = #tpu.pipeline_mode<synchronous>, transform_indices = @transform_6, window_bounds = array<i64: 8, 432>}, {pipeline_mode = #tpu.pipeline_mode<synchronous>, transform_indices = @transform_7, window_bounds = array<i64: 8, 1>}, {pipeline_mode = #tpu.pipeline_mode<synchronous>, transform_indices = @transform_8, window_bounds = array<i64: 8, 1>}, {pipeline_mode = #tpu.pipeline_mode<synchronous>, transform_indices = @transform_9, window_bounds = array<i64: 8, 1>}, {transform_indices = @transform_10, window_bounds = array<i64: 1, 8, 512>}]} {
    %c0 = arith.constant 0 : index
    %c0_0 = arith.constant 0 : index
    %c55 = arith.constant 55 : index
    %0 = vector.load %arg1[%c0, %c0_0, %c55] : memref<1x16x768xf32, #tpu.memory_space<vmem>>, vector<1x16x512xf32>
    %1 = vector.shape_cast %0 : vector<1x16x512xf32> to vector<16x512xf32>
    %c0_1 = arith.constant 0 : index
    %c0_2 = arith.constant 0 : index
    %2 = vector.load %arg2[%c0_1, %c0_2] : memref<27x512xf32, #tpu.memory_space<vmem>>, vector<1x512xf32>
    %3 = vector.broadcast %2 : vector<1x512xf32> to vector<16x512xf32>
    %4 = arith.mulf %1, %3 : vector<16x512xf32>
    %5 = arith.truncf %4 : vector<16x512xf32> to vector<16x512xbf16>
    %c0_3 = arith.constant 0 : index
    %c0_4 = arith.constant 0 : index
    %6 = vector.load %arg12[%c0_3, %c0_4] : memref<432x512xbf16, #tpu.memory_space<vmem>>, vector<16x512xbf16>
    tpu.vector_store %arg12[%c0_3, %c0_4], %5 {strides = array<i32>} : memref<432x512xbf16, #tpu.memory_space<vmem>>, vector<16x512xbf16>,
    %c0_5 = arith.constant 0 : index
    %c0_6 = arith.constant 0 : index
    %c56 = arith.constant 56 : index
    %7 = vector.load %arg1[%c0_5, %c0_6, %c56] : memref<1x16x768xf32, #tpu.memory_space<vmem>>, vector<1x16x512xf32>
    %8 = vector.shape_cast %7 : vector<1x16x512xf32> to vector<16x512xf32>
    %c1 = arith.constant 1 : index
    %c0_7 = arith.constant 0 : index
    %9 = vector.load %arg2[%c1, %c0_7] : memref<27x512xf32, #tpu.memory_space<vmem>>, vector<1x512xf32>
    %10 = vector.broadcast %9 : vector<1x512xf32> to vector<16x512xf32>
    %11 = arith.mulf %8, %10 : vector<16x512xf32>
    %12 = arith.truncf %11 : vector<16x512xf32> to vector<16x512xbf16>
    %c16 = arith.constant 16 : index
    %c0_8 = arith.constant 0 : index
    %13 = vector.load %arg12[%c16, %c0_8] : memref<432x512xbf16, #tpu.memory_space<vmem>>, vector<16x512xbf16>
    tpu.vector_store %arg12[%c16, %c0_8], %12 {strides = array<i32>} : memref<432x512xbf16, #tpu.memory_space<vmem>>, vector<16x512xbf16>,
    %c0_9 = arith.constant 0 : index
    %c0_10 = arith.constant 0 : index
    %c57 = arith.constant 57 : index
    %14 = vector.load %arg1[%c0_9, %c0_10, %c57] : memref<1x16x768xf32, #tpu.memory_space<vmem>>, vector<1x16x512xf32>
    %15 = vector.shape_cast %14 : vector<1x16x512xf32> to vector<16x512xf32>
    %c2 = arith.constant 2 : index
    %c0_11 = arith.constant 0 : index
    %16 = vector.load %arg2[%c2, %c0_11] : memref<27x512xf32, #tpu.memory_space<vmem>>, vector<1x512xf32>
    %17 = vector.broadcast %16 : vector<1x512xf32> to vector<16x512xf32>
    %18 = arith.mulf %15, %17 : vector<16x512xf32>
    %19 = arith.truncf %18 : vector<16x512xf32> to vector<16x512xbf16>
    %c32 = arith.constant 32 : index
    %c0_12 = arith.constant 0 : index
    %20 = vector.load %arg12[%c32, %c0_12] : memref<432x512xbf16, #tpu.memory_space<vmem>>, vector<16x512xbf16>
    tpu.vector_store %arg12[%c32, %c0_12], %19 {strides = array<i32>} : memref<432x512xbf16, #tpu.memory_space<vmem>>, vector<16x512xbf16>,
    %c0_13 = arith.constant 0 : index
    %c0_14 = arith.constant 0 : index
    %c63 = arith.constant 63 : index
    %21 = vector.load %arg1[%c0_13, %c0_14, %c63] : memref<1x16x768xf32, #tpu.memory_space<vmem>>, vector<1x16x512xf32>
    %22 = vector.shape_cast %21 : vector<1x16x512xf32> to vector<16x512xf32>
    %c3 = arith.constant 3 : index
    %c0_15 = arith.constant 0 : index
    %23 = vector.load %arg2[%c3, %c0_15] : memref<27x512xf32, #tpu.memory_space<vmem>>, vector<1x512xf32>
    %24 = vector.broadcast %23 : vector<1x512xf32> to vector<16x512xf32>
    %25 = arith.mulf %22, %24 : vector<16x512xf32>
    %26 = arith.truncf %25 : vector<16x512xf32> to vector<16x512xbf16>
    %c48 = arith.constant 48 : index
    %c0_16 = arith.constant 0 : index
    %27 = vector.load %arg12[%c48, %c0_16] : memref<432x512xbf16, #tpu.memory_space<vmem>>, vector<16x512xbf16>
    tpu.vector_store %arg12[%c48, %c0_16], %26 {strides = array<i32>} : memref<432x512xbf16, #tpu.memory_space<vmem>>, vector<16x512xbf16>,
    %c0_17 = arith.constant 0 : index
    %c0_18 = arith.constant 0 : index
    %c64 = arith.constant 64 : index
    %28 = vector.load %arg1[%c0_17, %c0_18, %c64] : memref<1x16x768xf32, #tpu.memory_space<vmem>>, vector<1x16x512xf32>
    %29 = vector.shape_cast %28 : vector<1x16x512xf32> to vector<16x512xf32>
    %c4 = arith.constant 4 : index
    %c0_19 = arith.constant 0 : index
    %30 = vector.load %arg2[%c4, %c0_19] : memref<27x512xf32, #tpu.memory_space<vmem>>, vector<1x512xf32>
    %31 = vector.broadcast %30 : vector<1x512xf32> to vector<16x512xf32>
    %32 = arith.mulf %29, %31 : vector<16x512xf32>
    %33 = arith.truncf %32 : vector<16x512xf32> to vector<16x512xbf16>
    %c64_20 = arith.constant 64 : index
    %c0_21 = arith.constant 0 : index
    %34 = vector.load %arg12[%c64_20, %c0_21] : memref<432x512xbf16, #tpu.memory_space<vmem>>, vector<16x512xbf16>
    tpu.vector_store %arg12[%c64_20, %c0_21], %33 {strides = array<i32>} : memref<432x512xbf16, #tpu.memory_space<vmem>>, vector<16x512xbf16>,
    %c0_22 = arith.constant 0 : index
    %c0_23 = arith.constant 0 : index
    %c65 = arith.constant 65 : index
    %35 = vector.load %arg1[%c0_22, %c0_23, %c65] : memref<1x16x768xf32, #tpu.memory_space<vmem>>, vector<1x16x512xf32>
    %36 = vector.shape_cast %35 : vector<1x16x512xf32> to vector<16x512xf32>
    %c5 = arith.constant 5 : index
    %c0_24 = arith.constant 0 : index
    %37 = vector.load %arg2[%c5, %c0_24] : memref<27x512xf32, #tpu.memory_space<vmem>>, vector<1x512xf32>
    %38 = vector.broadcast %37 : vector<1x512xf32> to vector<16x512xf32>
    %39 = arith.mulf %36, %38 : vector<16x512xf32>
    %40 = arith.truncf %39 : vector<16x512xf32> to vector<16x512xbf16>
    %c80 = arith.constant 80 : index
    %c0_25 = arith.constant 0 : index
    %41 = vector.load %arg12[%c80, %c0_25] : memref<432x512xbf16, #tpu.memory_space<vmem>>, vector<16x512xbf16>
    tpu.vector_store %arg12[%c80, %c0_25], %40 {strides = array<i32>} : memref<432x512xbf16, #tpu.memory_space<vmem>>, vector<16x512xbf16>,
    %c0_26 = arith.constant 0 : index
    %c0_27 = arith.constant 0 : index
    %c71 = arith.constant 71 : index
    %42 = vector.load %arg1[%c0_26, %c0_27, %c71] : memref<1x16x768xf32, #tpu.memory_space<vmem>>, vector<1x16x512xf32>
    %43 = vector.shape_cast %42 : vector<1x16x512xf32> to vector<16x512xf32>
    %c6 = arith.constant 6 : index
    %c0_28 = arith.constant 0 : index
    %44 = vector.load %arg2[%c6, %c0_28] : memref<27x512xf32, #tpu.memory_space<vmem>>, vector<1x512xf32>
    %45 = vector.broadcast %44 : vector<1x512xf32> to vector<16x512xf32>
    %46 = arith.mulf %43, %45 : vector<16x512xf32>
    %47 = arith.truncf %46 : vector<16x512xf32> to vector<16x512xbf16>
    %c96 = arith.constant 96 : index
    %c0_29 = arith.constant 0 : index
    %48 = vector.load %arg12[%c96, %c0_29] : memref<432x512xbf16, #tpu.memory_space<vmem>>, vector<16x512xbf16>
    tpu.vector_store %arg12[%c96, %c0_29], %47 {strides = array<i32>} : memref<432x512xbf16, #tpu.memory_space<vmem>>, vector<16x512xbf16>,
    %c0_30 = arith.constant 0 : index
    %c0_31 = arith.constant 0 : index
    %c72 = arith.constant 72 : index
    %49 = vector.load %arg1[%c0_30, %c0_31, %c72] : memref<1x16x768xf32, #tpu.memory_space<vmem>>, vector<1x16x512xf32>
    %50 = vector.shape_cast %49 : vector<1x16x512xf32> to vector<16x512xf32>
    %c7 = arith.constant 7 : index
    %c0_32 = arith.constant 0 : index
    %51 = vector.load %arg2[%c7, %c0_32] : memref<27x512xf32, #tpu.memory_space<vmem>>, vector<1x512xf32>
    %52 = vector.broadcast %51 : vector<1x512xf32> to vector<16x512xf32>
    %53 = arith.mulf %50, %52 : vector<16x512xf32>
    %54 = arith.truncf %53 : vector<16x512xf32> to vector<16x512xbf16>
    %c112 = arith.constant 112 : index
    %c0_33 = arith.constant 0 : index
    %55 = vector.load %arg12[%c112, %c0_33] : memref<432x512xbf16, #tpu.memory_space<vmem>>, vector<16x512xbf16>
    tpu.vector_store %arg12[%c112, %c0_33], %54 {strides = array<i32>} : memref<432x512xbf16, #tpu.memory_space<vmem>>, vector<16x512xbf16>,
    %c0_34 = arith.constant 0 : index
    %c0_35 = arith.constant 0 : index
    %c73 = arith.constant 73 : index
    %56 = vector.load %arg1[%c0_34, %c0_35, %c73] : memref<1x16x768xf32, #tpu.memory_space<vmem>>, vector<1x16x512xf32>
    %57 = vector.shape_cast %56 : vector<1x16x512xf32> to vector<16x512xf32>
    %c8 = arith.constant 8 : index
    %c0_36 = arith.constant 0 : index
    %58 = vector.load %arg2[%c8, %c0_36] : memref<27x512xf32, #tpu.memory_space<vmem>>, vector<1x512xf32>
    %59 = vector.broadcast %58 : vector<1x512xf32> to vector<16x512xf32>
    %60 = arith.mulf %57, %59 : vector<16x512xf32>
    %61 = arith.truncf %60 : vector<16x512xf32> to vector<16x512xbf16>
    %c128 = arith.constant 128 : index
    %c0_37 = arith.constant 0 : index
    %62 = vector.load %arg12[%c128, %c0_37] : memref<432x512xbf16, #tpu.memory_space<vmem>>, vector<16x512xbf16>
    tpu.vector_store %arg12[%c128, %c0_37], %61 {strides = array<i32>} : memref<432x512xbf16, #tpu.memory_space<vmem>>, vector<16x512xbf16>,
    %c0_38 = arith.constant 0 : index
    %c0_39 = arith.constant 0 : index
    %c119 = arith.constant 119 : index
    %63 = vector.load %arg1[%c0_38, %c0_39, %c119] : memref<1x16x768xf32, #tpu.memory_space<vmem>>, vector<1x16x512xf32>
    %64 = vector.shape_cast %63 : vector<1x16x512xf32> to vector<16x512xf32>
    %c9 = arith.constant 9 : index
    %c0_40 = arith.constant 0 : index
    %65 = vector.load %arg2[%c9, %c0_40] : memref<27x512xf32, #tpu.memory_space<vmem>>, vector<1x512xf32>
    %66 = vector.broadcast %65 : vector<1x512xf32> to vector<16x512xf32>
    %67 = arith.mulf %64, %66 : vector<16x512xf32>
    %68 = arith.truncf %67 : vector<16x512xf32> to vector<16x512xbf16>
    %c144 = arith.constant 144 : index
    %c0_41 = arith.constant 0 : index
    %69 = vector.load %arg12[%c144, %c0_41] : memref<432x512xbf16, #tpu.memory_space<vmem>>, vector<16x512xbf16>
    tpu.vector_store %arg12[%c144, %c0_41], %68 {strides = array<i32>} : memref<432x512xbf16, #tpu.memory_space<vmem>>, vector<16x512xbf16>,
    %c0_42 = arith.constant 0 : index
    %c0_43 = arith.constant 0 : index
    %c120 = arith.constant 120 : index
    %70 = vector.load %arg1[%c0_42, %c0_43, %c120] : memref<1x16x768xf32, #tpu.memory_space<vmem>>, vector<1x16x512xf32>
    %71 = vector.shape_cast %70 : vector<1x16x512xf32> to vector<16x512xf32>
    %c10 = arith.constant 10 : index
    %c0_44 = arith.constant 0 : index
    %72 = vector.load %arg2[%c10, %c0_44] : memref<27x512xf32, #tpu.memory_space<vmem>>, vector<1x512xf32>
    %73 = vector.broadcast %72 : vector<1x512xf32> to vector<16x512xf32>
    %74 = arith.mulf %71, %73 : vector<16x512xf32>
    %75 = arith.truncf %74 : vector<16x512xf32> to vector<16x512xbf16>
    %c160 = arith.constant 160 : index
    %c0_45 = arith.constant 0 : index
    %76 = vector.load %arg12[%c160, %c0_45] : memref<432x512xbf16, #tpu.memory_space<vmem>>, vector<16x512xbf16>
    tpu.vector_store %arg12[%c160, %c0_45], %75 {strides = array<i32>} : memref<432x512xbf16, #tpu.memory_space<vmem>>, vector<16x512xbf16>,
    %c0_46 = arith.constant 0 : index
    %c0_47 = arith.constant 0 : index
    %c121 = arith.constant 121 : index
    %77 = vector.load %arg1[%c0_46, %c0_47, %c121] : memref<1x16x768xf32, #tpu.memory_space<vmem>>, vector<1x16x512xf32>
    %78 = vector.shape_cast %77 : vector<1x16x512xf32> to vector<16x512xf32>
    %c11 = arith.constant 11 : index
    %c0_48 = arith.constant 0 : index
    %79 = vector.load %arg2[%c11, %c0_48] : memref<27x512xf32, #tpu.memory_space<vmem>>, vector<1x512xf32>
    %80 = vector.broadcast %79 : vector<1x512xf32> to vector<16x512xf32>
    %81 = arith.mulf %78, %80 : vector<16x512xf32>
    %82 = arith.truncf %81 : vector<16x512xf32> to vector<16x512xbf16>
    %c176 = arith.constant 176 : index
    %c0_49 = arith.constant 0 : index
    %83 = vector.load %arg12[%c176, %c0_49] : memref<432x512xbf16, #tpu.memory_space<vmem>>, vector<16x512xbf16>
    tpu.vector_store %arg12[%c176, %c0_49], %82 {strides = array<i32>} : memref<432x512xbf16, #tpu.memory_space<vmem>>, vector<16x512xbf16>,
    %c0_50 = arith.constant 0 : index
    %c0_51 = arith.constant 0 : index
    %c127 = arith.constant 127 : index
    %84 = vector.load %arg1[%c0_50, %c0_51, %c127] : memref<1x16x768xf32, #tpu.memory_space<vmem>>, vector<1x16x512xf32>
    %85 = vector.shape_cast %84 : vector<1x16x512xf32> to vector<16x512xf32>
    %c12 = arith.constant 12 : index
    %c0_52 = arith.constant 0 : index
    %86 = vector.load %arg2[%c12, %c0_52] : memref<27x512xf32, #tpu.memory_space<vmem>>, vector<1x512xf32>
    %87 = vector.broadcast %86 : vector<1x512xf32> to vector<16x512xf32>
    %88 = arith.mulf %85, %87 : vector<16x512xf32>
    %89 = arith.truncf %88 : vector<16x512xf32> to vector<16x512xbf16>
    %c192 = arith.constant 192 : index
    %c0_53 = arith.constant 0 : index
    %90 = vector.load %arg12[%c192, %c0_53] : memref<432x512xbf16, #tpu.memory_space<vmem>>, vector<16x512xbf16>
    tpu.vector_store %arg12[%c192, %c0_53], %89 {strides = array<i32>} : memref<432x512xbf16, #tpu.memory_space<vmem>>, vector<16x512xbf16>,
    %c0_54 = arith.constant 0 : index
    %c0_55 = arith.constant 0 : index
    %c128_56 = arith.constant 128 : index
    %91 = vector.load %arg1[%c0_54, %c0_55, %c128_56] : memref<1x16x768xf32, #tpu.memory_space<vmem>>, vector<1x16x512xf32>
    %92 = vector.shape_cast %91 : vector<1x16x512xf32> to vector<16x512xf32>
    %93 = arith.truncf %92 : vector<16x512xf32> to vector<16x512xbf16>
    %c208 = arith.constant 208 : index
    %c0_57 = arith.constant 0 : index
    %94 = vector.load %arg12[%c208, %c0_57] : memref<432x512xbf16, #tpu.memory_space<vmem>>, vector<16x512xbf16>
    tpu.vector_store %arg12[%c208, %c0_57], %93 {strides = array<i32>} : memref<432x512xbf16, #tpu.memory_space<vmem>>, vector<16x512xbf16>,
    %c0_58 = arith.constant 0 : index
    %c0_59 = arith.constant 0 : index
    %c129 = arith.constant 129 : index
    %95 = vector.load %arg1[%c0_58, %c0_59, %c129] : memref<1x16x768xf32, #tpu.memory_space<vmem>>, vector<1x16x512xf32>
    %96 = vector.shape_cast %95 : vector<1x16x512xf32> to vector<16x512xf32>
    %c14 = arith.constant 14 : index
    %c0_60 = arith.constant 0 : index
    %97 = vector.load %arg2[%c14, %c0_60] : memref<27x512xf32, #tpu.memory_space<vmem>>, vector<1x512xf32>
    %98 = vector.broadcast %97 : vector<1x512xf32> to vector<16x512xf32>
    %99 = arith.mulf %96, %98 : vector<16x512xf32>
    %100 = arith.truncf %99 : vector<16x512xf32> to vector<16x512xbf16>
    %c224 = arith.constant 224 : index
    %c0_61 = arith.constant 0 : index
    %101 = vector.load %arg12[%c224, %c0_61] : memref<432x512xbf16, #tpu.memory_space<vmem>>, vector<16x512xbf16>
    tpu.vector_store %arg12[%c224, %c0_61], %100 {strides = array<i32>} : memref<432x512xbf16, #tpu.memory_space<vmem>>, vector<16x512xbf16>,
    %c0_62 = arith.constant 0 : index
    %c0_63 = arith.constant 0 : index
    %c135 = arith.constant 135 : index
    %102 = vector.load %arg1[%c0_62, %c0_63, %c135] : memref<1x16x768xf32, #tpu.memory_space<vmem>>, vector<1x16x512xf32>
    %103 = vector.shape_cast %102 : vector<1x16x512xf32> to vector<16x512xf32>
    %c15 = arith.constant 15 : index
    %c0_64 = arith.constant 0 : index
    %104 = vector.load %arg2[%c15, %c0_64] : memref<27x512xf32, #tpu.memory_space<vmem>>, vector<1x512xf32>
    %105 = vector.broadcast %104 : vector<1x512xf32> to vector<16x512xf32>
    %106 = arith.mulf %103, %105 : vector<16x512xf32>
    %107 = arith.truncf %106 : vector<16x512xf32> to vector<16x512xbf16>
    %c240 = arith.constant 240 : index
    %c0_65 = arith.constant 0 : index
    %108 = vector.load %arg12[%c240, %c0_65] : memref<432x512xbf16, #tpu.memory_space<vmem>>, vector<16x512xbf16>
    tpu.vector_store %arg12[%c240, %c0_65], %107 {strides = array<i32>} : memref<432x512xbf16, #tpu.memory_space<vmem>>, vector<16x512xbf16>,
    %c0_66 = arith.constant 0 : index
    %c0_67 = arith.constant 0 : index
    %c136 = arith.constant 136 : index
    %109 = vector.load %arg1[%c0_66, %c0_67, %c136] : memref<1x16x768xf32, #tpu.memory_space<vmem>>, vector<1x16x512xf32>
    %110 = vector.shape_cast %109 : vector<1x16x512xf32> to vector<16x512xf32>
    %c16_68 = arith.constant 16 : index
    %c0_69 = arith.constant 0 : index
    %111 = vector.load %arg2[%c16_68, %c0_69] : memref<27x512xf32, #tpu.memory_space<vmem>>, vector<1x512xf32>
    %112 = vector.broadcast %111 : vector<1x512xf32> to vector<16x512xf32>
    %113 = arith.mulf %110, %112 : vector<16x512xf32>
    %114 = arith.truncf %113 : vector<16x512xf32> to vector<16x512xbf16>
    %c256 = arith.constant 256 : index
    %c0_70 = arith.constant 0 : index
    %115 = vector.load %arg12[%c256, %c0_70] : memref<432x512xbf16, #tpu.memory_space<vmem>>, vector<16x512xbf16>
    tpu.vector_store %arg12[%c256, %c0_70], %114 {strides = array<i32>} : memref<432x512xbf16, #tpu.memory_space<vmem>>, vector<16x512xbf16>,
    %c0_71 = arith.constant 0 : index
    %c0_72 = arith.constant 0 : index
    %c137 = arith.constant 137 : index
    %116 = vector.load %arg1[%c0_71, %c0_72, %c137] : memref<1x16x768xf32, #tpu.memory_space<vmem>>, vector<1x16x512xf32>
    %117 = vector.shape_cast %116 : vector<1x16x512xf32> to vector<16x512xf32>
    %c17 = arith.constant 17 : index
    %c0_73 = arith.constant 0 : index
    %118 = vector.load %arg2[%c17, %c0_73] : memref<27x512xf32, #tpu.memory_space<vmem>>, vector<1x512xf32>
    %119 = vector.broadcast %118 : vector<1x512xf32> to vector<16x512xf32>
    %120 = arith.mulf %117, %119 : vector<16x512xf32>
    %121 = arith.truncf %120 : vector<16x512xf32> to vector<16x512xbf16>
    %c272 = arith.constant 272 : index
    %c0_74 = arith.constant 0 : index
    %122 = vector.load %arg12[%c272, %c0_74] : memref<432x512xbf16, #tpu.memory_space<vmem>>, vector<16x512xbf16>
    tpu.vector_store %arg12[%c272, %c0_74], %121 {strides = array<i32>} : memref<432x512xbf16, #tpu.memory_space<vmem>>, vector<16x512xbf16>,
    %c0_75 = arith.constant 0 : index
    %c0_76 = arith.constant 0 : index
    %c183 = arith.constant 183 : index
    %123 = vector.load %arg1[%c0_75, %c0_76, %c183] : memref<1x16x768xf32, #tpu.memory_space<vmem>>, vector<1x16x512xf32>
    %124 = vector.shape_cast %123 : vector<1x16x512xf32> to vector<16x512xf32>
    %c18 = arith.constant 18 : index
    %c0_77 = arith.constant 0 : index
    %125 = vector.load %arg2[%c18, %c0_77] : memref<27x512xf32, #tpu.memory_space<vmem>>, vector<1x512xf32>
    %126 = vector.broadcast %125 : vector<1x512xf32> to vector<16x512xf32>
    %127 = arith.mulf %124, %126 : vector<16x512xf32>
    %128 = arith.truncf %127 : vector<16x512xf32> to vector<16x512xbf16>
    %c288 = arith.constant 288 : index
    %c0_78 = arith.constant 0 : index
    %129 = vector.load %arg12[%c288, %c0_78] : memref<432x512xbf16, #tpu.memory_space<vmem>>, vector<16x512xbf16>
    tpu.vector_store %arg12[%c288, %c0_78], %128 {strides = array<i32>} : memref<432x512xbf16, #tpu.memory_space<vmem>>, vector<16x512xbf16>,
    %c0_79 = arith.constant 0 : index
    %c0_80 = arith.constant 0 : index
    %c184 = arith.constant 184 : index
    %130 = vector.load %arg1[%c0_79, %c0_80, %c184] : memref<1x16x768xf32, #tpu.memory_space<vmem>>, vector<1x16x512xf32>
    %131 = vector.shape_cast %130 : vector<1x16x512xf32> to vector<16x512xf32>
    %c19 = arith.constant 19 : index
    %c0_81 = arith.constant 0 : index
    %132 = vector.load %arg2[%c19, %c0_81] : memref<27x512xf32, #tpu.memory_space<vmem>>, vector<1x512xf32>
    %133 = vector.broadcast %132 : vector<1x512xf32> to vector<16x512xf32>
    %134 = arith.mulf %131, %133 : vector<16x512xf32>
    %135 = arith.truncf %134 : vector<16x512xf32> to vector<16x512xbf16>
    %c304 = arith.constant 304 : index
    %c0_82 = arith.constant 0 : index
    %136 = vector.load %arg12[%c304, %c0_82] : memref<432x512xbf16, #tpu.memory_space<vmem>>, vector<16x512xbf16>
    tpu.vector_store %arg12[%c304, %c0_82], %135 {strides = array<i32>} : memref<432x512xbf16, #tpu.memory_space<vmem>>, vector<16x512xbf16>,
    %c0_83 = arith.constant 0 : index
    %c0_84 = arith.constant 0 : index
    %c185 = arith.constant 185 : index
    %137 = vector.load %arg1[%c0_83, %c0_84, %c185] : memref<1x16x768xf32, #tpu.memory_space<vmem>>, vector<1x16x512xf32>
    %138 = vector.shape_cast %137 : vector<1x16x512xf32> to vector<16x512xf32>
    %c20 = arith.constant 20 : index
    %c0_85 = arith.constant 0 : index
    %139 = vector.load %arg2[%c20, %c0_85] : memref<27x512xf32, #tpu.memory_space<vmem>>, vector<1x512xf32>
    %140 = vector.broadcast %139 : vector<1x512xf32> to vector<16x512xf32>
    %141 = arith.mulf %138, %140 : vector<16x512xf32>
    %142 = arith.truncf %141 : vector<16x512xf32> to vector<16x512xbf16>
    %c320 = arith.constant 320 : index
    %c0_86 = arith.constant 0 : index
    %143 = vector.load %arg12[%c320, %c0_86] : memref<432x512xbf16, #tpu.memory_space<vmem>>, vector<16x512xbf16>
    tpu.vector_store %arg12[%c320, %c0_86], %142 {strides = array<i32>} : memref<432x512xbf16, #tpu.memory_space<vmem>>, vector<16x512xbf16>,
    %c0_87 = arith.constant 0 : index
    %c0_88 = arith.constant 0 : index
    %c191 = arith.constant 191 : index
    %144 = vector.load %arg1[%c0_87, %c0_88, %c191] : memref<1x16x768xf32, #tpu.memory_space<vmem>>, vector<1x16x512xf32>
    %145 = vector.shape_cast %144 : vector<1x16x512xf32> to vector<16x512xf32>
    %c21 = arith.constant 21 : index
    %c0_89 = arith.constant 0 : index
    %146 = vector.load %arg2[%c21, %c0_89] : memref<27x512xf32, #tpu.memory_space<vmem>>, vector<1x512xf32>
    %147 = vector.broadcast %146 : vector<1x512xf32> to vector<16x512xf32>
    %148 = arith.mulf %145, %147 : vector<16x512xf32>
    %149 = arith.truncf %148 : vector<16x512xf32> to vector<16x512xbf16>
    %c336 = arith.constant 336 : index
    %c0_90 = arith.constant 0 : index
    %150 = vector.load %arg12[%c336, %c0_90] : memref<432x512xbf16, #tpu.memory_space<vmem>>, vector<16x512xbf16>
    tpu.vector_store %arg12[%c336, %c0_90], %149 {strides = array<i32>} : memref<432x512xbf16, #tpu.memory_space<vmem>>, vector<16x512xbf16>,
    %c0_91 = arith.constant 0 : index
    %c0_92 = arith.constant 0 : index
    %c192_93 = arith.constant 192 : index
    %151 = vector.load %arg1[%c0_91, %c0_92, %c192_93] : memref<1x16x768xf32, #tpu.memory_space<vmem>>, vector<1x16x512xf32>
    %152 = vector.shape_cast %151 : vector<1x16x512xf32> to vector<16x512xf32>
    %c22 = arith.constant 22 : index
    %c0_94 = arith.constant 0 : index
    %153 = vector.load %arg2[%c22, %c0_94] : memref<27x512xf32, #tpu.memory_space<vmem>>, vector<1x512xf32>
    %154 = vector.broadcast %153 : vector<1x512xf32> to vector<16x512xf32>
    %155 = arith.mulf %152, %154 : vector<16x512xf32>
    %156 = arith.truncf %155 : vector<16x512xf32> to vector<16x512xbf16>
    %c352 = arith.constant 352 : index
    %c0_95 = arith.constant 0 : index
    %157 = vector.load %arg12[%c352, %c0_95] : memref<432x512xbf16, #tpu.memory_space<vmem>>, vector<16x512xbf16>
    tpu.vector_store %arg12[%c352, %c0_95], %156 {strides = array<i32>} : memref<432x512xbf16, #tpu.memory_space<vmem>>, vector<16x512xbf16>,
    %c0_96 = arith.constant 0 : index
    %c0_97 = arith.constant 0 : index
    %c193 = arith.constant 193 : index
    %158 = vector.load %arg1[%c0_96, %c0_97, %c193] : memref<1x16x768xf32, #tpu.memory_space<vmem>>, vector<1x16x512xf32>
    %159 = vector.shape_cast %158 : vector<1x16x512xf32> to vector<16x512xf32>
    %c23 = arith.constant 23 : index
    %c0_98 = arith.constant 0 : index
    %160 = vector.load %arg2[%c23, %c0_98] : memref<27x512xf32, #tpu.memory_space<vmem>>, vector<1x512xf32>
    %161 = vector.broadcast %160 : vector<1x512xf32> to vector<16x512xf32>
    %162 = arith.mulf %159, %161 : vector<16x512xf32>
    %163 = arith.truncf %162 : vector<16x512xf32> to vector<16x512xbf16>
    %c368 = arith.constant 368 : index
    %c0_99 = arith.constant 0 : index
    %164 = vector.load %arg12[%c368, %c0_99] : memref<432x512xbf16, #tpu.memory_space<vmem>>, vector<16x512xbf16>
    tpu.vector_store %arg12[%c368, %c0_99], %163 {strides = array<i32>} : memref<432x512xbf16, #tpu.memory_space<vmem>>, vector<16x512xbf16>,
    %c0_100 = arith.constant 0 : index
    %c0_101 = arith.constant 0 : index
    %c199 = arith.constant 199 : index
    %165 = vector.load %arg1[%c0_100, %c0_101, %c199] : memref<1x16x768xf32, #tpu.memory_space<vmem>>, vector<1x16x512xf32>
    %166 = vector.shape_cast %165 : vector<1x16x512xf32> to vector<16x512xf32>
    %c24 = arith.constant 24 : index
    %c0_102 = arith.constant 0 : index
    %167 = vector.load %arg2[%c24, %c0_102] : memref<27x512xf32, #tpu.memory_space<vmem>>, vector<1x512xf32>
    %168 = vector.broadcast %167 : vector<1x512xf32> to vector<16x512xf32>
    %169 = arith.mulf %166, %168 : vector<16x512xf32>
    %170 = arith.truncf %169 : vector<16x512xf32> to vector<16x512xbf16>
    %c384 = arith.constant 384 : index
    %c0_103 = arith.constant 0 : index
    %171 = vector.load %arg12[%c384, %c0_103] : memref<432x512xbf16, #tpu.memory_space<vmem>>, vector<16x512xbf16>
    tpu.vector_store %arg12[%c384, %c0_103], %170 {strides = array<i32>} : memref<432x512xbf16, #tpu.memory_space<vmem>>, vector<16x512xbf16>,
    %c0_104 = arith.constant 0 : index
    %c0_105 = arith.constant 0 : index
    %c200 = arith.constant 200 : index
    %172 = vector.load %arg1[%c0_104, %c0_105, %c200] : memref<1x16x768xf32, #tpu.memory_space<vmem>>, vector<1x16x512xf32>
    %173 = vector.shape_cast %172 : vector<1x16x512xf32> to vector<16x512xf32>
    %c25 = arith.constant 25 : index
    %c0_106 = arith.constant 0 : index
    %174 = vector.load %arg2[%c25, %c0_106] : memref<27x512xf32, #tpu.memory_space<vmem>>, vector<1x512xf32>
    %175 = vector.broadcast %174 : vector<1x512xf32> to vector<16x512xf32>
    %176 = arith.mulf %173, %175 : vector<16x512xf32>
    %177 = arith.truncf %176 : vector<16x512xf32> to vector<16x512xbf16>
    %c400 = arith.constant 400 : index
    %c0_107 = arith.constant 0 : index
    %178 = vector.load %arg12[%c400, %c0_107] : memref<432x512xbf16, #tpu.memory_space<vmem>>, vector<16x512xbf16>
    tpu.vector_store %arg12[%c400, %c0_107], %177 {strides = array<i32>} : memref<432x512xbf16, #tpu.memory_space<vmem>>, vector<16x512xbf16>,
    %c0_108 = arith.constant 0 : index
    %c0_109 = arith.constant 0 : index
    %c201 = arith.constant 201 : index
    %179 = vector.load %arg1[%c0_108, %c0_109, %c201] : memref<1x16x768xf32, #tpu.memory_space<vmem>>, vector<1x16x512xf32>
    %180 = vector.shape_cast %179 : vector<1x16x512xf32> to vector<16x512xf32>
    %c26 = arith.constant 26 : index
    %c0_110 = arith.constant 0 : index
    %181 = vector.load %arg2[%c26, %c0_110] : memref<27x512xf32, #tpu.memory_space<vmem>>, vector<1x512xf32>
    %182 = vector.broadcast %181 : vector<1x512xf32> to vector<16x512xf32>
    %183 = arith.mulf %180, %182 : vector<16x512xf32>
    %184 = arith.truncf %183 : vector<16x512xf32> to vector<16x512xbf16>
    %c416 = arith.constant 416 : index
    %c0_111 = arith.constant 0 : index
    %185 = vector.load %arg12[%c416, %c0_111] : memref<432x512xbf16, #tpu.memory_space<vmem>>, vector<16x512xbf16>
    tpu.vector_store %arg12[%c416, %c0_111], %184 {strides = array<i32>} : memref<432x512xbf16, #tpu.memory_space<vmem>>, vector<16x512xbf16>,
    %c0_112 = arith.constant 0 : index
    %c0_113 = arith.constant 0 : index
    %186 = vector.load %arg3[%c0_112, %c0_113] : memref<16x432xbf16, #tpu.memory_space<vmem>>, vector<16x432xbf16>
    %c0_114 = arith.constant 0 : index
    %c0_115 = arith.constant 0 : index
    %187 = vector.load %arg12[%c0_114, %c0_115] : memref<432x512xbf16, #tpu.memory_space<vmem>>, vector<432x512xbf16>
    %cst = arith.constant dense<0.000000e+00> : vector<16x512xf32>
    %188 = tpu.matmul %186, %187, %cst {dimension_numbers = #tpu.dot_dimension_numbers<[1], [0], [0], [1], [0, 0, 1, 1], [], []>} : vector<16x432xbf16>, vector<432x512xbf16>, vector<16x512xf32> -> vector<16x512xf32>
    %c0_116 = arith.constant 0 : index
    %c0_117 = arith.constant 0 : index
    %189 = vector.load %arg4[%c0_116, %c0_117] : memref<16x1xf32, #tpu.memory_space<vmem>>, vector<16x1xf32>
    %190 = vector.broadcast %189 : vector<16x1xf32> to vector<16x512xf32>
    %191 = arith.addf %188, %190 : vector<16x512xf32>
    %cst_118 = arith.constant 0.000000e+00 : f32
    %192 = vector.broadcast %cst_118 : f32 to vector<16x512xf32>
    %193 = arith.maximumf %191, %192 : vector<16x512xf32>
    %c0_119 = arith.constant 0 : index
    %c0_120 = arith.constant 0 : index
    %194 = vector.load %arg5[%c0_119, %c0_120] : memref<16x1xf32, #tpu.memory_space<vmem>>, vector<16x1xf32>
    %195 = vector.broadcast %194 : vector<16x1xf32> to vector<16x512xf32>
    %196 = arith.mulf %193, %195 : vector<16x512xf32>
    %c0_121 = arith.constant 0 : index
    %c0_122 = arith.constant 0 : index
    %197 = vector.load %arg6[%c0_121, %c0_122] : memref<16x1xf32, #tpu.memory_space<vmem>>, vector<16x1xf32>
    %198 = vector.broadcast %197 : vector<16x1xf32> to vector<16x512xf32>
    %199 = arith.addf %196, %198 : vector<16x512xf32>
    %cst_123 = arith.constant 0.000000e+00 : bf16
    %200 = vector.broadcast %cst_123 : bf16 to vector<16x128xbf16>
    %c0_124 = arith.constant 0 : index
    %c0_125 = arith.constant 0 : index
    %201 = vector.load %arg13[%c0_124, %c0_125] : memref<16x768xbf16, #tpu.memory_space<vmem>>, vector<16x128xbf16>
    tpu.vector_store %arg13[%c0_124, %c0_125], %200 {strides = array<i32>} : memref<16x768xbf16, #tpu.memory_space<vmem>>, vector<16x128xbf16>,
    %cst_126 = arith.constant 0.000000e+00 : bf16
    %202 = vector.broadcast %cst_126 : bf16 to vector<16x128xbf16>
    %c0_127 = arith.constant 0 : index
    %c640 = arith.constant 640 : index
    %203 = vector.load %arg13[%c0_127, %c640] : memref<16x768xbf16, #tpu.memory_space<vmem>>, vector<16x128xbf16>
    tpu.vector_store %arg13[%c0_127, %c640], %202 {strides = array<i32>} : memref<16x768xbf16, #tpu.memory_space<vmem>>, vector<16x128xbf16>,
    %204 = arith.truncf %199 : vector<16x512xf32> to vector<16x512xbf16>
    %c0_128 = arith.constant 0 : index
    %c128_129 = arith.constant 128 : index
    %205 = vector.load %arg13[%c0_128, %c128_129] : memref<16x768xbf16, #tpu.memory_space<vmem>>, vector<16x512xbf16>
    tpu.vector_store %arg13[%c0_128, %c128_129], %204 {strides = array<i32>} : memref<16x768xbf16, #tpu.memory_space<vmem>>, vector<16x512xbf16>,
    %c0_130 = arith.constant 0 : index
    %c55_131 = arith.constant 55 : index
    %206 = vector.load %arg13[%c0_130, %c55_131] : memref<16x768xbf16, #tpu.memory_space<vmem>>, vector<16x512xbf16>
    %c0_132 = arith.constant 0 : index
    %c0_133 = arith.constant 0 : index
    %207 = vector.load %arg2[%c0_132, %c0_133] : memref<27x512xf32, #tpu.memory_space<vmem>>, vector<1x512xf32>
    %208 = arith.extf %206 : vector<16x512xbf16> to vector<16x512xf32>
    %209 = vector.broadcast %207 : vector<1x512xf32> to vector<16x512xf32>
    %210 = arith.mulf %208, %209 : vector<16x512xf32>
    %211 = arith.truncf %210 : vector<16x512xf32> to vector<16x512xbf16>
    %c0_134 = arith.constant 0 : index
    %c0_135 = arith.constant 0 : index
    %212 = vector.load %arg12[%c0_134, %c0_135] : memref<432x512xbf16, #tpu.memory_space<vmem>>, vector<16x512xbf16>
    tpu.vector_store %arg12[%c0_134, %c0_135], %211 {strides = array<i32>} : memref<432x512xbf16, #tpu.memory_space<vmem>>, vector<16x512xbf16>,
    %c0_136 = arith.constant 0 : index
    %c56_137 = arith.constant 56 : index
    %213 = vector.load %arg13[%c0_136, %c56_137] : memref<16x768xbf16, #tpu.memory_space<vmem>>, vector<16x512xbf16>
    %c1_138 = arith.constant 1 : index
    %c0_139 = arith.constant 0 : index
    %214 = vector.load %arg2[%c1_138, %c0_139] : memref<27x512xf32, #tpu.memory_space<vmem>>, vector<1x512xf32>
    %215 = arith.extf %213 : vector<16x512xbf16> to vector<16x512xf32>
    %216 = vector.broadcast %214 : vector<1x512xf32> to vector<16x512xf32>
    %217 = arith.mulf %215, %216 : vector<16x512xf32>
    %218 = arith.truncf %217 : vector<16x512xf32> to vector<16x512xbf16>
    %c16_140 = arith.constant 16 : index
    %c0_141 = arith.constant 0 : index
    %219 = vector.load %arg12[%c16_140, %c0_141] : memref<432x512xbf16, #tpu.memory_space<vmem>>, vector<16x512xbf16>
    tpu.vector_store %arg12[%c16_140, %c0_141], %218 {strides = array<i32>} : memref<432x512xbf16, #tpu.memory_space<vmem>>, vector<16x512xbf16>,
    %c0_142 = arith.constant 0 : index
    %c57_143 = arith.constant 57 : index
    %220 = vector.load %arg13[%c0_142, %c57_143] : memref<16x768xbf16, #tpu.memory_space<vmem>>, vector<16x512xbf16>
    %c2_144 = arith.constant 2 : index
    %c0_145 = arith.constant 0 : index
    %221 = vector.load %arg2[%c2_144, %c0_145] : memref<27x512xf32, #tpu.memory_space<vmem>>, vector<1x512xf32>
    %222 = arith.extf %220 : vector<16x512xbf16> to vector<16x512xf32>
    %223 = vector.broadcast %221 : vector<1x512xf32> to vector<16x512xf32>
    %224 = arith.mulf %222, %223 : vector<16x512xf32>
    %225 = arith.truncf %224 : vector<16x512xf32> to vector<16x512xbf16>
    %c32_146 = arith.constant 32 : index
    %c0_147 = arith.constant 0 : index
    %226 = vector.load %arg12[%c32_146, %c0_147] : memref<432x512xbf16, #tpu.memory_space<vmem>>, vector<16x512xbf16>
    tpu.vector_store %arg12[%c32_146, %c0_147], %225 {strides = array<i32>} : memref<432x512xbf16, #tpu.memory_space<vmem>>, vector<16x512xbf16>,
    %c0_148 = arith.constant 0 : index
    %c63_149 = arith.constant 63 : index
    %227 = vector.load %arg13[%c0_148, %c63_149] : memref<16x768xbf16, #tpu.memory_space<vmem>>, vector<16x512xbf16>
    %c3_150 = arith.constant 3 : index
    %c0_151 = arith.constant 0 : index
    %228 = vector.load %arg2[%c3_150, %c0_151] : memref<27x512xf32, #tpu.memory_space<vmem>>, vector<1x512xf32>
    %229 = arith.extf %227 : vector<16x512xbf16> to vector<16x512xf32>
    %230 = vector.broadcast %228 : vector<1x512xf32> to vector<16x512xf32>
    %231 = arith.mulf %229, %230 : vector<16x512xf32>
    %232 = arith.truncf %231 : vector<16x512xf32> to vector<16x512xbf16>
    %c48_152 = arith.constant 48 : index
    %c0_153 = arith.constant 0 : index
    %233 = vector.load %arg12[%c48_152, %c0_153] : memref<432x512xbf16, #tpu.memory_space<vmem>>, vector<16x512xbf16>
    tpu.vector_store %arg12[%c48_152, %c0_153], %232 {strides = array<i32>} : memref<432x512xbf16, #tpu.memory_space<vmem>>, vector<16x512xbf16>,
    %c0_154 = arith.constant 0 : index
    %c64_155 = arith.constant 64 : index
    %234 = vector.load %arg13[%c0_154, %c64_155] : memref<16x768xbf16, #tpu.memory_space<vmem>>, vector<16x512xbf16>
    %c4_156 = arith.constant 4 : index
    %c0_157 = arith.constant 0 : index
    %235 = vector.load %arg2[%c4_156, %c0_157] : memref<27x512xf32, #tpu.memory_space<vmem>>, vector<1x512xf32>
    %236 = arith.extf %234 : vector<16x512xbf16> to vector<16x512xf32>
    %237 = vector.broadcast %235 : vector<1x512xf32> to vector<16x512xf32>
    %238 = arith.mulf %236, %237 : vector<16x512xf32>
    %239 = arith.truncf %238 : vector<16x512xf32> to vector<16x512xbf16>
    %c64_158 = arith.constant 64 : index
    %c0_159 = arith.constant 0 : index
    %240 = vector.load %arg12[%c64_158, %c0_159] : memref<432x512xbf16, #tpu.memory_space<vmem>>, vector<16x512xbf16>
    tpu.vector_store %arg12[%c64_158, %c0_159], %239 {strides = array<i32>} : memref<432x512xbf16, #tpu.memory_space<vmem>>, vector<16x512xbf16>,
    %c0_160 = arith.constant 0 : index
    %c65_161 = arith.constant 65 : index
    %241 = vector.load %arg13[%c0_160, %c65_161] : memref<16x768xbf16, #tpu.memory_space<vmem>>, vector<16x512xbf16>
    %c5_162 = arith.constant 5 : index
    %c0_163 = arith.constant 0 : index
    %242 = vector.load %arg2[%c5_162, %c0_163] : memref<27x512xf32, #tpu.memory_space<vmem>>, vector<1x512xf32>
    %243 = arith.extf %241 : vector<16x512xbf16> to vector<16x512xf32>
    %244 = vector.broadcast %242 : vector<1x512xf32> to vector<16x512xf32>
    %245 = arith.mulf %243, %244 : vector<16x512xf32>
    %246 = arith.truncf %245 : vector<16x512xf32> to vector<16x512xbf16>
    %c80_164 = arith.constant 80 : index
    %c0_165 = arith.constant 0 : index
    %247 = vector.load %arg12[%c80_164, %c0_165] : memref<432x512xbf16, #tpu.memory_space<vmem>>, vector<16x512xbf16>
    tpu.vector_store %arg12[%c80_164, %c0_165], %246 {strides = array<i32>} : memref<432x512xbf16, #tpu.memory_space<vmem>>, vector<16x512xbf16>,
    %c0_166 = arith.constant 0 : index
    %c71_167 = arith.constant 71 : index
    %248 = vector.load %arg13[%c0_166, %c71_167] : memref<16x768xbf16, #tpu.memory_space<vmem>>, vector<16x512xbf16>
    %c6_168 = arith.constant 6 : index
    %c0_169 = arith.constant 0 : index
    %249 = vector.load %arg2[%c6_168, %c0_169] : memref<27x512xf32, #tpu.memory_space<vmem>>, vector<1x512xf32>
    %250 = arith.extf %248 : vector<16x512xbf16> to vector<16x512xf32>
    %251 = vector.broadcast %249 : vector<1x512xf32> to vector<16x512xf32>
    %252 = arith.mulf %250, %251 : vector<16x512xf32>
    %253 = arith.truncf %252 : vector<16x512xf32> to vector<16x512xbf16>
    %c96_170 = arith.constant 96 : index
    %c0_171 = arith.constant 0 : index
    %254 = vector.load %arg12[%c96_170, %c0_171] : memref<432x512xbf16, #tpu.memory_space<vmem>>, vector<16x512xbf16>
    tpu.vector_store %arg12[%c96_170, %c0_171], %253 {strides = array<i32>} : memref<432x512xbf16, #tpu.memory_space<vmem>>, vector<16x512xbf16>,
    %c0_172 = arith.constant 0 : index
    %c72_173 = arith.constant 72 : index
    %255 = vector.load %arg13[%c0_172, %c72_173] : memref<16x768xbf16, #tpu.memory_space<vmem>>, vector<16x512xbf16>
    %c7_174 = arith.constant 7 : index
    %c0_175 = arith.constant 0 : index
    %256 = vector.load %arg2[%c7_174, %c0_175] : memref<27x512xf32, #tpu.memory_space<vmem>>, vector<1x512xf32>
    %257 = arith.extf %255 : vector<16x512xbf16> to vector<16x512xf32>
    %258 = vector.broadcast %256 : vector<1x512xf32> to vector<16x512xf32>
    %259 = arith.mulf %257, %258 : vector<16x512xf32>
    %260 = arith.truncf %259 : vector<16x512xf32> to vector<16x512xbf16>
    %c112_176 = arith.constant 112 : index
    %c0_177 = arith.constant 0 : index
    %261 = vector.load %arg12[%c112_176, %c0_177] : memref<432x512xbf16, #tpu.memory_space<vmem>>, vector<16x512xbf16>
    tpu.vector_store %arg12[%c112_176, %c0_177], %260 {strides = array<i32>} : memref<432x512xbf16, #tpu.memory_space<vmem>>, vector<16x512xbf16>,
    %c0_178 = arith.constant 0 : index
    %c73_179 = arith.constant 73 : index
    %262 = vector.load %arg13[%c0_178, %c73_179] : memref<16x768xbf16, #tpu.memory_space<vmem>>, vector<16x512xbf16>
    %c8_180 = arith.constant 8 : index
    %c0_181 = arith.constant 0 : index
    %263 = vector.load %arg2[%c8_180, %c0_181] : memref<27x512xf32, #tpu.memory_space<vmem>>, vector<1x512xf32>
    %264 = arith.extf %262 : vector<16x512xbf16> to vector<16x512xf32>
    %265 = vector.broadcast %263 : vector<1x512xf32> to vector<16x512xf32>
    %266 = arith.mulf %264, %265 : vector<16x512xf32>
    %267 = arith.truncf %266 : vector<16x512xf32> to vector<16x512xbf16>
    %c128_182 = arith.constant 128 : index
    %c0_183 = arith.constant 0 : index
    %268 = vector.load %arg12[%c128_182, %c0_183] : memref<432x512xbf16, #tpu.memory_space<vmem>>, vector<16x512xbf16>
    tpu.vector_store %arg12[%c128_182, %c0_183], %267 {strides = array<i32>} : memref<432x512xbf16, #tpu.memory_space<vmem>>, vector<16x512xbf16>,
    %c0_184 = arith.constant 0 : index
    %c119_185 = arith.constant 119 : index
    %269 = vector.load %arg13[%c0_184, %c119_185] : memref<16x768xbf16, #tpu.memory_space<vmem>>, vector<16x512xbf16>
    %c9_186 = arith.constant 9 : index
    %c0_187 = arith.constant 0 : index
    %270 = vector.load %arg2[%c9_186, %c0_187] : memref<27x512xf32, #tpu.memory_space<vmem>>, vector<1x512xf32>
    %271 = arith.extf %269 : vector<16x512xbf16> to vector<16x512xf32>
    %272 = vector.broadcast %270 : vector<1x512xf32> to vector<16x512xf32>
    %273 = arith.mulf %271, %272 : vector<16x512xf32>
    %274 = arith.truncf %273 : vector<16x512xf32> to vector<16x512xbf16>
    %c144_188 = arith.constant 144 : index
    %c0_189 = arith.constant 0 : index
    %275 = vector.load %arg12[%c144_188, %c0_189] : memref<432x512xbf16, #tpu.memory_space<vmem>>, vector<16x512xbf16>
    tpu.vector_store %arg12[%c144_188, %c0_189], %274 {strides = array<i32>} : memref<432x512xbf16, #tpu.memory_space<vmem>>, vector<16x512xbf16>,
    %c0_190 = arith.constant 0 : index
    %c120_191 = arith.constant 120 : index
    %276 = vector.load %arg13[%c0_190, %c120_191] : memref<16x768xbf16, #tpu.memory_space<vmem>>, vector<16x512xbf16>
    %c10_192 = arith.constant 10 : index
    %c0_193 = arith.constant 0 : index
    %277 = vector.load %arg2[%c10_192, %c0_193] : memref<27x512xf32, #tpu.memory_space<vmem>>, vector<1x512xf32>
    %278 = arith.extf %276 : vector<16x512xbf16> to vector<16x512xf32>
    %279 = vector.broadcast %277 : vector<1x512xf32> to vector<16x512xf32>
    %280 = arith.mulf %278, %279 : vector<16x512xf32>
    %281 = arith.truncf %280 : vector<16x512xf32> to vector<16x512xbf16>
    %c160_194 = arith.constant 160 : index
    %c0_195 = arith.constant 0 : index
    %282 = vector.load %arg12[%c160_194, %c0_195] : memref<432x512xbf16, #tpu.memory_space<vmem>>, vector<16x512xbf16>
    tpu.vector_store %arg12[%c160_194, %c0_195], %281 {strides = array<i32>} : memref<432x512xbf16, #tpu.memory_space<vmem>>, vector<16x512xbf16>,
    %c0_196 = arith.constant 0 : index
    %c121_197 = arith.constant 121 : index
    %283 = vector.load %arg13[%c0_196, %c121_197] : memref<16x768xbf16, #tpu.memory_space<vmem>>, vector<16x512xbf16>
    %c11_198 = arith.constant 11 : index
    %c0_199 = arith.constant 0 : index
    %284 = vector.load %arg2[%c11_198, %c0_199] : memref<27x512xf32, #tpu.memory_space<vmem>>, vector<1x512xf32>
    %285 = arith.extf %283 : vector<16x512xbf16> to vector<16x512xf32>
    %286 = vector.broadcast %284 : vector<1x512xf32> to vector<16x512xf32>
    %287 = arith.mulf %285, %286 : vector<16x512xf32>
    %288 = arith.truncf %287 : vector<16x512xf32> to vector<16x512xbf16>
    %c176_200 = arith.constant 176 : index
    %c0_201 = arith.constant 0 : index
    %289 = vector.load %arg12[%c176_200, %c0_201] : memref<432x512xbf16, #tpu.memory_space<vmem>>, vector<16x512xbf16>
    tpu.vector_store %arg12[%c176_200, %c0_201], %288 {strides = array<i32>} : memref<432x512xbf16, #tpu.memory_space<vmem>>, vector<16x512xbf16>,
    %c0_202 = arith.constant 0 : index
    %c127_203 = arith.constant 127 : index
    %290 = vector.load %arg13[%c0_202, %c127_203] : memref<16x768xbf16, #tpu.memory_space<vmem>>, vector<16x512xbf16>
    %c12_204 = arith.constant 12 : index
    %c0_205 = arith.constant 0 : index
    %291 = vector.load %arg2[%c12_204, %c0_205] : memref<27x512xf32, #tpu.memory_space<vmem>>, vector<1x512xf32>
    %292 = arith.extf %290 : vector<16x512xbf16> to vector<16x512xf32>
    %293 = vector.broadcast %291 : vector<1x512xf32> to vector<16x512xf32>
    %294 = arith.mulf %292, %293 : vector<16x512xf32>
    %295 = arith.truncf %294 : vector<16x512xf32> to vector<16x512xbf16>
    %c192_206 = arith.constant 192 : index
    %c0_207 = arith.constant 0 : index
    %296 = vector.load %arg12[%c192_206, %c0_207] : memref<432x512xbf16, #tpu.memory_space<vmem>>, vector<16x512xbf16>
    tpu.vector_store %arg12[%c192_206, %c0_207], %295 {strides = array<i32>} : memref<432x512xbf16, #tpu.memory_space<vmem>>, vector<16x512xbf16>,
    %c0_208 = arith.constant 0 : index
    %c128_209 = arith.constant 128 : index
    %297 = vector.load %arg13[%c0_208, %c128_209] : memref<16x768xbf16, #tpu.memory_space<vmem>>, vector<16x512xbf16>
    %c208_210 = arith.constant 208 : index
    %c0_211 = arith.constant 0 : index
    %298 = vector.load %arg12[%c208_210, %c0_211] : memref<432x512xbf16, #tpu.memory_space<vmem>>, vector<16x512xbf16>
    tpu.vector_store %arg12[%c208_210, %c0_211], %297 {strides = array<i32>} : memref<432x512xbf16, #tpu.memory_space<vmem>>, vector<16x512xbf16>,
    %c0_212 = arith.constant 0 : index
    %c129_213 = arith.constant 129 : index
    %299 = vector.load %arg13[%c0_212, %c129_213] : memref<16x768xbf16, #tpu.memory_space<vmem>>, vector<16x512xbf16>
    %c14_214 = arith.constant 14 : index
    %c0_215 = arith.constant 0 : index
    %300 = vector.load %arg2[%c14_214, %c0_215] : memref<27x512xf32, #tpu.memory_space<vmem>>, vector<1x512xf32>
    %301 = arith.extf %299 : vector<16x512xbf16> to vector<16x512xf32>
    %302 = vector.broadcast %300 : vector<1x512xf32> to vector<16x512xf32>
    %303 = arith.mulf %301, %302 : vector<16x512xf32>
    %304 = arith.truncf %303 : vector<16x512xf32> to vector<16x512xbf16>
    %c224_216 = arith.constant 224 : index
    %c0_217 = arith.constant 0 : index
    %305 = vector.load %arg12[%c224_216, %c0_217] : memref<432x512xbf16, #tpu.memory_space<vmem>>, vector<16x512xbf16>
    tpu.vector_store %arg12[%c224_216, %c0_217], %304 {strides = array<i32>} : memref<432x512xbf16, #tpu.memory_space<vmem>>, vector<16x512xbf16>,
    %c0_218 = arith.constant 0 : index
    %c135_219 = arith.constant 135 : index
    %306 = vector.load %arg13[%c0_218, %c135_219] : memref<16x768xbf16, #tpu.memory_space<vmem>>, vector<16x512xbf16>
    %c15_220 = arith.constant 15 : index
    %c0_221 = arith.constant 0 : index
    %307 = vector.load %arg2[%c15_220, %c0_221] : memref<27x512xf32, #tpu.memory_space<vmem>>, vector<1x512xf32>
    %308 = arith.extf %306 : vector<16x512xbf16> to vector<16x512xf32>
    %309 = vector.broadcast %307 : vector<1x512xf32> to vector<16x512xf32>
    %310 = arith.mulf %308, %309 : vector<16x512xf32>
    %311 = arith.truncf %310 : vector<16x512xf32> to vector<16x512xbf16>
    %c240_222 = arith.constant 240 : index
    %c0_223 = arith.constant 0 : index
    %312 = vector.load %arg12[%c240_222, %c0_223] : memref<432x512xbf16, #tpu.memory_space<vmem>>, vector<16x512xbf16>
    tpu.vector_store %arg12[%c240_222, %c0_223], %311 {strides = array<i32>} : memref<432x512xbf16, #tpu.memory_space<vmem>>, vector<16x512xbf16>,
    %c0_224 = arith.constant 0 : index
    %c136_225 = arith.constant 136 : index
    %313 = vector.load %arg13[%c0_224, %c136_225] : memref<16x768xbf16, #tpu.memory_space<vmem>>, vector<16x512xbf16>
    %c16_226 = arith.constant 16 : index
    %c0_227 = arith.constant 0 : index
    %314 = vector.load %arg2[%c16_226, %c0_227] : memref<27x512xf32, #tpu.memory_space<vmem>>, vector<1x512xf32>
    %315 = arith.extf %313 : vector<16x512xbf16> to vector<16x512xf32>
    %316 = vector.broadcast %314 : vector<1x512xf32> to vector<16x512xf32>
    %317 = arith.mulf %315, %316 : vector<16x512xf32>
    %318 = arith.truncf %317 : vector<16x512xf32> to vector<16x512xbf16>
    %c256_228 = arith.constant 256 : index
    %c0_229 = arith.constant 0 : index
    %319 = vector.load %arg12[%c256_228, %c0_229] : memref<432x512xbf16, #tpu.memory_space<vmem>>, vector<16x512xbf16>
    tpu.vector_store %arg12[%c256_228, %c0_229], %318 {strides = array<i32>} : memref<432x512xbf16, #tpu.memory_space<vmem>>, vector<16x512xbf16>,
    %c0_230 = arith.constant 0 : index
    %c137_231 = arith.constant 137 : index
    %320 = vector.load %arg13[%c0_230, %c137_231] : memref<16x768xbf16, #tpu.memory_space<vmem>>, vector<16x512xbf16>
    %c17_232 = arith.constant 17 : index
    %c0_233 = arith.constant 0 : index
    %321 = vector.load %arg2[%c17_232, %c0_233] : memref<27x512xf32, #tpu.memory_space<vmem>>, vector<1x512xf32>
    %322 = arith.extf %320 : vector<16x512xbf16> to vector<16x512xf32>
    %323 = vector.broadcast %321 : vector<1x512xf32> to vector<16x512xf32>
    %324 = arith.mulf %322, %323 : vector<16x512xf32>
    %325 = arith.truncf %324 : vector<16x512xf32> to vector<16x512xbf16>
    %c272_234 = arith.constant 272 : index
    %c0_235 = arith.constant 0 : index
    %326 = vector.load %arg12[%c272_234, %c0_235] : memref<432x512xbf16, #tpu.memory_space<vmem>>, vector<16x512xbf16>
    tpu.vector_store %arg12[%c272_234, %c0_235], %325 {strides = array<i32>} : memref<432x512xbf16, #tpu.memory_space<vmem>>, vector<16x512xbf16>,
    %c0_236 = arith.constant 0 : index
    %c183_237 = arith.constant 183 : index
    %327 = vector.load %arg13[%c0_236, %c183_237] : memref<16x768xbf16, #tpu.memory_space<vmem>>, vector<16x512xbf16>
    %c18_238 = arith.constant 18 : index
    %c0_239 = arith.constant 0 : index
    %328 = vector.load %arg2[%c18_238, %c0_239] : memref<27x512xf32, #tpu.memory_space<vmem>>, vector<1x512xf32>
    %329 = arith.extf %327 : vector<16x512xbf16> to vector<16x512xf32>
    %330 = vector.broadcast %328 : vector<1x512xf32> to vector<16x512xf32>
    %331 = arith.mulf %329, %330 : vector<16x512xf32>
    %332 = arith.truncf %331 : vector<16x512xf32> to vector<16x512xbf16>
    %c288_240 = arith.constant 288 : index
    %c0_241 = arith.constant 0 : index
    %333 = vector.load %arg12[%c288_240, %c0_241] : memref<432x512xbf16, #tpu.memory_space<vmem>>, vector<16x512xbf16>
    tpu.vector_store %arg12[%c288_240, %c0_241], %332 {strides = array<i32>} : memref<432x512xbf16, #tpu.memory_space<vmem>>, vector<16x512xbf16>,
    %c0_242 = arith.constant 0 : index
    %c184_243 = arith.constant 184 : index
    %334 = vector.load %arg13[%c0_242, %c184_243] : memref<16x768xbf16, #tpu.memory_space<vmem>>, vector<16x512xbf16>
    %c19_244 = arith.constant 19 : index
    %c0_245 = arith.constant 0 : index
    %335 = vector.load %arg2[%c19_244, %c0_245] : memref<27x512xf32, #tpu.memory_space<vmem>>, vector<1x512xf32>
    %336 = arith.extf %334 : vector<16x512xbf16> to vector<16x512xf32>
    %337 = vector.broadcast %335 : vector<1x512xf32> to vector<16x512xf32>
    %338 = arith.mulf %336, %337 : vector<16x512xf32>
    %339 = arith.truncf %338 : vector<16x512xf32> to vector<16x512xbf16>
    %c304_246 = arith.constant 304 : index
    %c0_247 = arith.constant 0 : index
    %340 = vector.load %arg12[%c304_246, %c0_247] : memref<432x512xbf16, #tpu.memory_space<vmem>>, vector<16x512xbf16>
    tpu.vector_store %arg12[%c304_246, %c0_247], %339 {strides = array<i32>} : memref<432x512xbf16, #tpu.memory_space<vmem>>, vector<16x512xbf16>,
    %c0_248 = arith.constant 0 : index
    %c185_249 = arith.constant 185 : index
    %341 = vector.load %arg13[%c0_248, %c185_249] : memref<16x768xbf16, #tpu.memory_space<vmem>>, vector<16x512xbf16>
    %c20_250 = arith.constant 20 : index
    %c0_251 = arith.constant 0 : index
    %342 = vector.load %arg2[%c20_250, %c0_251] : memref<27x512xf32, #tpu.memory_space<vmem>>, vector<1x512xf32>
    %343 = arith.extf %341 : vector<16x512xbf16> to vector<16x512xf32>
    %344 = vector.broadcast %342 : vector<1x512xf32> to vector<16x512xf32>
    %345 = arith.mulf %343, %344 : vector<16x512xf32>
    %346 = arith.truncf %345 : vector<16x512xf32> to vector<16x512xbf16>
    %c320_252 = arith.constant 320 : index
    %c0_253 = arith.constant 0 : index
    %347 = vector.load %arg12[%c320_252, %c0_253] : memref<432x512xbf16, #tpu.memory_space<vmem>>, vector<16x512xbf16>
    tpu.vector_store %arg12[%c320_252, %c0_253], %346 {strides = array<i32>} : memref<432x512xbf16, #tpu.memory_space<vmem>>, vector<16x512xbf16>,
    %c0_254 = arith.constant 0 : index
    %c191_255 = arith.constant 191 : index
    %348 = vector.load %arg13[%c0_254, %c191_255] : memref<16x768xbf16, #tpu.memory_space<vmem>>, vector<16x512xbf16>
    %c21_256 = arith.constant 21 : index
    %c0_257 = arith.constant 0 : index
    %349 = vector.load %arg2[%c21_256, %c0_257] : memref<27x512xf32, #tpu.memory_space<vmem>>, vector<1x512xf32>
    %350 = arith.extf %348 : vector<16x512xbf16> to vector<16x512xf32>
    %351 = vector.broadcast %349 : vector<1x512xf32> to vector<16x512xf32>
    %352 = arith.mulf %350, %351 : vector<16x512xf32>
    %353 = arith.truncf %352 : vector<16x512xf32> to vector<16x512xbf16>
    %c336_258 = arith.constant 336 : index
    %c0_259 = arith.constant 0 : index
    %354 = vector.load %arg12[%c336_258, %c0_259] : memref<432x512xbf16, #tpu.memory_space<vmem>>, vector<16x512xbf16>
    tpu.vector_store %arg12[%c336_258, %c0_259], %353 {strides = array<i32>} : memref<432x512xbf16, #tpu.memory_space<vmem>>, vector<16x512xbf16>,
    %c0_260 = arith.constant 0 : index
    %c192_261 = arith.constant 192 : index
    %355 = vector.load %arg13[%c0_260, %c192_261] : memref<16x768xbf16, #tpu.memory_space<vmem>>, vector<16x512xbf16>
    %c22_262 = arith.constant 22 : index
    %c0_263 = arith.constant 0 : index
    %356 = vector.load %arg2[%c22_262, %c0_263] : memref<27x512xf32, #tpu.memory_space<vmem>>, vector<1x512xf32>
    %357 = arith.extf %355 : vector<16x512xbf16> to vector<16x512xf32>
    %358 = vector.broadcast %356 : vector<1x512xf32> to vector<16x512xf32>
    %359 = arith.mulf %357, %358 : vector<16x512xf32>
    %360 = arith.truncf %359 : vector<16x512xf32> to vector<16x512xbf16>
    %c352_264 = arith.constant 352 : index
    %c0_265 = arith.constant 0 : index
    %361 = vector.load %arg12[%c352_264, %c0_265] : memref<432x512xbf16, #tpu.memory_space<vmem>>, vector<16x512xbf16>
    tpu.vector_store %arg12[%c352_264, %c0_265], %360 {strides = array<i32>} : memref<432x512xbf16, #tpu.memory_space<vmem>>, vector<16x512xbf16>,
    %c0_266 = arith.constant 0 : index
    %c193_267 = arith.constant 193 : index
    %362 = vector.load %arg13[%c0_266, %c193_267] : memref<16x768xbf16, #tpu.memory_space<vmem>>, vector<16x512xbf16>
    %c23_268 = arith.constant 23 : index
    %c0_269 = arith.constant 0 : index
    %363 = vector.load %arg2[%c23_268, %c0_269] : memref<27x512xf32, #tpu.memory_space<vmem>>, vector<1x512xf32>
    %364 = arith.extf %362 : vector<16x512xbf16> to vector<16x512xf32>
    %365 = vector.broadcast %363 : vector<1x512xf32> to vector<16x512xf32>
    %366 = arith.mulf %364, %365 : vector<16x512xf32>
    %367 = arith.truncf %366 : vector<16x512xf32> to vector<16x512xbf16>
    %c368_270 = arith.constant 368 : index
    %c0_271 = arith.constant 0 : index
    %368 = vector.load %arg12[%c368_270, %c0_271] : memref<432x512xbf16, #tpu.memory_space<vmem>>, vector<16x512xbf16>
    tpu.vector_store %arg12[%c368_270, %c0_271], %367 {strides = array<i32>} : memref<432x512xbf16, #tpu.memory_space<vmem>>, vector<16x512xbf16>,
    %c0_272 = arith.constant 0 : index
    %c199_273 = arith.constant 199 : index
    %369 = vector.load %arg13[%c0_272, %c199_273] : memref<16x768xbf16, #tpu.memory_space<vmem>>, vector<16x512xbf16>
    %c24_274 = arith.constant 24 : index
    %c0_275 = arith.constant 0 : index
    %370 = vector.load %arg2[%c24_274, %c0_275] : memref<27x512xf32, #tpu.memory_space<vmem>>, vector<1x512xf32>
    %371 = arith.extf %369 : vector<16x512xbf16> to vector<16x512xf32>
    %372 = vector.broadcast %370 : vector<1x512xf32> to vector<16x512xf32>
    %373 = arith.mulf %371, %372 : vector<16x512xf32>
    %374 = arith.truncf %373 : vector<16x512xf32> to vector<16x512xbf16>
    %c384_276 = arith.constant 384 : index
    %c0_277 = arith.constant 0 : index
    %375 = vector.load %arg12[%c384_276, %c0_277] : memref<432x512xbf16, #tpu.memory_space<vmem>>, vector<16x512xbf16>
    tpu.vector_store %arg12[%c384_276, %c0_277], %374 {strides = array<i32>} : memref<432x512xbf16, #tpu.memory_space<vmem>>, vector<16x512xbf16>,
    %c0_278 = arith.constant 0 : index
    %c200_279 = arith.constant 200 : index
    %376 = vector.load %arg13[%c0_278, %c200_279] : memref<16x768xbf16, #tpu.memory_space<vmem>>, vector<16x512xbf16>
    %c25_280 = arith.constant 25 : index
    %c0_281 = arith.constant 0 : index
    %377 = vector.load %arg2[%c25_280, %c0_281] : memref<27x512xf32, #tpu.memory_space<vmem>>, vector<1x512xf32>
    %378 = arith.extf %376 : vector<16x512xbf16> to vector<16x512xf32>
    %379 = vector.broadcast %377 : vector<1x512xf32> to vector<16x512xf32>
    %380 = arith.mulf %378, %379 : vector<16x512xf32>
    %381 = arith.truncf %380 : vector<16x512xf32> to vector<16x512xbf16>
    %c400_282 = arith.constant 400 : index
    %c0_283 = arith.constant 0 : index
    %382 = vector.load %arg12[%c400_282, %c0_283] : memref<432x512xbf16, #tpu.memory_space<vmem>>, vector<16x512xbf16>
    tpu.vector_store %arg12[%c400_282, %c0_283], %381 {strides = array<i32>} : memref<432x512xbf16, #tpu.memory_space<vmem>>, vector<16x512xbf16>,
    %c0_284 = arith.constant 0 : index
    %c201_285 = arith.constant 201 : index
    %383 = vector.load %arg13[%c0_284, %c201_285] : memref<16x768xbf16, #tpu.memory_space<vmem>>, vector<16x512xbf16>
    %c26_286 = arith.constant 26 : index
    %c0_287 = arith.constant 0 : index
    %384 = vector.load %arg2[%c26_286, %c0_287] : memref<27x512xf32, #tpu.memory_space<vmem>>, vector<1x512xf32>
    %385 = arith.extf %383 : vector<16x512xbf16> to vector<16x512xf32>
    %386 = vector.broadcast %384 : vector<1x512xf32> to vector<16x512xf32>
    %387 = arith.mulf %385, %386 : vector<16x512xf32>
    %388 = arith.truncf %387 : vector<16x512xf32> to vector<16x512xbf16>
    %c416_288 = arith.constant 416 : index
    %c0_289 = arith.constant 0 : index
    %389 = vector.load %arg12[%c416_288, %c0_289] : memref<432x512xbf16, #tpu.memory_space<vmem>>, vector<16x512xbf16>
    tpu.vector_store %arg12[%c416_288, %c0_289], %388 {strides = array<i32>} : memref<432x512xbf16, #tpu.memory_space<vmem>>, vector<16x512xbf16>,
    %c0_290 = arith.constant 0 : index
    %c0_291 = arith.constant 0 : index
    %390 = vector.load %arg7[%c0_290, %c0_291] : memref<8x432xbf16, #tpu.memory_space<vmem>>, vector<8x432xbf16>
    %c0_292 = arith.constant 0 : index
    %c0_293 = arith.constant 0 : index
    %391 = vector.load %arg12[%c0_292, %c0_293] : memref<432x512xbf16, #tpu.memory_space<vmem>>, vector<432x512xbf16>
    %cst_294 = arith.constant dense<0.000000e+00> : vector<8x512xf32>
    %392 = tpu.matmul %390, %391, %cst_294 {dimension_numbers = #tpu.dot_dimension_numbers<[1], [0], [0], [1], [0, 0, 1, 1], [], []>} : vector<8x432xbf16>, vector<432x512xbf16>, vector<8x512xf32> -> vector<8x512xf32>
    %c0_295 = arith.constant 0 : index
    %c0_296 = arith.constant 0 : index
    %393 = vector.load %arg8[%c0_295, %c0_296] : memref<8x1xf32, #tpu.memory_space<vmem>>, vector<8x1xf32>
    %394 = vector.broadcast %393 : vector<8x1xf32> to vector<8x512xf32>
    %395 = arith.addf %392, %394 : vector<8x512xf32>
    %cst_297 = arith.constant 0.000000e+00 : f32
    %396 = vector.broadcast %cst_297 : f32 to vector<8x512xf32>
    %397 = arith.maximumf %395, %396 : vector<8x512xf32>
    %c0_298 = arith.constant 0 : index
    %c0_299 = arith.constant 0 : index
    %398 = vector.load %arg9[%c0_298, %c0_299] : memref<8x1xf32, #tpu.memory_space<vmem>>, vector<8x1xf32>
    %399 = vector.broadcast %398 : vector<8x1xf32> to vector<8x512xf32>
    %400 = arith.mulf %397, %399 : vector<8x512xf32>
    %c0_300 = arith.constant 0 : index
    %c0_301 = arith.constant 0 : index
    %401 = vector.load %arg10[%c0_300, %c0_301] : memref<8x1xf32, #tpu.memory_space<vmem>>, vector<8x1xf32>
    %402 = vector.broadcast %401 : vector<8x1xf32> to vector<8x512xf32>
    %403 = arith.addf %400, %402 : vector<8x512xf32>
    %c0_302 = arith.constant 0 : index
    %c0_303 = arith.constant 0 : index
    %c0_304 = arith.constant 0 : index
    %404 = vector.load %arg11[%c0_302, %c0_303, %c0_304] : memref<1x8x512xf32, #tpu.memory_space<vmem>>, vector<1x8x512xf32>
    %405 = vector.shape_cast %404 : vector<1x8x512xf32> to vector<8x512xf32>
    %406 = vector.shape_cast %403 : vector<8x512xf32> to vector<1x8x512xf32>
    tpu.vector_store %arg11[%c0_302, %c0_303, %c0_304], %406 {strides = array<i32>} : memref<1x8x512xf32, #tpu.memory_space<vmem>>, vector<1x8x512xf32>,
    return
  }
  func.func @transform_0(%arg0: i32) -> (i32, i32, i32) {
    %c0_i32 = arith.constant 0 : i32
    %c0_i32_0 = arith.constant 0 : i32
    %c0_i32_1 = arith.constant 0 : i32
    return %arg0, %c0_i32, %c0_i32_0 : i32, i32, i32
  }
  func.func @transform_1(%arg0: i32) -> (i32, i32) {
    %c0_i32 = arith.constant 0 : i32
    %c0_i32_0 = arith.constant 0 : i32
    %c0_i32_1 = arith.constant 0 : i32
    return %c0_i32, %c0_i32_0 : i32, i32
  }
  func.func @transform_2(%arg0: i32) -> (i32, i32) {
    %c0_i32 = arith.constant 0 : i32
    %c0_i32_0 = arith.constant 0 : i32
    %c0_i32_1 = arith.constant 0 : i32
    return %c0_i32, %c0_i32_0 : i32, i32
  }
  func.func @transform_3(%arg0: i32) -> (i32, i32) {
    %c0_i32 = arith.constant 0 : i32
    %c0_i32_0 = arith.constant 0 : i32
    %c0_i32_1 = arith.constant 0 : i32
    return %c0_i32, %c0_i32_0 : i32, i32
  }
  func.func @transform_4(%arg0: i32) -> (i32, i32) {
    %c0_i32 = arith.constant 0 : i32
    %c0_i32_0 = arith.constant 0 : i32
    %c0_i32_1 = arith.constant 0 : i32
    return %c0_i32, %c0_i32_0 : i32, i32
  }
  func.func @transform_5(%arg0: i32) -> (i32, i32) {
    %c0_i32 = arith.constant 0 : i32
    %c0_i32_0 = arith.constant 0 : i32
    %c0_i32_1 = arith.constant 0 : i32
    return %c0_i32, %c0_i32_0 : i32, i32
  }
  func.func @transform_6(%arg0: i32) -> (i32, i32) {
    %c0_i32 = arith.constant 0 : i32
    %c0_i32_0 = arith.constant 0 : i32
    %c0_i32_1 = arith.constant 0 : i32
    return %c0_i32, %c0_i32_0 : i32, i32
  }
  func.func @transform_7(%arg0: i32) -> (i32, i32) {
    %c0_i32 = arith.constant 0 : i32
    %c0_i32_0 = arith.constant 0 : i32
    %c0_i32_1 = arith.constant 0 : i32
    return %c0_i32, %c0_i32_0 : i32, i32
  }
  func.func @transform_8(%arg0: i32) -> (i32, i32) {
    %c0_i32 = arith.constant 0 : i32
    %c0_i32_0 = arith.constant 0 : i32
    %c0_i32_1 = arith.constant 0 : i32
    return %c0_i32, %c0_i32_0 : i32, i32
  }
  func.func @transform_9(%arg0: i32) -> (i32, i32) {
    %c0_i32 = arith.constant 0 : i32
    %c0_i32_0 = arith.constant 0 : i32
    %c0_i32_1 = arith.constant 0 : i32
    return %c0_i32, %c0_i32_0 : i32, i32
  }
  func.func @transform_10(%arg0: i32) -> (i32, i32, i32) {
    %c0_i32 = arith.constant 0 : i32
    %c0_i32_0 = arith.constant 0 : i32
    %c0_i32_1 = arith.constant 0 : i32
    return %arg0, %c0_i32, %c0_i32_0 : i32, i32, i32
  }
}

</mosaic_0001>

<bundles_post_ra>
// kernel: tpu_custom_call.1
= control target key start
LH: loop header
LB: loop body
LE: loop exit
PB: predicated region body
PF: predicated region fallthrough
CT: control target
= control target key end

     0   :  { %s9100_s0 = inlined_call_operand.hbm [shape: f32[2,16,768], index: 0, kind: input, shape index: {}]   ;;  %s9101_s1 = inlined_call_operand.hbm [shape: f32[27,512], index: 1, kind: input, shape index: {}]   ;;  %s9102_s2 = inlined_call_operand.vmem [shape: bf16[16,432], index: 2, kind: input, shape index: {}]   ;;  %s9103_s3 = inlined_call_operand.vmem [shape: f32[16,1], index: 3, kind: input, shape index: {}]   ;;  %s9104_s4 = inlined_call_operand.vmem [shape: f32[16,1], index: 4, kind: input, shape index: {}]   ;;  %s9105_s5 = inlined_call_operand.vmem [shape: f32[16,1], index: 5, kind: input, shape index: {}]   ;;  %s9106_s6 = inlined_call_operand.vmem [shape: bf16[8,432], index: 6, kind: input, shape index: {}]   ;;  %s9107_s7 = inlined_call_operand.vmem [shape: f32[8,1], index: 7, kind: input, shape index: {}]   ;;  %s9108_s8 = inlined_call_operand.vmem [shape: f32[8,1], index: 8, kind: input, shape index: {}]   ;;  %s9109_s9 = inlined_call_operand.vmem [shape: f32[8,1], index: 9, kind: input, shape index: {}]   ;;  %s9110_s10 = inlined_call_operand.hbm [shape: f32[2,8,512], index: 10, kind: output, shape index: {}]  }
   0x1   :  { %9161 = sst [smem:[#allocation20_spill]] %s9100_s0 }
   0x2   :  { %9162 = sst [smem:[#allocation21_spill]] %s9101_s1 }
   0x3   :  { %9163 = sst [smem:[#allocation22_spill]] %s9102_s2 }
   0x4   :  { %9164 = sst [smem:[#allocation23_spill]] %s9103_s3 }
   0x5   :  { %15 = vsyncpa [#allocation5], 0 }
   0x6   :  { %17 = vsyncpa [#allocation5 + $0x1], 0 }
   0x7   :  { %18 = vsyncpa [#allocation8], 0 }
   0x8   :  { %19 = vsyncpa [#allocation6], 0 }
   0x9   :  { %21 = vsyncpa [#allocation6 + $0x1], 0  ;;  %s6233_s13 = smov 0   ;;  %s6235_s14 = smov 0  }
   0xa   :  { %s6237_s15 = smov 0   ;;  %s6239_s16 = smov 0  }
   0xb LB: > { %9165 = sst [smem:[#allocation13_spill]] %s6139_s13  ;;  %s6254_s17 = sadd.s32 4294967295, %s6151_s16   ;;  %s6151_s16 = sphi %s6239_s16, %s9242_s16   ;;  %s6147_s15 = sphi %s6237_s15, %s9245_s15   ;;  %s6143_s14 = sphi %s6235_s14, %s9244_s14   ;;  %s6139_s13 = sphi %s6233_s13, %s9243_s13  }
   0xc   : > { %s5875_s18 = sadd.s32 4294967294, %s6151_s16   ;;  %p47_p0 = scmp.ne.s32.totalorder %s6143_s14, %s6139_s13 }
   0xd   : > { %p9113_p1 = scmp.eq.s32.totalorder %s6254_s17, 0  ;;  %p266_p3 = scmp.eq.s32.totalorder %s5875_s18, 1 }
   0xe   : > { %p5876_p5 = scmp.ge.s32.totalorder %s6151_s16, 1  ;;  %p273_p7 = scmp.lt.s32.totalorder %s6151_s16, 3 }
   0xf   : > { %p6263_p4 = por %p9113_p1, %p47_p0  ;;  %p6268_p6 = por %p266_p3, %p47_p0 }
  0x10   : > { %p6273_p8 = pnand %p5876_p5, %p273_p7  ;;  %s6153_s22 = smov [#allocation7]  }
  0x11   : > { %s9166_s19 = scalar_select %p6263_p4, 1, 0 }
  0x12   : > { %s9167_s20 = scalar_select %p6268_p6, 1, 0 }
  0x13   : > { %s9169_s21 = scalar_select %p6273_p8, 1, 0 }
  0x14   : > { %9168 = sst [smem:[#allocation14_spill]] %s9167_s20  ;;  %s285_s23 = sshll.u32 %s6153_s22, 4  ;;  %s6277_s23 = int_to_ptr.vmem [resolvable:$true] %s285_s23 }
  0x15   : > { %p5940_p9 = pneg %p6273_p8  ;;  %s6289_s25 = sadd.s32 1, %s6151_s16  }
  0x16   : > { %9171 = sst [smem:[#allocation15_spill]] %s6289_s25  ;;  %s34_s26 = sadd.s32 1, %s6147_s15 }
  0x17   : > { %p6284_p11 = pnand %p5940_p9, %p9113_p1  ;;  %s31_s27 = ssub.s32 %s6151_s16, %s6289_s25 }
  0x18   : > { %s9172_s1 = sld [smem:[#allocation21_spill]] }
  0x19   : > { %p6025_p13 = pneg %p6284_p11 }
  0x1e   : > { %s6023_s30 = scalar_lea.hbm %s9172_s1, 2048 }
  0x1f   : > { %p6024_p12 = scmp.ne.s32.totalorder %s9172_s1, %s6023_s30  ;;  %p6030_p5 = scmp.lt.u32.totalorder %s6023_s30, %s9172_s1 }
  0x21   : > { %p6026_p0 = pnand %p6025_p13, %p6024_p12 }
  0x23   : > { %p6027_p3 = pneg %p6026_p0 }
  0x25   : > { %p6032_p7 = pnand %p6030_p5, %p6027_p3 }
  0x27   : > { %6035 = shalt.err (!%p6032_p7)
}
  0x28   : > { %s6036_s25 = scalar_lea.vmem %s6277_s23, 2048  ;;  %p6044_p2 = scmp.lt.s32.totalorder %s6277_s23, %s6277_s23 }
  0x29   : > { %p6037_p9 = scmp.ne.s32.totalorder %s6277_s23, %s6036_s25  ;;  %p6045_p6 = scmp.lt.s32.totalorder %s6036_s25, %s6036_s25 }
  0x2b   : > { %p6039_p10 = pnand %p6037_p9, %p6025_p13  ;;  %p6046_p4 = por %p6045_p6, %p6044_p2 }
  0x2d   : > { %p6040_p1 = pneg %p6039_p10 }
  0x2f   : > { %p6047_p8 = pnand %p6046_p4, %p6040_p1 }
  0x31   : > { %6050 = shalt.err (!%p6047_p8)
}
  0x32   : > { %s6154_s28 = smov 512   ;;  %s6155_s29 = smov 32  }
  0x33   : > { %5943 = dma.hbm_to_vmem [thread:$0]  (!%p6284_p11), %s9172_s1, 2048, %s6277_s23, [#allocation8], %s6154_s28, %s6154_s28, %s6155_s29  }
  0x34   : > { %p32_p2 = scmp.eq.s32.totalorder %s31_s27, 0  ;;  %p41_p1 = scmp.ne.s32.totalorder %s6147_s15, %s6143_s14 }
  0x35   : > { %p42_p4 = scmp.eq.s32.totalorder %s6151_s16, 0  ;;  %p5953_p6 = scmp.lt.s32.totalorder %s6151_s16, 2 }
  0x36   : > { %s6320_s25 = scalar_select %p32_p2, %s6147_s15, %s34_s26  }
  0x37   : > { %p43_p8 = por %p42_p4, %p41_p1  ;;  %p9173_p10 = scmp.eq.s32.totalorder %s6254_s17, 1 }
  0x38   : > { %s323_s18 = sand.u32 1, %s6147_s15   ;;  %s5930_s22 = smul.u32 1536, %s6151_s16 }
  0x39   : > { %p6324_p12 = por %p9173_p10, %p41_p1  ;;  %s5929_s20 = smul.u32 96, %s323_s18 }
  0x3a   : > { %s9175_s0 = sld [smem:[#allocation20_spill]]  ;;  %p6335_p11 = pnand %p5953_p6, %p43_p8 }
  0x3b   : > { %s327_s26 = scalar_lea.vmem [#allocation4], %s5929_s20  ;;  %s6341_s28 = scalar_lea.sflag [#allocation5], %s323_s18 }
  0x3c   : > { %s334_s27 = sshll.u32 %s327_s26, 4  ;;  %p6053_p0 = pneg %p6335_p11  ;;  %s6339_s27 = int_to_ptr.vmem [resolvable:$true] %s334_s27 }
  0x40   : > { %s6333_s30 = scalar_lea.hbm %s9175_s0, %s5930_s22  ;;  %s6056_s22 = scalar_lea.hbm %s9175_s0, 3072 }
  0x41   : > { %s6051_s29 = scalar_lea.hbm %s6333_s30, 1536  ;;  %p6057_p7 = scmp.lt.u32.totalorder %s6333_s30, %s9175_s0 }
  0x42   : > { %p6052_p13 = scmp.ne.s32.totalorder %s6333_s30, %s6051_s29  ;;  %p6058_p9 = scmp.lt.u32.totalorder %s6056_s22, %s6051_s29 }
  0x43   : > { %p6060_p1 = scmp.lt.u32.totalorder %s6051_s29, %s6333_s30 }
  0x44   : > { %p6054_p3 = pnand %p6053_p0, %p6052_p13  ;;  %p6059_p2 = por %p6058_p9, %p6057_p7 }
  0x46   : > { %p6055_p5 = pneg %p6054_p3  ;;  %p6061_p4 = por %p6060_p1, %p6059_p2 }
  0x48   : > { %p6062_p6 = pnand %p6061_p4, %p6055_p5 }
  0x4a   : > { %6065 = shalt.err (!%p6062_p6)
}
  0x4b   : > { %s6066_s20 = scalar_lea.vmem %s6339_s27, 1536  ;;  %s6156_s18 = smov [#allocation4]  }
  0x4c   : > { %p6067_p8 = scmp.ne.s32.totalorder %s6339_s27, %s6066_s20  ;;  %s6071_s26 = sshll.u32 %s6156_s18, 4  ;;  %s6072_s26 = int_to_ptr.vmem [resolvable:$false] %s6071_s26 }
  0x4d   : > { %s6073_s1 = scalar_lea.vmem %s6072_s26, 3072  ;;  %p6074_p3 = scmp.lt.s32.totalorder %s6339_s27, %s6072_s26 }
  0x4e   : > { %p6069_p10 = pnand %p6067_p8, %p6053_p0  ;;  %p6075_p7 = scmp.lt.s32.totalorder %s6073_s1, %s6066_s20 }
  0x50   : > { %p6070_p13 = pneg %p6069_p10  ;;  %p6076_p9 = por %p6075_p7, %p6074_p3 }
  0x52   : > { %p6077_p2 = pnand %p6076_p9, %p6070_p13 }
  0x54   : > { %6080 = shalt.err (!%p6077_p2)
}
  0x55   : > { %s6157_s29 = smov 768   ;;  %s6158_s13 = smov 48  }
  0x56   : > { %5947 = dma.hbm_to_vmem [thread:$0]  (!%p6335_p11), %s6333_s30, 1536, %s6339_s27, %s6341_s28, %s6157_s29, %s6157_s29, %s6158_s13  }
  0x57   : > { %p9177_p0 = scmp.ne.s32.totalorder %s9169_s21, 0 }
  0x59   : > { %346 = sbr.rel (%p9177_p0) target bundleno = 1962 (0x7aa), region = 60 }
  0x60   : > { %s6372_s11 = sand.u32 1, %s6143_s14   ;;  %p9178_p5 = scmp.ne.s32.totalorder %s9166_s19, 0 }
  0x61   : > { %s5931_s22 = smul.u32 96, %s6372_s11  ;;  %s349_s24 = scalar_lea.sflag [#allocation5], %s6372_s11 }
  0x63   : > { %s6376_s20 = scalar_lea.vmem [#allocation4], %s5931_s22 }
  0x64   : > { %6126 = dma.done.wait (%p9178_p5), %s349_s24, 1536  }
  0x65   : > { %6128 = vsyncadd (%p9178_p5), %s349_s24, 4294965760  ;;  %p9179_p11 = scmp.eq.s32.totalorder %s6254_s17, 0 }
  0x67   : > { %6130 = dma.done.wait (%p9179_p11), [#allocation8], 2048   ;;  %p9180_p1 = pmov %p9179_p11 }
  0x68   : > { %v406_v0 = vlaneseq  ;;  %v404_v6 = vld [vmem:[#allocation7] ss:$8 sm:$0xf]  ;;  %s9155_s19 = smov 55   ;;  %s9153_s21 = smov 56   ;;  %vm430_vm0 = vcmask 449536  }
  0x69   : > { %6132 = vsyncadd (%p9180_p1), [#allocation8], 4294965248  ;;  %v493_v11 = vld [vmem:[#allocation7 + $0x1] ss:$8 sm:$0xf]  ;;  %s9143_s30 = smov 57  }
  0x6a   : > { %v407_v1 = vshrl.u32 %v406_v0, 7  ;;  %v582_v16 = vld [vmem:[#allocation7 + $0x2] ss:$8 sm:$0xf]  ;;  %s9141_s23 = smov 63   ;;  %s9139_s27 = smov 64  }
  0x6b   : > { %v671_v21 = vld [vmem:[#allocation7 + $0x3] ss:$8 sm:$0xf]  ;;  %v760_v26 = vld [vmem:[#allocation7 + $0x4] ss:$8 sm:$0xf] }
  0x6c   : > { %v6386_v2 = vsub.s32 2, %v407_v1  ;;  %v6388_v3 = vsub.s32 0, %v407_v1  ;;  %v6390_v4 = vsub.s32 3, %v407_v1  ;;  %v6392_v5 = vsub.s32 1, %v407_v1  ;;  %s9137_s28 = smov 65   ;;  %s9135_s18 = smov 71  }
  0x6d   : > { %v849_v31 = vld [vmem:[#allocation7 + $0x5] ss:$8 sm:$0xf]  ;;  %v938_v36 = vld [vmem:[#allocation7 + $0x6] ss:$8 sm:$0xf] }
  0x6e   : > { %v417_v7 = vrot.slane %v404_v6, %v6386_v2  ;;  %v409_v8 = vrot.slane %v404_v6, %v6388_v3  ;;  %v421_v9 = vrot.slane %v404_v6, %v6390_v4  ;;  %v413_v10 = vrot.slane %v404_v6, %v6392_v5  ;;  %v6448_v41 = vld [vmem:[#allocation7 + $0x7] ss:$8 sm:$0xf]  ;;  %s9145_s26 = smov 72   ;;  %s9147_s1 = smov 73  }
  0x6f   : > { %v498_v12 = vrot.slane %v493_v11, %v6388_v3  ;;  %v502_v13 = vrot.slane %v493_v11, %v6392_v5  ;;  %v506_v14 = vrot.slane %v493_v11, %v6386_v2  ;;  %v510_v15 = vrot.slane %v493_v11, %v6390_v4  ;;  %v6462_v45 = vld [vmem:[%s6376_s20] sm:$0xff]  ;;  %v6465_v46 = vld [vmem:[%s6376_s20 + $0x30] sm:$0xff]  ;;  %s9118_s29 = smov 119   ;;  %s9120_s13 = smov 120  }
  0x70   : > { %426 = vrot.lane.b32.xlu1 %v417_v7, %s9155_s19  ;;  %422 = vrot.lane.b32.xlu0 %v409_v8, %s9155_s19  ;;  %v591_v17 = vrot.slane %v582_v16, %v6392_v5  ;;  %v587_v18 = vrot.slane %v582_v16, %v6388_v3  ;;  %v599_v19 = vrot.slane %v582_v16, %v6390_v4  ;;  %v6476_v51 = vld [vmem:[%s6376_s20 + $0x20] sm:$0xff]  ;;  %v6479_v52 = vld [vmem:[%s6376_s20 + $0x50] sm:$0xff]  ;;  %vm519_vm1 = vcmask 457728   ;;  %s9122_s22 = smov 121   ;;  %s9124_s24 = smov 127  }
  0x71   : > { %v595_v20 = vrot.slane %v582_v16, %v6386_v2  ;;  %v676_v22 = vrot.slane %v671_v21, %v6388_v3  ;;  %v680_v23 = vrot.slane %v671_v21, %v6392_v5  ;;  %v684_v24 = vrot.slane %v671_v21, %v6386_v2  ;;  %s9183_s2 = sld [smem:[#allocation22_spill]]  ;;  %s9186_s3 = sld [smem:[#allocation23_spill]] }
  0x72   : > { %v688_v25 = vrot.slane %v671_v21, %v6390_v4  ;;  %v769_v27 = vrot.slane %v760_v26, %v6392_v5  ;;  %v765_v28 = vrot.slane %v760_v26, %v6388_v3  ;;  %v777_v29 = vrot.slane %v760_v26, %v6390_v4  ;;  %s9204_s0 = smov 9  }
  0x73   : > { %v773_v30 = vrot.slane %v760_v26, %v6386_v2  ;;  %v854_v32 = vrot.slane %v849_v31, %v6388_v3  ;;  %v858_v33 = vrot.slane %v849_v31, %v6392_v5  ;;  %v862_v34 = vrot.slane %v849_v31, %v6386_v2 }
  0x74   : > { %428 = vrot.lane.b32.xlu1 %v421_v9, %s9155_s19  ;;  %424 = vrot.lane.b32.xlu0 %v413_v10, %s9155_s19  ;;  %v866_v35 = vrot.slane %v849_v31, %v6390_v4  ;;  %v947_v37 = vrot.slane %v938_v36, %v6392_v5  ;;  %v943_v38 = vrot.slane %v938_v36, %v6388_v3  ;;  %vm608_vm2 = vcmask 465920  }
  0x75   : > { %v955_v39 = vrot.slane %v938_v36, %v6390_v4  ;;  %v951_v40 = vrot.slane %v938_v36, %v6386_v2  ;;  %v1036_v42 = vrot.slane %v6448_v41, %v6392_v5  ;;  %v1032_v43 = vrot.slane %v6448_v41, %v6388_v3 }
  0x76   : > { %v1040_v44 = vrot.slane %v6448_v41, %v6386_v2  ;;  %vm697_vm3 = vcmask 515072   ;;  %vm786_vm4 = vcmask 523264   ;;  %vm736_vm5 = vcmask 531456  }
  0x77   : > { %vm647_vm6 = vcmask 580608   ;;  %vm558_vm7 = vcmask 588800   ;;  %vm469_vm8 = vcmask 596992   ;;  %vm9134_vm9 = vcmask 973824  }
  0x78   : > { %511 = vrot.lane.b32.xlu1 %v498_v12, %s9153_s21  ;;  %513 = vrot.lane.b32.xlu0 %v502_v13, %s9153_s21  ;;  %vm1320_vm10 = vcmask 982016   ;;  %vm1409_vm11 = vcmask 990208   ;;  %vm1498_vm12 = vcmask 1039360   ;;  %vm1537_vm13 = vcmask 7168  }
  0x79   : > { %vm9152_vm14 = vcmask 56320   ;;  %vm9151_vm15 = vcmask 64512  }
  0x7c   : > { %515 = vrot.lane.b32.xlu1 %v506_v14, %s9153_s21  ;;  %517 = vrot.lane.b32.xlu0 %v510_v15, %s9153_s21 }
  0x80   : > { %602 = vrot.lane.b32.xlu1 %v591_v17, %s9143_s30  ;;  %600 = vrot.lane.b32.xlu0 %v587_v18, %s9143_s30 }
  0x84   : > { %606 = vrot.lane.b32.xlu1 %v599_v19, %s9143_s30  ;;  %604 = vrot.lane.b32.xlu0 %v595_v20, %s9143_s30 }
  0x88   : > { %689 = vrot.lane.b32.xlu1 %v676_v22, %s9141_s23  ;;  %691 = vrot.lane.b32.xlu0 %v680_v23, %s9141_s23 }
  0x8c   : > { %693 = vrot.lane.b32.xlu1 %v684_v24, %s9141_s23  ;;  %695 = vrot.lane.b32.xlu0 %v688_v25, %s9141_s23 }
  0x90   : > { %780 = vrot.lane.b32.xlu1 %v769_v27, %s9139_s27  ;;  %778 = vrot.lane.b32.xlu0 %v765_v28, %s9139_s27 }
  0x94   : > { %784 = vrot.lane.b32.xlu1 %v777_v29, %s9139_s27  ;;  %782 = vrot.lane.b32.xlu0 %v773_v30, %s9139_s27 }
  0x98   : > { %867 = vrot.lane.b32.xlu1 %v854_v32, %s9137_s28  ;;  %869 = vrot.lane.b32.xlu0 %v858_v33, %s9137_s28 }
  0x9c   : > { %871 = vrot.lane.b32.xlu1 %v862_v34, %s9137_s28  ;;  %873 = vrot.lane.b32.xlu0 %v866_v35, %s9137_s28 }
  0xa0   : > { %958 = vrot.lane.b32.xlu1 %v947_v37, %s9135_s18  ;;  %956 = vrot.lane.b32.xlu0 %v943_v38, %s9135_s18 }
  0xa4   : > { %962 = vrot.lane.b32.xlu1 %v955_v39, %s9135_s18  ;;  %960 = vrot.lane.b32.xlu0 %v951_v40, %s9135_s18 }
  0xa8   : > { %1047 = vrot.lane.b32.xlu0 %v1036_v42, %s9145_s26  ;;  %1045 = vrot.lane.b32.xlu1 %v1032_v43, %s9145_s26 }
  0xac   : > { %1049 = vrot.lane.b32.xlu1 %v1040_v44, %s9145_s26 }
  0xe2   : > { %v6467_v47 = vpop.permute.xlu1 %426  ;;  %v6469_v48 = vpop.permute.xlu0 %422 }
  0xe3   : > { %v439_v49 = vmul.f32 %v6469_v48, %v6462_v45  ;;  %v444_v50 = vmul.f32 %v6469_v48, %v6465_v46 }
  0xe5   : > { %v449_v53 = vpack.c.bf16 %v444_v50, %v439_v49  ;;  %v6572_v49 = vld [vmem:[%s6376_s20 + $0x8] sm:$0xff]  ;;  %v6575_v50 = vld [vmem:[%s6376_s20 + $0x38] sm:$0xff] }
  0xe6   : > { %v6481_v54 = vpop.permute.xlu1 %428  ;;  %v6483_v55 = vpop.permute.xlu0 %424 }
  0xe7   : > { %v443_v56 = vmul.f32 %v6481_v54, %v6476_v51  ;;  %v448_v57 = vmul.f32 %v6481_v54, %v6479_v52  ;;  %459 = vrot.lane.b32.xlu0 %v449_v53, %s9147_s1  ;;  %v431_v53 = vsel %vm430_vm0, %v6469_v48, %v6483_v55  ;;  %v433_v48 = vsel %vm430_vm0, %v6467_v47, %v6481_v54 }
  0xe9   : > { %v453_v58 = vpack.c.bf16 %v448_v57, %v443_v56 }
  0xea   : > { %v6490_v59 = vpop.permute.xlu1 %511  ;;  %v6492_v60 = vpop.permute.xlu0 %513 }
  0xeb   : > { %v528_v61 = vmul.f32 %v6490_v59, %v6462_v45  ;;  %v533_v62 = vmul.f32 %v6490_v59, %v6465_v46  ;;  %467 = vrot.lane.b32.xlu0 %v453_v58, %s9147_s1 }
  0xed   : > { %v538_v63 = vpack.c.bf16 %v533_v62, %v528_v61  ;;  %v440_v62 = vmul.f32 %v431_v53, %v6572_v49 }
  0xee   : > { %v6499_v0 = vpop.permute.xlu1 %515  ;;  %v6501_v1 = vpop.permute.xlu0 %517 }
  0xef   : > { %v532_v6 = vmul.f32 %v6501_v1, %v6476_v51  ;;  %v537_v7 = vmul.f32 %v6501_v1, %v6479_v52  ;;  %548 = vrot.lane.b32.xlu1 %v538_v63, %s9145_s26  ;;  %v445_v63 = vmul.f32 %v431_v53, %v6575_v50 }
  0xf1   : > { %v542_v8 = vpack.c.bf16 %v537_v7, %v532_v6  ;;  %v6595_v7 = vld [vmem:[%s6376_s20 + $0x18] sm:$0xff] }
  0xf2   : > { %v6508_v9 = vpop.permute.xlu1 %602  ;;  %v6510_v10 = vpop.permute.xlu0 %600 }
  0xf3   : > { %v617_v11 = vmul.f32 %v6510_v10, %v6462_v45  ;;  %v622_v12 = vmul.f32 %v6510_v10, %v6465_v46  ;;  %556 = vrot.lane.b32.xlu1 %v542_v8, %s9145_s26  ;;  %v6598_v8 = vld [vmem:[%s6376_s20 + $0x48] sm:$0xff] }
  0xf5   : > { %v627_v13 = vpack.c.bf16 %v622_v12, %v617_v11 }
  0xf6   : > { %v6517_v14 = vpop.permute.xlu1 %606  ;;  %v6519_v15 = vpop.permute.xlu0 %604 }
  0xf7   : > { %v621_v16 = vmul.f32 %v6517_v14, %v6476_v51  ;;  %v626_v17 = vmul.f32 %v6517_v14, %v6479_v52  ;;  %637 = vrot.lane.b32.xlu0 %v627_v13, %s9135_s18 }
  0xf9   : > { %v631_v18 = vpack.c.bf16 %v626_v17, %v621_v16  ;;  %v450_v17 = vpack.c.bf16 %v445_v63, %v440_v62 }
  0xfa   : > { %v6526_v19 = vpop.permute.xlu1 %689  ;;  %v6528_v20 = vpop.permute.xlu0 %691 }
  0xfb   : > { %v706_v21 = vmul.f32 %v6526_v19, %v6462_v45  ;;  %v711_v22 = vmul.f32 %v6526_v19, %v6465_v46  ;;  %645 = vrot.lane.b32.xlu0 %v631_v18, %s9135_s18  ;;  %v442_v18 = vmul.f32 %v6595_v7, %v433_v48 }
  0xfd   : > { %v716_v23 = vpack.c.bf16 %v711_v22, %v706_v21  ;;  %v447_v21 = vmul.f32 %v6598_v8, %v433_v48  ;;  %v521_v22 = vsel %vm519_vm1, %v6492_v60, %v6499_v0 }
  0xfe   : > { %v6535_v24 = vpop.permute.xlu1 %693  ;;  %v6537_v25 = vpop.permute.xlu0 %695 }
  0xff   : > { %v710_v26 = vmul.f32 %v6537_v25, %v6476_v51  ;;  %v715_v27 = vmul.f32 %v6537_v25, %v6479_v52  ;;  %726 = vrot.lane.b32.xlu1 %v716_v23, %s9137_s28 }
 0x101   : > { %v720_v28 = vpack.c.bf16 %v715_v27, %v710_v26  ;;  %v6617_v26 = vld [vmem:[%s6376_s20 + $0x10] sm:$0xff]  ;;  %v6620_v27 = vld [vmem:[%s6376_s20 + $0x40] sm:$0xff] }
 0x102   : > { %v6544_v29 = vpop.permute.xlu1 %780  ;;  %v6546_v30 = vpop.permute.xlu0 %778 }
 0x103   : > { %v795_v31 = vmul.f32 %v6546_v30, %v6462_v45  ;;  %v800_v32 = vmul.f32 %v6546_v30, %v6465_v46  ;;  %734 = vrot.lane.b32.xlu1 %v720_v28, %s9137_s28  ;;  %v432_v28 = vsel %vm430_vm0, %v6483_v55, %v6467_v47  ;;  %v609_v55 = vsel %vm608_vm2, %v6510_v10, %v6508_v9 }
 0x104   : > { %v446_v47 = vmul.f32 %v432_v28, %v6620_v27  ;;  %v618_v53 = vmul.f32 %v609_v55, %v6572_v49  ;;  %v611_v10 = vsel %vm608_vm2, %v6519_v15, %v6517_v14 }
 0x105   : > { %v805_v33 = vpack.c.bf16 %v800_v32, %v795_v31 }
 0x106   : > { %v6553_v34 = vpop.permute.xlu1 %784  ;;  %v6555_v35 = vpop.permute.xlu0 %782 }
 0x107   : > { %v799_v36 = vmul.f32 %v6553_v34, %v6476_v51  ;;  %v804_v37 = vmul.f32 %v6553_v34, %v6479_v52  ;;  %815 = vrot.lane.b32.xlu0 %v805_v33, %s9139_s27  ;;  %v530_v33 = vmul.f32 %v521_v22, %v6617_v26 }
 0x109   : > { %v809_v38 = vpack.c.bf16 %v804_v37, %v799_v36  ;;  %v535_v36 = vmul.f32 %v521_v22, %v6620_v27  ;;  %v452_v37 = vpack.c.bf16 %v447_v21, %v442_v18 }
 0x10a   : > { %v6562_v39 = vpop.permute.xlu1 %867  ;;  %v6564_v40 = vpop.permute.xlu0 %869 }
 0x10b   : > { %v884_v42 = vmul.f32 %v6562_v39, %v6462_v45  ;;  %v889_v43 = vmul.f32 %v6562_v39, %v6465_v46  ;;  %823 = vrot.lane.b32.xlu0 %v809_v38, %s9139_s27 }
 0x10d   : > { %v894_v44 = vpack.c.bf16 %v889_v43, %v884_v42  ;;  %v441_v42 = vmul.f32 %v432_v28, %v6617_v26  ;;  %v520_v43 = vsel %vm519_vm1, %v6490_v59, %v6492_v60  ;;  %v522_v59 = vsel %vm519_vm1, %v6499_v0, %v6501_v1 }
 0x10e   : > { %v6580_v56 = vpop.permute.xlu1 %871  ;;  %v6582_v57 = vpop.permute.xlu0 %873  ;;  %v534_v62 = vmul.f32 %v520_v43, %v6575_v50  ;;  %v620_v60 = vmul.f32 %v611_v10, %v6595_v7  ;;  %v610_v0 = vsel %vm608_vm2, %v6508_v9, %v6519_v15  ;;  %v787_v28 = vsel %vm786_vm4, %v6546_v30, %v6544_v29 }
 0x10f   : > { %v888_v58 = vmul.f32 %v6582_v57, %v6476_v51  ;;  %v893_v61 = vmul.f32 %v6582_v57, %v6479_v52  ;;  %904 = vrot.lane.b32.xlu1 %v894_v44, %s9141_s23  ;;  %v540_v44 = vpack.c.bf16 %v535_v36, %v530_v33  ;;  %v451_v63 = vpack.c.bf16 %v446_v47, %v441_v42 }
 0x110   : > { %v619_v21 = vmul.f32 %v610_v0, %v6617_v26  ;;  %v624_v22 = vmul.f32 %v610_v0, %v6620_v27  ;;  %v698_v9 = vsel %vm697_vm3, %v6526_v19, %v6528_v20  ;;  %v801_v33 = vmul.f32 %v787_v28, %v6575_v50 }
 0x111   : > { %v898_v6 = vpack.c.bf16 %v893_v61, %v888_v58  ;;  %v623_v58 = vmul.f32 %v609_v55, %v6575_v50  ;;  %v529_v61 = vmul.f32 %v520_v43, %v6572_v49  ;;  %v707_v36 = vmul.f32 %v698_v9, %v6572_v49 }
 0x112   : > { %v6600_v11 = vpop.permute.xlu1 %958  ;;  %v6602_v12 = vpop.permute.xlu0 %956  ;;  %v789_v30 = vsel %vm786_vm4, %v6555_v35, %v6553_v34  ;;  %v700_v19 = vsel %vm697_vm3, %v6535_v24, %v6537_v25  ;;  %v877_v55 = vsel %vm736_vm5, %v6564_v40, %v6580_v56 }
 0x113   : > { %v973_v13 = vmul.f32 %v6602_v12, %v6462_v45  ;;  %v978_v16 = vmul.f32 %v6602_v12, %v6465_v46  ;;  %912 = vrot.lane.b32.xlu1 %v898_v6, %s9141_s23  ;;  %v625_v6 = vmul.f32 %v611_v10, %v6598_v8  ;;  %v628_v48 = vpack.c.bf16 %v623_v58, %v618_v53 }
 0x114   : > { %v539_v14 = vpack.c.bf16 %v534_v62, %v529_v61  ;;  %v803_v42 = vmul.f32 %v789_v30, %v6598_v8  ;;  %v709_v43 = vmul.f32 %v700_v19, %v6595_v7  ;;  %v886_v25 = vmul.f32 %v877_v55, %v6617_v26 }
 0x115   : > { %v983_v54 = vpack.c.bf16 %v978_v16, %v973_v13  ;;  %v699_v13 = vsel %vm697_vm3, %v6528_v20, %v6535_v24  ;;  %v531_v16 = vmul.f32 %v6595_v7, %v522_v59  ;;  %v630_v18 = vpack.c.bf16 %v625_v6, %v620_v60 }
 0x116   : > { %v6614_v23 = vpop.permute.xlu1 %962  ;;  %v708_v1 = vmul.f32 %v699_v13, %v6617_v26  ;;  %v798_v20 = vmul.f32 %v789_v30, %v6595_v7  ;;  %v788_v24 = vsel %vm786_vm4, %v6544_v29, %v6555_v35  ;;  %v891_v53 = vmul.f32 %v877_v55, %v6620_v27  ;;  %v961_v35 = vpop.permute.xlu0 %960 }
 0x117   : > { %v977_v31 = vmul.f32 %v6614_v23, %v6476_v51  ;;  %v982_v32 = vmul.f32 %v6614_v23, %v6479_v52  ;;  %461 = vrot.lane.b32.xlu1 %v450_v17, %s9147_s1  ;;  %993 = vrot.lane.b32.xlu0 %v983_v54, %s9143_s30  ;;  %v536_v17 = vmul.f32 %v6598_v8, %v522_v59 }
 0x118   : > { %v713_v54 = vmul.f32 %v699_v13, %v6620_v27  ;;  %v808_v58 = vpack.c.bf16 %v803_v42, %v798_v20  ;;  %v797_v61 = vmul.f32 %v788_v24, %v6617_v26  ;;  %v802_v62 = vmul.f32 %v788_v24, %v6620_v27 }
 0x119   : > { %v987_v38 = vpack.c.bf16 %v982_v32, %v977_v31  ;;  %v541_v31 = vpack.c.bf16 %v536_v17, %v531_v16  ;;  %v796_v32 = vmul.f32 %v787_v28, %v6572_v49  ;;  %v965_v10 = vsel %vm647_vm6, %v6602_v12, %v6600_v11 }
 0x11a   : > { %v718_v15 = vpack.c.bf16 %v713_v54, %v708_v1  ;;  %v876_v29 = vsel %vm736_vm5, %v6562_v39, %v6564_v40  ;;  %v896_v59 = vpack.c.bf16 %v891_v53, %v886_v25  ;;  %v974_v60 = vmul.f32 %v965_v10, %v6572_v49 }
 0x11b   : > { %465 = vrot.lane.b32.xlu1 %v452_v37, %s9147_s1  ;;  %1001 = vrot.lane.b32.xlu0 %v987_v38, %s9143_s30  ;;  %v712_v37 = vmul.f32 %v698_v9, %v6575_v50  ;;  %v629_v38 = vpack.c.bf16 %v624_v22, %v619_v21  ;;  %v806_v47 = vpack.c.bf16 %v801_v33, %v796_v32 }
 0x11c   : > { %v979_v6 = vmul.f32 %v965_v10, %v6575_v50  ;;  %v885_v13 = vmul.f32 %v876_v29, %v6572_v49  ;;  %v890_v12 = vmul.f32 %v876_v29, %v6575_v50  ;;  %v807_v16 = vpack.c.bf16 %v802_v62, %v797_v61 }
 0x11d   : > { %v717_v34 = vpack.c.bf16 %v712_v37, %v707_v36  ;;  %v878_v39 = vsel %vm736_vm5, %v6580_v56, %v6582_v57  ;;  %v1048_v56 = vpop.permute.xlu0 %1047 }
 0x11e   : > { %v984_v0 = vpack.c.bf16 %v979_v6, %v974_v60  ;;  %v895_v1 = vpack.c.bf16 %v890_v12, %v885_v13  ;;  %v887_v54 = vmul.f32 %v878_v39, %v6595_v7 }
 0x11f   : > { %552 = vrot.lane.b32.xlu1 %v540_v44, %s9145_s26  ;;  %463 = vrot.lane.b32.xlu0 %v451_v63, %s9147_s1  ;;  %v714_v44 = vmul.f32 %v700_v19, %v6598_v8  ;;  %v1044_v19 = vrot.slane %v6448_v41, %v6390_v4 }
 0x121   : > { %v719_v63 = vpack.c.bf16 %v714_v44, %v709_v43 }
 0x123   : > { %639 = vrot.lane.b32.xlu1 %v628_v48, %s9135_s18  ;;  %550 = vrot.lane.b32.xlu0 %v539_v14, %s9145_s26  ;;  %v1046_v48 = vpop.permute.xlu1 %1045  ;;  %v967_v14 = vsel %vm647_vm6, %v961_v35, %v6614_v23  ;;  %v892_v23 = vmul.f32 %v878_v39, %v6598_v8 }
 0x124   : > { %v976_v40 = vmul.f32 %v967_v14, %v6595_v7  ;;  %v981_v17 = vmul.f32 %v967_v14, %v6598_v8  ;;  %v1062_v57 = vmul.f32 %v1046_v48, %v6462_v45  ;;  %v1067_v21 = vmul.f32 %v1046_v48, %v6465_v46 }
 0x125   : > { %v1054_v37 = vsel %vm558_vm7, %v1046_v48, %v1048_v56 }
 0x126   : > { %v1072_v36 = vpack.c.bf16 %v1067_v21, %v1062_v57  ;;  %v1063_v20 = vmul.f32 %v1054_v37, %v6572_v49  ;;  %v1068_v42 = vmul.f32 %v1054_v37, %v6575_v50 }
 0x127   : > { %643 = vrot.lane.b32.xlu1 %v630_v18, %s9135_s18  ;;  %554 = vrot.lane.b32.xlu0 %v541_v31, %s9145_s26  ;;  %v966_v18 = vsel %vm647_vm6, %v6600_v11, %v961_v35  ;;  %v6735_v22 = vpop.permute.xlu1 %1049  ;;  %v986_v31 = vpack.c.bf16 %v981_v17, %v976_v40  ;;  %v897_v11 = vpack.c.bf16 %v892_v23, %v887_v54 }
 0x128   : > { %v1055_v28 = vsel %vm558_vm7, %v1048_v56, %v6735_v22  ;;  %v975_v9 = vmul.f32 %v966_v18, %v6617_v26 }
 0x129   : > { %v1064_v32 = vmul.f32 %v1055_v28, %v6617_v26  ;;  %v1069_v33 = vmul.f32 %v1055_v28, %v6620_v27 }
 0x12b   : > { %730 = vrot.lane.b32.xlu1 %v718_v15, %s9137_s28  ;;  %641 = vrot.lane.b32.xlu0 %v629_v38, %s9135_s18  ;;  %v980_v15 = vmul.f32 %v966_v18, %v6620_v27  ;;  %v1074_v38 = vpack.c.bf16 %v1069_v33, %v1064_v32 }
 0x12d   : > { %v985_v30 = vpack.c.bf16 %v980_v15, %v975_v9 }
 0x12f   : > { %817 = vrot.lane.b32.xlu1 %v806_v47, %s9139_s27  ;;  %728 = vrot.lane.b32.xlu0 %v717_v34, %s9137_s28  ;;  %v1073_v47 = vpack.c.bf16 %v1068_v42, %v1063_v20 }
 0x133   : > { %821 = vrot.lane.b32.xlu1 %v808_v58, %s9139_s27  ;;  %732 = vrot.lane.b32.xlu0 %v719_v63, %s9137_s28 }
 0x137   : > { %908 = vrot.lane.b32.xlu1 %v896_v59, %s9141_s23  ;;  %819 = vrot.lane.b32.xlu0 %v807_v16, %s9139_s27 }
 0x13b   : > { %995 = vrot.lane.b32.xlu1 %v984_v0, %s9143_s30  ;;  %906 = vrot.lane.b32.xlu0 %v895_v1, %s9141_s23 }
 0x13f   : > { %999 = vrot.lane.b32.xlu1 %v986_v31, %s9143_s30  ;;  %910 = vrot.lane.b32.xlu0 %v897_v11, %s9141_s23 }
 0x143   : > { %1082 = vrot.lane.b32.xlu1 %v1072_v36, %s9153_s21  ;;  %997 = vrot.lane.b32.xlu0 %v985_v30, %s9143_s30 }
 0x147   : > { %1086 = vrot.lane.b32.xlu1 %v1074_v38, %s9153_s21  ;;  %1051 = vrot.lane.b32.xlu0 %v1044_v19, %s9145_s26 }
 0x14b   : > { %1084 = vrot.lane.b32.xlu0 %v1073_v47, %s9153_s21 }
 0x159   : > { %v460_v55 = vpop.permute.xlu0 %459 }
 0x15d   : > { %v468_v43 = vpop.permute.xlu0 %467 }
 0x161   : > { %v549_v34 = vpop.permute.xlu1 %548 }
 0x165   : > { %v557_v44 = vpop.permute.xlu1 %556 }
 0x169   : > { %v638_v24 = vpop.permute.xlu0 %637 }
 0x16d   : > { %v646_v53 = vpop.permute.xlu0 %645 }
 0x171   : > { %v727_v25 = vpop.permute.xlu1 %726 }
 0x175   : > { %v735_v58 = vpop.permute.xlu1 %734 }
 0x179   : > { %v816_v41 = vpop.permute.xlu0 %815 }
 0x17d   : > { %v824_v10 = vpop.permute.xlu0 %823 }
 0x181   : > { %v6756_v61 = vpop.permute.xlu1 %904 }
 0x185   : > { %v6758_v62 = vpop.permute.xlu1 %912 }
 0x189   : > { %v462_v63 = vpop.permute.xlu1 %461  ;;  %v6760_v29 = vpop.permute.xlu0 %993 }
 0x18a   : > { %v470_v14 = vsel %vm469_vm8, %v460_v55, %v462_v63 }
 0x18d   : > { %v466_v35 = vpop.permute.xlu1 %465  ;;  %v6762_v59 = vpop.permute.xlu0 %1001 }
 0x18e   : > { %v473_v60 = vsel %vm469_vm8, %v466_v35, %v468_v43 }
 0x18f   : > { %2938 = vmatprep.subr.bf16.mxu1 %v473_v60 }
 0x191   : > { %v553_v6 = vpop.permute.xlu1 %552  ;;  %v464_v48 = vpop.permute.xlu0 %463 }
 0x192   : > { %v471_v13 = vsel %vm469_vm8, %v462_v63, %v464_v48  ;;  %v472_v12 = vsel %vm469_vm8, %v464_v48, %v466_v35 }
 0x193   : > { %2852 = vmatprep.subr.bf16.mxu0 %v471_v13  ;;  %2939 = vmatpush1.bf16.msra.mxu1 %v472_v12 }
 0x194   : > { %2853 = vmatpush1.bf16.msra.mxu0 %v470_v14 }
 0x195   : > { %v640_v16 = vpop.permute.xlu1 %639  ;;  %v551_v39 = vpop.permute.xlu0 %550 }
 0x196   : > { %v560_v40 = vsel %vm558_vm7, %v551_v39, %v553_v6  ;;  %v559_v17 = vsel %vm558_vm7, %v549_v34, %v551_v39  ;;  %v648_v31 = vsel %vm647_vm6, %v638_v24, %v640_v16 }
 0x197   : > { %2854 = vmatprep.subr.bf16.mxu0 %v560_v40 }
 0x198   : > { %2855 = vmatpush1.bf16.msra.mxu0 %v559_v17 }
 0x199   : > { %v644_v0 = vpop.permute.xlu1 %643  ;;  %v555_v1 = vpop.permute.xlu0 %554 }
 0x19a   : > { %v562_v54 = vsel %vm558_vm7, %v555_v1, %v557_v44  ;;  %v561_v23 = vsel %vm558_vm7, %v553_v6, %v555_v1  ;;  %v651_v56 = vsel %vm647_vm6, %v644_v0, %v646_v53 }
 0x19b   : > { %2940 = vmatprep.subr.bf16.mxu1 %v562_v54 }
 0x19c   : > { %2941 = vmatpush1.bf16.msra.mxu1 %v561_v23 }
 0x19d   : > { %v731_v18 = vpop.permute.xlu1 %730  ;;  %2942 = vmatprep.subr.bf16.mxu1 %v651_v56  ;;  %v642_v57 = vpop.permute.xlu0 %641 }
 0x19e   : > { %v649_v21 = vsel %vm647_vm6, %v640_v16, %v642_v57  ;;  %v650_v28 = vsel %vm647_vm6, %v642_v57, %v644_v0  ;;  %v1116_v16 = vld [vmem:[#allocation7 + $0x20] ss:$8 sm:$0xf] }
 0x19f   : > { %2856 = vmatprep.subr.bf16.mxu0 %v649_v21  ;;  %v1121_v54 = vrot.slane %v1116_v16, %v6388_v3  ;;  %v1133_v23 = vrot.slane %v1116_v16, %v6390_v4 }
 0x1a0   : > { %2857 = vmatpush1.bf16.msra.mxu0 %v648_v31  ;;  %2943 = vmatpush1.bf16.msra.mxu1 %v650_v28 }
 0x1a1   : > { %v818_v9 = vpop.permute.xlu1 %817  ;;  %v729_v15 = vpop.permute.xlu0 %728 }
 0x1a2   : > { %v738_v11 = vsel %vm736_vm5, %v729_v15, %v731_v18  ;;  %v737_v32 = vsel %vm736_vm5, %v727_v25, %v729_v15  ;;  %v826_v55 = vsel %vm786_vm4, %v816_v41, %v818_v9 }
 0x1a3   : > { %2858 = vmatprep.subr.bf16.mxu0 %v738_v11 }
 0x1a4   : > { %2859 = vmatpush1.bf16.msra.mxu0 %v737_v32 }
 0x1a5   : > { %v822_v33 = vpop.permute.xlu1 %821  ;;  %v733_v36 = vpop.permute.xlu0 %732 }
 0x1a6   : > { %v740_v37 = vsel %vm736_vm5, %v733_v36, %v735_v58  ;;  %v739_v30 = vsel %vm736_vm5, %v731_v18, %v733_v36  ;;  %v829_v19 = vsel %vm786_vm4, %v822_v33, %v824_v10  ;;  %v1129_v18 = vrot.slane %v1116_v16, %v6386_v2 }
 0x1a7   : > { %2944 = vmatprep.subr.bf16.mxu1 %v740_v37 }
 0x1a8   : > { %2945 = vmatpush1.bf16.msra.mxu1 %v739_v30  ;;  %v1205_v30 = vld [vmem:[#allocation7 + $0x21] ss:$8 sm:$0xf] }
 0x1a9   : > { %v909_v38 = vpop.permute.xlu1 %908  ;;  %2946 = vmatprep.subr.bf16.mxu1 %v829_v19  ;;  %v820_v20 = vpop.permute.xlu0 %819 }
 0x1aa   : > { %v827_v42 = vsel %vm786_vm4, %v818_v9, %v820_v20  ;;  %v828_v47 = vsel %vm786_vm4, %v820_v20, %v822_v33 }
 0x1ab   : > { %2860 = vmatprep.subr.bf16.mxu0 %v827_v42 }
 0x1ac   : > { %2861 = vmatpush1.bf16.msra.mxu0 %v826_v55  ;;  %2947 = vmatpush1.bf16.msra.mxu1 %v828_v47  ;;  %v1214_v47 = vrot.slane %v1205_v30, %v6392_v5  ;;  %v1294_v55 = vld [vmem:[#allocation7 + $0x22] ss:$8 sm:$0xf] }
 0x1ad   : > { %v996_v34 = vpop.permute.xlu1 %995  ;;  %v907_v43 = vpop.permute.xlu0 %906 }
 0x1ae   : > { %v916_v44 = vsel %vm697_vm3, %v907_v43, %v909_v38  ;;  %v915_v24 = vsel %vm697_vm3, %v6756_v61, %v907_v43  ;;  %v1004_v6 = vsel %vm608_vm2, %v6760_v29, %v996_v34  ;;  %v1125_v29 = vrot.slane %v1116_v16, %v6392_v5 }
 0x1af   : > { %2862 = vmatprep.subr.bf16.mxu0 %v916_v44  ;;  %v1303_v43 = vrot.slane %v1294_v55, %v6392_v5  ;;  %v1383_v44 = vld [vmem:[#allocation7 + $0x23] ss:$8 sm:$0xf] }
 0x1b0   : > { %2863 = vmatpush1.bf16.msra.mxu0 %v915_v24  ;;  %v1388_v24 = vrot.slane %v1383_v44, %v6388_v3 }
 0x1b1   : > { %v1000_v25 = vpop.permute.xlu1 %999  ;;  %v911_v53 = vpop.permute.xlu0 %910 }
 0x1b2   : > { %v918_v58 = vsel %vm697_vm3, %v911_v53, %v6758_v62  ;;  %v917_v10 = vsel %vm697_vm3, %v909_v38, %v911_v53  ;;  %v1007_v41 = vsel %vm608_vm2, %v1000_v25, %v6762_v59  ;;  %v1396_v53 = vrot.slane %v1383_v44, %v6386_v2 }
 0x1b3   : > { %2948 = vmatprep.subr.bf16.mxu1 %v918_v58  ;;  %v1392_v58 = vrot.slane %v1383_v44, %v6392_v5 }
 0x1b4   : > { %2949 = vmatpush1.bf16.msra.mxu1 %v917_v10  ;;  %v1472_v10 = vld [vmem:[#allocation7 + $0x24] ss:$8 sm:$0xf] }
 0x1b5   : > { %2950 = vmatprep.subr.bf16.mxu1 %v1007_v41  ;;  %v998_v63 = vpop.permute.xlu0 %997  ;;  %v1083_v35 = vpop.permute.xlu1 %1082  ;;  %v1477_v41 = vrot.slane %v1472_v10, %v6388_v3 }
 0x1b6   : > { %v1005_v60 = vsel %vm608_vm2, %v996_v34, %v998_v63  ;;  %v1006_v61 = vsel %vm608_vm2, %v998_v63, %v1000_v25  ;;  %v1307_v34 = vrot.slane %v1294_v55, %v6386_v2  ;;  %v1311_v25 = vrot.slane %v1294_v55, %v6390_v4 }
 0x1b7   : > { %2864 = vmatprep.subr.bf16.mxu0 %v1005_v60  ;;  %v1400_v63 = vrot.slane %v1383_v44, %v6390_v4  ;;  %v1481_v60 = vrot.slane %v1472_v10, %v6392_v5  ;;  %v2368_v44 = vld [vmem:[#allocation7 + $0x47] ss:$8 sm:$0xf] }
 0x1b8   : > { %2865 = vmatpush1.bf16.msra.mxu0 %v1004_v6  ;;  %2951 = vmatpush1.bf16.msra.mxu1 %v1006_v61  ;;  %v1577_v61 = vld [vmem:[#allocation7 + $0x26] ss:$8 sm:$0xf] }
 0x1b9   : > { %v1052_v62 = vpop.permute.xlu0 %1051  ;;  %v1087_v39 = vpop.permute.xlu1 %1086  ;;  %v1582_v6 = vrot.slane %v1577_v61, %v6388_v3 }
 0x1ba   : > { %v1056_v48 = vsel %vm558_vm7, %v6735_v22, %v1052_v62  ;;  %v1066_v13 = vmul.f32 %v1052_v62, %v6476_v51  ;;  %v1071_v59 = vmul.f32 %v1052_v62, %v6479_v52  ;;  %v1489_v62 = vrot.slane %v1472_v10, %v6390_v4 }
 0x1bb   : > { %v1065_v12 = vmul.f32 %v1056_v48, %v6595_v7  ;;  %v1070_v14 = vmul.f32 %v1056_v48, %v6598_v8  ;;  %v1590_v48 = vrot.slane %v1577_v61, %v6386_v2 }
 0x1bc   : > { %v1076_v40 = vpack.c.bf16 %v1071_v59, %v1066_v13  ;;  %v1586_v13 = vrot.slane %v1577_v61, %v6392_v5  ;;  %v1666_v59 = vld [vmem:[#allocation7 + $0x27] ss:$8 sm:$0xf] }
 0x1bd   : > { %v1075_v17 = vpack.c.bf16 %v1070_v14, %v1065_v12  ;;  %v1085_v0 = vpop.permute.xlu0 %1084  ;;  %v1671_v12 = vrot.slane %v1666_v59, %v6388_v3  ;;  %v1594_v14 = vrot.slane %v1577_v61, %v6390_v4  ;;  %v1679_v16 = vrot.slane %v1666_v59, %v6386_v2 }
 0x1be   : > { %1090 = vrot.lane.b32.xlu1 %v1076_v40, %s9153_s21  ;;  %v1094_v1 = vsel %vm519_vm1, %v1085_v0, %v1087_v39  ;;  %v1093_v22 = vsel %vm519_vm1, %v1083_v35, %v1085_v0  ;;  %v1485_v35 = vrot.slane %v1472_v10, %v6386_v2  ;;  %v1755_v40 = vld [vmem:[#allocation7 + $0x40] ss:$8 sm:$0xf]  ;;  %v1683_v0 = vrot.slane %v1666_v59, %v6390_v4 }
 0x1bf   : > { %1088 = vrot.lane.b32.xlu0 %v1075_v17, %s9153_s21  ;;  %2866 = vmatprep.subr.bf16.mxu0 %v1094_v1  ;;  %v1760_v17 = vrot.slane %v1755_v40, %v6388_v3  ;;  %v1764_v1 = vrot.slane %v1755_v40, %v6392_v5  ;;  %v2381_v10 = vrot.slane %v2368_v44, %v6386_v2 }
 0x1c0   : > { %2867 = vmatpush1.bf16.msra.mxu0 %v1093_v22  ;;  %v1844_v22 = vld [vmem:[#allocation7 + $0x41] ss:$8 sm:$0xf] }
 0x1c2   : > { %1136 = vrot.lane.b32.xlu1 %v1125_v29, %s9147_s1  ;;  %v1768_v29 = vrot.slane %v1755_v40, %v6386_v2 }
 0x1c3   : > { %1134 = vrot.lane.b32.xlu0 %v1121_v54, %s9147_s1  ;;  %v1849_v54 = vrot.slane %v1844_v22, %v6388_v3 }
 0x1c6   : > { %1140 = vrot.lane.b32.xlu1 %v1133_v23, %s9147_s1  ;;  %v1772_v23 = vrot.slane %v1755_v40, %v6390_v4 }
 0x1c7   : > { %1138 = vrot.lane.b32.xlu0 %v1129_v18, %s9147_s1  ;;  %v1857_v18 = vrot.slane %v1844_v22, %v6386_v2 }
 0x230   : > { %v1091_v56 = vpop.permute.xlu1 %1090 }
 0x231   : > { %v1089_v57 = vpop.permute.xlu0 %1088 }
 0x232   : > { %v1096_v21 = vsel %vm519_vm1, %v1089_v57, %v1091_v56  ;;  %v1095_v28 = vsel %vm519_vm1, %v1087_v39, %v1089_v57  ;;  %v1675_v39 = vrot.slane %v1666_v59, %v6392_v5  ;;  %v1853_v56 = vrot.slane %v1844_v22, %v6392_v5  ;;  %v1933_v57 = vld [vmem:[#allocation7 + $0x42] ss:$8 sm:$0xf] }
 0x233   : > { %2952 = vmatprep.subr.bf16.mxu1 %v1096_v21  ;;  %v1938_v21 = vrot.slane %v1933_v57, %v6388_v3 }
 0x234   : > { %2953 = vmatpush1.bf16.msra.mxu1 %v1095_v28  ;;  %v1137_v31 = vpop.permute.xlu1 %1136  ;;  %v1861_v28 = vrot.slane %v1844_v22, %v6390_v4  ;;  %v6970_v22 = vld [vmem:[%s6376_s20 + $0x40] sm:$0xff] }
 0x235   : > { %v1135_v9 = vpop.permute.xlu0 %1134 }
 0x236   : > { %v1143_v15 = vsel %vm469_vm8, %v1135_v9, %v1137_v31  ;;  %v1151_v11 = vmul.f32 %v1135_v9, %v6462_v45  ;;  %v1156_v32 = vmul.f32 %v1135_v9, %v6465_v46  ;;  %v1210_v46 = vrot.slane %v1205_v30, %v6388_v3 }
 0x237   : > { %v1152_v33 = vmul.f32 %v1143_v15, %v6572_v49  ;;  %v1157_v36 = vmul.f32 %v1143_v15, %v6575_v50  ;;  %v1218_v50 = vrot.slane %v1205_v30, %v6386_v2  ;;  %v1942_v9 = vrot.slane %v1933_v57, %v6392_v5  ;;  %v2020_v15 = vld [vmem:[#allocation7 + $0x43] ss:$8 sm:$0xf] }
 0x238   : > { %v1161_v37 = vpack.c.bf16 %v1156_v32, %v1151_v11  ;;  %v2025_v11 = vrot.slane %v2020_v15, %v6388_v3  ;;  %v1950_v32 = vrot.slane %v1933_v57, %v6390_v4 }
 0x239   : > { %v6821_v38 = vpop.permute.xlu0 %1138  ;;  %v1162_v19 = vpack.c.bf16 %v1157_v36, %v1152_v33  ;;  %v2033_v33 = vrot.slane %v2020_v15, %v6386_v2  ;;  %v2029_v36 = vrot.slane %v2020_v15, %v6392_v5 }
 0x23a   : > { %v1144_v20 = vsel %vm469_vm8, %v1137_v31, %v6821_v38  ;;  %1171 = vrot.lane.b32.xlu0 %v1161_v37, %s9155_s19  ;;  %v1946_v31 = vrot.slane %v1933_v57, %v6386_v2  ;;  %v2107_v37 = vld [vmem:[#allocation7 + $0x44] ss:$8 sm:$0xf] }
 0x23b   : > { %v1153_v42 = vmul.f32 %v1144_v20, %v6617_v26  ;;  %v1158_v45 = vmul.f32 %v1144_v20, %v6620_v27  ;;  %1173 = vrot.lane.b32.xlu1 %v1162_v19, %s9155_s19  ;;  %v1299_v26 = vrot.slane %v1294_v55, %v6388_v3  ;;  %v1222_v27 = vrot.slane %v1205_v30, %v6390_v4  ;;  %v2281_v55 = vld [vmem:[#allocation7 + $0x46] ss:$8 sm:$0xf] }
 0x23c   : > { %v2112_v30 = vrot.slane %v2107_v37, %v6388_v3  ;;  %v2037_v19 = vrot.slane %v2020_v15, %v6390_v4  ;;  %v2120_v20 = vrot.slane %v2107_v37, %v6386_v2  ;;  %v6981_v57 = vld [vmem:[%s6376_s20 + $0x48] sm:$0xff]  ;;  %v6987_v15 = vld [vmem:[%s6376_s20] sm:$0xff] }
 0x23d   : > { %v1163_v49 = vpack.c.bf16 %v1158_v45, %v1153_v42  ;;  %v2116_v42 = vrot.slane %v2107_v37, %v6392_v5  ;;  %v2194_v45 = vld [vmem:[#allocation7 + $0x45] ss:$8 sm:$0xf] }
 0x23f   : > { %1223 = vrot.lane.b32.xlu1 %v1210_v46, %s9118_s29  ;;  %1175 = vrot.lane.b32.xlu0 %v1163_v49, %s9155_s19  ;;  %v2199_v46 = vrot.slane %v2194_v45, %v6388_v3  ;;  %v2124_v49 = vrot.slane %v2107_v37, %v6390_v4  ;;  %v6996_v37 = vld [vmem:[%s6376_s20 + $0x20] sm:$0xff] }
 0x243   : > { %1227 = vrot.lane.b32.xlu1 %v1218_v50, %s9118_s29  ;;  %1225 = vrot.lane.b32.xlu0 %v1214_v47, %s9118_s29  ;;  %v2207_v50 = vrot.slane %v2194_v45, %v6386_v2  ;;  %v2203_v47 = vrot.slane %v2194_v45, %v6392_v5 }
 0x247   : > { %1312 = vrot.lane.b32.xlu1 %v1299_v26, %s9120_s13  ;;  %1229 = vrot.lane.b32.xlu0 %v1222_v27, %s9118_s29  ;;  %s9132_s29 = smov 1   ;;  %v2286_v26 = vrot.slane %v2281_v55, %v6388_v3  ;;  %v2211_v27 = vrot.slane %v2194_v45, %v6390_v4 }
 0x24b   : > { %1316 = vrot.lane.b32.xlu1 %v1307_v34, %s9120_s13  ;;  %1314 = vrot.lane.b32.xlu0 %v1303_v43, %s9120_s13  ;;  %v2294_v34 = vrot.slane %v2281_v55, %v6386_v2  ;;  %v2290_v43 = vrot.slane %v2281_v55, %v6392_v5 }
 0x24f   : > { %1401 = vrot.lane.b32.xlu1 %v1388_v24, %s9122_s22  ;;  %1318 = vrot.lane.b32.xlu0 %v1311_v25, %s9120_s13  ;;  %s9130_s13 = smov 7   ;;  %v1141_v24 = vpop.permute.xlu1 %1140  ;;  %v2373_v25 = vrot.slane %v2368_v44, %v6388_v3 }
 0x253   : > { %1405 = vrot.lane.b32.xlu1 %v1396_v53, %s9122_s22  ;;  %1403 = vrot.lane.b32.xlu0 %v1392_v58, %s9122_s22  ;;  %v2298_v53 = vrot.slane %v2281_v55, %v6390_v4  ;;  %v1145_v58 = vsel %vm469_vm8, %v6821_v38, %v1141_v24  ;;  %v2455_v38 = vld [vmem:[#allocation7 + $0x60] ss:$8 sm:$0xf] }
 0x254   : > { %v2464_v40 = vrot.slane %v2455_v38, %v6392_v5 }
 0x257   : > { %1490 = vrot.lane.b32.xlu1 %v1477_v41, %s9124_s24  ;;  %1407 = vrot.lane.b32.xlu0 %v1400_v63, %s9122_s22  ;;  %s9128_s22 = smov 8   ;;  %v2377_v41 = vrot.slane %v2368_v44, %v6392_v5  ;;  %v1154_v63 = vmul.f32 %v1145_v58, %v6595_v7  ;;  %v2460_v7 = vrot.slane %v2455_v38, %v6388_v3 }
 0x25b   : > { %1494 = vrot.lane.b32.xlu1 %v1485_v35, %s9124_s24  ;;  %1492 = vrot.lane.b32.xlu0 %v1481_v60, %s9124_s24  ;;  %v1159_v35 = vmul.f32 %v1145_v58, %v6598_v8  ;;  %v2385_v60 = vrot.slane %v2368_v44, %v6390_v4 }
 0x25f   : > { %1595 = vrot.lane.b32.xlu1 %v1582_v6, %s9132_s29  ;;  %1496 = vrot.lane.b32.xlu0 %v1489_v62, %s9124_s24  ;;  %s9126_s24 = smov 9   ;;  %v1155_v6 = vmul.f32 %v1141_v24, %v6476_v51  ;;  %v1160_v62 = vmul.f32 %v1141_v24, %v6479_v52  ;;  %v2468_v52 = vrot.slane %v2455_v38, %v6386_v2 }
 0x263   : > { %1599 = vrot.lane.b32.xlu1 %v1590_v48, %s9132_s29  ;;  %1597 = vrot.lane.b32.xlu0 %v1586_v13, %s9132_s29  ;;  %v1164_v48 = vpack.c.bf16 %v1159_v35, %v1154_v63 }
 0x267   : > { %1684 = vrot.lane.b32.xlu1 %v1671_v12, %s9130_s13  ;;  %1601 = vrot.lane.b32.xlu0 %v1594_v14, %s9132_s29  ;;  %v1165_v12 = vpack.c.bf16 %v1160_v62, %v1155_v6 }
 0x26b   : > { %1688 = vrot.lane.b32.xlu1 %v1679_v16, %s9130_s13  ;;  %1686 = vrot.lane.b32.xlu0 %v1675_v39, %s9130_s13  ;;  %v6959_v16 = vld [vmem:[%s6376_s20 + $0x8] sm:$0xff]  ;;  %v6962_v39 = vld [vmem:[%s6376_s20 + $0x38] sm:$0xff] }
 0x26f   : > { %1773 = vrot.lane.b32.xlu1 %v1760_v17, %s9128_s22  ;;  %1690 = vrot.lane.b32.xlu0 %v1683_v0, %s9130_s13 }
 0x273   : > { %1777 = vrot.lane.b32.xlu1 %v1768_v29, %s9128_s22  ;;  %1775 = vrot.lane.b32.xlu0 %v1764_v1, %s9128_s22  ;;  %v6967_v1 = vld [vmem:[%s6376_s20 + $0x10] sm:$0xff] }
 0x277   : > { %1862 = vrot.lane.b32.xlu1 %v1849_v54, %s9126_s24  ;;  %1779 = vrot.lane.b32.xlu0 %v1772_v23, %s9128_s22 }
 0x27b   : > { %1866 = vrot.lane.b32.xlu1 %v1857_v18, %s9126_s24  ;;  %1864 = vrot.lane.b32.xlu0 %v1853_v56, %s9126_s24  ;;  %v6978_v56 = vld [vmem:[%s6376_s20 + $0x18] sm:$0xff] }
 0x27f   : > { %1951 = vrot.lane.b32.xlu1 %v1938_v21, %s9155_s19  ;;  %1868 = vrot.lane.b32.xlu0 %v1861_v28, %s9126_s24  ;;  %v2472_v21 = vrot.slane %v2455_v38, %v6390_v4 }
 0x283   : > { %1955 = vrot.lane.b32.xlu1 %v1946_v31, %s9155_s19  ;;  %1953 = vrot.lane.b32.xlu0 %v1942_v9, %s9155_s19 }
 0x287   : > { %2038 = vrot.lane.b32.xlu1 %v2025_v11, %s9153_s21  ;;  %1957 = vrot.lane.b32.xlu0 %v1950_v32, %s9155_s19  ;;  %v6990_v11 = vld [vmem:[%s6376_s20 + $0x30] sm:$0xff] }
 0x28b   : > { %2042 = vrot.lane.b32.xlu1 %v2033_v33, %s9153_s21  ;;  %2040 = vrot.lane.b32.xlu0 %v2029_v36, %s9153_s21 }
 0x28f   : > { %2125 = vrot.lane.b32.xlu1 %v2112_v30, %s9143_s30  ;;  %2044 = vrot.lane.b32.xlu0 %v2037_v19, %s9153_s21  ;;  %v6999_v30 = vld [vmem:[%s6376_s20 + $0x50] sm:$0xff] }
 0x293   : > { %2129 = vrot.lane.b32.xlu1 %v2120_v20, %s9143_s30  ;;  %2127 = vrot.lane.b32.xlu0 %v2116_v42, %s9143_s30 }
 0x297   : > { %2212 = vrot.lane.b32.xlu1 %v2199_v46, %s9141_s23  ;;  %2131 = vrot.lane.b32.xlu0 %v2124_v49, %s9143_s30 }
 0x29b   : > { %2216 = vrot.lane.b32.xlu1 %v2207_v50, %s9141_s23  ;;  %2214 = vrot.lane.b32.xlu0 %v2203_v47, %s9141_s23 }
 0x29f   : > { %2299 = vrot.lane.b32.xlu1 %v2286_v26, %s9139_s27  ;;  %2218 = vrot.lane.b32.xlu0 %v2211_v27, %s9141_s23  ;;  %v2542_v27 = vld [vmem:[#allocation7 + $0x61] ss:$8 sm:$0xf] }
 0x2a0   : > { %v2559_v35 = vrot.slane %v2542_v27, %v6390_v4 }
 0x2a3   : > { %2303 = vrot.lane.b32.xlu1 %v2294_v34, %s9139_s27  ;;  %2301 = vrot.lane.b32.xlu0 %v2290_v43, %s9139_s27 }
 0x2a7   : > { %2386 = vrot.lane.b32.xlu1 %v2373_v25, %s9137_s28  ;;  %2305 = vrot.lane.b32.xlu0 %v2298_v53, %s9139_s27  ;;  %v2551_v25 = vrot.slane %v2542_v27, %v6392_v5  ;;  %v2547_v53 = vrot.slane %v2542_v27, %v6388_v3 }
 0x2ab   : > { %2390 = vrot.lane.b32.xlu1 %v2381_v10, %s9137_s28  ;;  %2388 = vrot.lane.b32.xlu0 %v2377_v41, %s9137_s28 }
 0x2ac   : > { %v1172_v61 = vpop.permute.xlu0 %1171 }
 0x2ad   : > { %v1174_v13 = vpop.permute.xlu1 %1173 }
 0x2ae   : > { %v1182_v14 = vsel %vm430_vm0, %v1172_v61, %v1174_v13 }
 0x2af   : > { %1177 = vrot.lane.b32.xlu1 %v1164_v48, %s9155_s19  ;;  %2392 = vrot.lane.b32.xlu0 %v2385_v60, %s9137_s28  ;;  %v2555_v60 = vrot.slane %v2542_v27, %v6386_v2 }
 0x2b1   : > { %v1224_v8 = vpop.permute.xlu1 %1223  ;;  %v6950_v59 = vpop.permute.xlu0 %1175 }
 0x2b2   : > { %v1183_v51 = vsel %vm430_vm0, %v1174_v13, %v6950_v59  ;;  %v1240_v42 = vmul.f32 %v1224_v8, %v6987_v15  ;;  %v1245_v45 = vmul.f32 %v1224_v8, %v6990_v11 }
 0x2b3   : > { %2473 = vrot.lane.b32.xlu1 %v2460_v7, %s9135_s18  ;;  %1179 = vrot.lane.b32.xlu0 %v1165_v12, %s9155_s19 }
 0x2b4   : > { %2868 = vmatprep.subr.bf16.mxu0 %v1183_v51  ;;  %v1250_v44 = vpack.c.bf16 %v1245_v45, %v1240_v42 }
 0x2b5   : > { %2869 = vmatpush1.bf16.msra.mxu0 %v1182_v14  ;;  %v1228_v17 = vpop.permute.xlu1 %1227  ;;  %v1226_v0 = vpop.permute.xlu0 %1225 }
 0x2b6   : > { %v1232_v29 = vsel %vm9134_vm9, %v1224_v8, %v1226_v0  ;;  %v1233_v54 = vsel %vm9134_vm9, %v1226_v0, %v1228_v17 }
 0x2b7   : > { %v1241_v23 = vmul.f32 %v1232_v29, %v6959_v16  ;;  %v1246_v18 = vmul.f32 %v1232_v29, %v6962_v39  ;;  %2477 = vrot.lane.b32.xlu1 %v2468_v52, %s9135_s18  ;;  %2475 = vrot.lane.b32.xlu0 %v2464_v40, %s9135_s18  ;;  %v1242_v32 = vmul.f32 %v1233_v54, %v6967_v1  ;;  %v2629_v29 = vld [vmem:[#allocation7 + $0x62] ss:$8 sm:$0xf] }
 0x2b8   : > { %v1247_v33 = vmul.f32 %v1233_v54, %v6970_v22  ;;  %v2638_v42 = vrot.slane %v2629_v29, %v6392_v5 }
 0x2b9   : > { %v1251_v28 = vpack.c.bf16 %v1246_v18, %v1241_v23  ;;  %v6984_v31 = vpop.permute.xlu1 %1312  ;;  %v1230_v9 = vpop.permute.xlu0 %1229 }
 0x2ba   : > { %v1234_v36 = vsel %vm9134_vm9, %v1228_v17, %v1230_v9  ;;  %v1252_v47 = vpack.c.bf16 %v1247_v33, %v1242_v32  ;;  %v1244_v55 = vmul.f32 %v1230_v9, %v6996_v37  ;;  %v1249_v26 = vmul.f32 %v1230_v9, %v6999_v30 }
 0x2bb   : > { %v1243_v19 = vmul.f32 %v1234_v36, %v6978_v56  ;;  %v1248_v20 = vmul.f32 %v1234_v36, %v6981_v57  ;;  %1262 = vrot.lane.b32.xlu1 %v1251_v28, %s9126_s24  ;;  %2479 = vrot.lane.b32.xlu0 %v2472_v21, %s9135_s18  ;;  %v1329_v21 = vmul.f32 %v6984_v31, %v6987_v15  ;;  %vm9149_vm9 = vcmask 72704  }
 0x2bc   : > { %v1254_v24 = vpack.c.bf16 %v1249_v26, %v1244_v55  ;;  %v1334_v28 = vmul.f32 %v6984_v31, %v6990_v11  ;;  %v2634_v32 = vrot.slane %v2629_v29, %v6388_v3  ;;  %v2646_v26 = vrot.slane %v2629_v29, %v6390_v4 }
 0x2bd   : > { %v1317_v46 = vpop.permute.xlu1 %1316  ;;  %v1315_v49 = vpop.permute.xlu0 %1314  ;;  %v1253_v50 = vpack.c.bf16 %v1248_v20, %v1243_v19 }
 0x2be   : > { %v1322_v41 = vsel %vm1320_vm10, %v1315_v49, %v1317_v46  ;;  %v1321_v63 = vsel %vm1320_vm10, %v6984_v31, %v1315_v49  ;;  %v1339_v20 = vpack.c.bf16 %v1334_v28, %v1329_v21  ;;  %v2642_v31 = vrot.slane %v2629_v29, %v6386_v2 }
 0x2bf   : > { %1266 = vrot.lane.b32.xlu1 %v1253_v50, %s9126_s24  ;;  %1264 = vrot.lane.b32.xlu0 %v1252_v47, %s9126_s24  ;;  %v1331_v61 = vmul.f32 %v1322_v41, %v6967_v1  ;;  %v1336_v38 = vmul.f32 %v1322_v41, %v6970_v22  ;;  %v1330_v48 = vmul.f32 %v1321_v63, %v6959_v16 }
 0x2c0   : > { %v1335_v13 = vmul.f32 %v1321_v63, %v6962_v39 }
 0x2c1   : > { %v7011_v34 = vpop.permute.xlu1 %1401  ;;  %v1319_v43 = vpop.permute.xlu0 %1318  ;;  %v1341_v8 = vpack.c.bf16 %v1336_v38, %v1331_v61 }
 0x2c2   : > { %v1323_v7 = vsel %vm1320_vm10, %v1317_v46, %v1319_v43  ;;  %v1333_v12 = vmul.f32 %v1319_v43, %v6996_v37  ;;  %v1338_v51 = vmul.f32 %v1319_v43, %v6999_v30  ;;  %v1340_v40 = vpack.c.bf16 %v1335_v13, %v1330_v48 }
 0x2c3   : > { %1260 = vrot.lane.b32.xlu1 %v1250_v44, %s9126_s24  ;;  %1268 = vrot.lane.b32.xlu0 %v1254_v24, %s9126_s24  ;;  %v1332_v17 = vmul.f32 %v1323_v7, %v6978_v56  ;;  %v1337_v0 = vmul.f32 %v1323_v7, %v6981_v57  ;;  %s9181_s24 = smov 127  }
 0x2c4   : > { %v1343_v18 = vpack.c.bf16 %v1338_v51, %v1333_v12 }
 0x2c5   : > { %v1406_v58 = vpop.permute.xlu1 %1405  ;;  %v1404_v10 = vpop.permute.xlu0 %1403  ;;  %v1342_v9 = vpack.c.bf16 %v1337_v0, %v1332_v17 }
 0x2c6   : > { %v1410_v19 = vsel %vm1409_vm11, %v7011_v34, %v1404_v10  ;;  %v1411_v55 = vsel %vm1409_vm11, %v1404_v10, %v1406_v58  ;;  %v1423_v10 = vmul.f32 %v7011_v34, %v6990_v11 }
 0x2c7   : > { %2562 = vrot.lane.b32.xlu1 %v2551_v25, %s9145_s26  ;;  %2560 = vrot.lane.b32.xlu0 %v2547_v53, %s9145_s26  ;;  %v1419_v45 = vmul.f32 %v1410_v19, %v6959_v16  ;;  %v1424_v46 = vmul.f32 %v1410_v19, %v6962_v39  ;;  %v1420_v53 = vmul.f32 %v1411_v55, %v6967_v1 }
 0x2c8   : > { %v1425_v41 = vmul.f32 %v1411_v55, %v6970_v22 }
 0x2c9   : > { %v7026_v6 = vpop.permute.xlu1 %1490  ;;  %v1408_v62 = vpop.permute.xlu0 %1407  ;;  %v1429_v27 = vpack.c.bf16 %v1424_v46, %v1419_v45 }
 0x2ca   : > { %v1412_v47 = vsel %vm1409_vm11, %v1406_v58, %v1408_v62  ;;  %v1418_v58 = vmul.f32 %v7011_v34, %v6987_v15  ;;  %v1430_v61 = vpack.c.bf16 %v1425_v41, %v1420_v53  ;;  %v1422_v38 = vmul.f32 %v1408_v62, %v6996_v37 }
 0x2cb   : > { %2566 = vrot.lane.b32.xlu1 %v2559_v35, %s9145_s26  ;;  %2564 = vrot.lane.b32.xlu0 %v2555_v60, %s9145_s26  ;;  %v1421_v43 = vmul.f32 %v1412_v47, %v6978_v56  ;;  %v1426_v44 = vmul.f32 %v1412_v47, %v6981_v57  ;;  %v1427_v48 = vmul.f32 %v1408_v62, %v6999_v30 }
 0x2cc   : > { %v1507_v47 = vmul.f32 %v7026_v6, %v6987_v15  ;;  %v1512_v55 = vmul.f32 %v7026_v6, %v6990_v11 }
 0x2cd   : > { %v7035_v52 = vpop.permute.xlu1 %1494  ;;  %v1493_v14 = vpop.permute.xlu0 %1492  ;;  %v1431_v60 = vpack.c.bf16 %v1426_v44, %v1421_v43  ;;  %v1432_v0 = vpack.c.bf16 %v1427_v48, %v1422_v38 }
 0x2ce   : > { %v1500_v13 = vsel %vm1498_vm12, %v1493_v14, %v7035_v52  ;;  %v1499_v7 = vsel %vm1498_vm12, %v7026_v6, %v1493_v14 }
 0x2cf   : > { %1353 = vrot.lane.b32.xlu1 %v1341_v8, %s9128_s22  ;;  %1351 = vrot.lane.b32.xlu0 %v1340_v40, %s9128_s22  ;;  %v1509_v34 = vmul.f32 %v1500_v13, %v6967_v1  ;;  %v1514_v8 = vmul.f32 %v1500_v13, %v6970_v22  ;;  %v1428_v40 = vpack.c.bf16 %v1423_v10, %v1418_v58 }
 0x2d0   : > { %v1508_v62 = vmul.f32 %v1499_v7, %v6959_v16  ;;  %v1513_v17 = vmul.f32 %v1499_v7, %v6962_v39  ;;  %v1517_v10 = vpack.c.bf16 %v1512_v55, %v1507_v47 }
 0x2d1   : > { %v7041_v54 = vpop.permute.xlu1 %1595  ;;  %v1497_v23 = vpop.permute.xlu0 %1496  ;;  %v1519_v29 = vpack.c.bf16 %v1514_v8, %v1509_v34 }
 0x2d2   : > { %v1501_v14 = vsel %vm1498_vm12, %v7035_v52, %v1497_v23  ;;  %v1516_v21 = vmul.f32 %v1497_v23, %v6999_v30 }
 0x2d3   : > { %1357 = vrot.lane.b32.xlu1 %v1343_v18, %s9128_s22  ;;  %1355 = vrot.lane.b32.xlu0 %v1342_v9, %s9128_s22  ;;  %v1511_v18 = vmul.f32 %v1497_v23, %v6996_v37  ;;  %v1510_v19 = vmul.f32 %v1501_v14, %v6978_v56 }
 0x2d5   : > { %v7050_v33 = vpop.permute.xlu1 %1599  ;;  %v7052_v36 = vpop.permute.xlu0 %1597  ;;  %v1521_v46 = vpack.c.bf16 %v1516_v21, %v1511_v18 }
 0x2d6   : > { %v1604_v52 = vsel %vm1537_vm13, %v7041_v54, %v7052_v36  ;;  %v1605_v43 = vsel %vm1537_vm13, %v7052_v36, %v7050_v33  ;;  %v1612_v36 = vmul.f32 %v7041_v54, %v6959_v16 }
 0x2d7   : > { %2647 = vrot.lane.b32.xlu1 %v2634_v32, %s9147_s1  ;;  %1349 = vrot.lane.b32.xlu0 %v1339_v20, %s9128_s22  ;;  %v1518_v32 = vpack.c.bf16 %v1513_v17, %v1508_v62  ;;  %v1515_v20 = vmul.f32 %v1501_v14, %v6981_v57  ;;  %v1618_v23 = vmul.f32 %v1604_v52, %v6970_v22  ;;  %s9182_s22 = smov 121  }
 0x2d8   : > { %v1614_v6 = vmul.f32 %v1605_v43, %v6978_v56  ;;  %v1619_v58 = vmul.f32 %v1605_v43, %v6981_v57 }
 0x2d9   : > { %v7062_v49 = vpop.permute.xlu1 %1684  ;;  %v7064_v50 = vpop.permute.xlu0 %1601 }
 0x2da   : > { %v1624_v7 = vpack.c.bf16 %v1619_v58, %v1614_v6 }
 0x2db   : > { %2651 = vrot.lane.b32.xlu1 %v2642_v31, %s9147_s1  ;;  %2649 = vrot.lane.b32.xlu0 %v2638_v42, %s9147_s1  ;;  %v1613_v31 = vmul.f32 %v1604_v52, %v6967_v1 }
 0x2dd   : > { %v7073_v24 = vpop.permute.xlu1 %1688  ;;  %v7075_v25 = vpop.permute.xlu0 %1686  ;;  %v1623_v44 = vpack.c.bf16 %v1618_v23, %v1613_v31 }
 0x2df   : > { %1440 = vrot.lane.b32.xlu1 %v1429_v27, %s9130_s13  ;;  %2653 = vrot.lane.b32.xlu0 %v2646_v26, %s9147_s1  ;;  %v1606_v26 = vsel %vm1537_vm13, %v7050_v33, %v7064_v50  ;;  %v1520_v27 = vpack.c.bf16 %v1515_v20, %v1510_v19  ;;  %v7152_v33 = vld [vmem:[%s6376_s20 + $0x58] sm:$0xff] }
 0x2e0   : > { %v1615_v15 = vmul.f32 %v1606_v26, %v6996_v37  ;;  %v1620_v53 = vmul.f32 %v1606_v26, %v6999_v30  ;;  %v1621_v8 = vmul.f32 %v7064_v50, %v7152_v33 }
 0x2e1   : > { %v7085_v63 = vpop.permute.xlu1 %1773  ;;  %v7087_v35 = vpop.permute.xlu0 %1690 }
 0x2e2   : > { %v1625_v13 = vpack.c.bf16 %v1620_v53, %v1615_v15  ;;  %v1710_v52 = vmul.f32 %v7087_v35, %v7152_v33  ;;  %v1701_v15 = vmul.f32 %v7062_v49, %v6959_v16  ;;  %v1706_v53 = vmul.f32 %v7062_v49, %v6962_v39 }
 0x2e3   : > { %1444 = vrot.lane.b32.xlu1 %v1431_v60, %s9130_s13  ;;  %1442 = vrot.lane.b32.xlu0 %v1430_v61, %s9130_s13  ;;  %v7149_v60 = vld [vmem:[%s6376_s20 + $0x28] sm:$0xff]  ;;  %v1617_v61 = vmul.f32 %v7041_v54, %v6962_v39  ;;  %v1693_v54 = vsel %vm9152_vm14, %v7062_v49, %v7075_v25 }
 0x2e4   : > { %v1616_v34 = vmul.f32 %v7064_v50, %v7149_v60  ;;  %v1707_v18 = vmul.f32 %v1693_v54, %v6970_v22  ;;  %v1705_v20 = vmul.f32 %v7087_v35, %v7149_v60 }
 0x2e5   : > { %v7099_v12 = vpop.permute.xlu1 %1777  ;;  %v7101_v51 = vpop.permute.xlu0 %1775  ;;  %v1622_v50 = vpack.c.bf16 %v1617_v61, %v1612_v36 }
 0x2e6   : > { %v1626_v21 = vpack.c.bf16 %v1621_v8, %v1616_v34  ;;  %v1782_v55 = vsel %vm9151_vm15, %v7085_v63, %v7101_v51  ;;  %v1783_v36 = vsel %vm9151_vm15, %v7101_v51, %v7099_v12  ;;  %v1790_v51 = vmul.f32 %v7085_v63, %v6959_v16 }
 0x2e7   : > { %1438 = vrot.lane.b32.xlu1 %v1428_v40, %s9130_s13  ;;  %1446 = vrot.lane.b32.xlu0 %v1432_v0, %s9130_s13  ;;  %v1694_v40 = vsel %vm9152_vm14, %v7075_v25, %v7073_v24  ;;  %v1702_v25 = vmul.f32 %v1693_v54, %v6967_v1  ;;  %v1791_v26 = vmul.f32 %v1782_v55, %v6967_v1  ;;  %s9185_s13 = smov 119  }
 0x2e8   : > { %v1703_v62 = vmul.f32 %v1694_v40, %v6978_v56  ;;  %v1708_v17 = vmul.f32 %v1694_v40, %v6981_v57  ;;  %v1792_v8 = vmul.f32 %v1783_v36, %v6978_v56  ;;  %v1797_v40 = vmul.f32 %v1783_v36, %v6981_v57 }
 0x2e9   : > { %v7111_v28 = vpop.permute.xlu1 %1862  ;;  %v7113_v9 = vpop.permute.xlu0 %1779  ;;  %v1795_v54 = vmul.f32 %v7085_v63, %v6962_v39 }
 0x2ea   : > { %v1713_v19 = vpack.c.bf16 %v1708_v17, %v1703_v62  ;;  %v1784_v6 = vsel %vm9151_vm15, %v7099_v12, %v7113_v9  ;;  %v1711_v12 = vpack.c.bf16 %v1706_v53, %v1701_v15 }
 0x2eb   : > { %1531 = vrot.lane.b32.xlu1 %v1519_v29, %s9132_s29  ;;  %1529 = vrot.lane.b32.xlu0 %v1518_v32, %s9132_s29  ;;  %v6176_v29 = vmov 0   ;;  %v1695_v32 = vsel %vm9152_vm14, %v7073_v24, %v7087_v35  ;;  %v1796_v35 = vmul.f32 %v1782_v55, %v6970_v22  ;;  %v1793_v49 = vmul.f32 %v1784_v6, %v6996_v37 }
 0x2ec   : > { %6012 = vset.pattern.permute.xlu1 %v6176_v29  ;;  %6011 = vset.pattern.permute.xlu0 %v6176_v29  ;;  %v1704_v47 = vmul.f32 %v1695_v32, %v6996_v37  ;;  %v1709_v24 = vmul.f32 %v1695_v32, %v6999_v30 }
 0x2ed   : > { %v7124_v42 = vpop.permute.xlu1 %1866  ;;  %v7126_v45 = vpop.permute.xlu0 %1864  ;;  %v1801_v61 = vpack.c.bf16 %v1796_v35, %v1791_v26 }
 0x2ee   : > { %v1714_v58 = vpack.c.bf16 %v1709_v24, %v1704_v47  ;;  %v1872_v32 = vsel %vm9149_vm9, %v7126_v45, %v7124_v42  ;;  %v1871_v63 = vsel %vm9149_vm9, %v7111_v28, %v7126_v45 }
 0x2ef   : > { %1535 = vrot.lane.b32.xlu1 %v1521_v46, %s9132_s29  ;;  %1533 = vrot.lane.b32.xlu0 %v1520_v27, %s9132_s29  ;;  %v1712_v46 = vpack.c.bf16 %v1707_v18, %v1702_v25  ;;  %v1802_v25 = vpack.c.bf16 %v1797_v40, %v1792_v8  ;;  %v1794_v18 = vmul.f32 %v7113_v9, %v7149_v60 }
 0x2f0   : > { %v1880_v47 = vmul.f32 %v1871_v63, %v6967_v1  ;;  %v1885_v24 = vmul.f32 %v1871_v63, %v6970_v22  ;;  %v1879_v40 = vmul.f32 %v7111_v28, %v6959_v16 }
 0x2f1   : > { %v7142_v41 = vpop.permute.xlu1 %1951  ;;  %v7144_v11 = vpop.permute.xlu0 %1868 }
 0x2f2   : > { %v1873_v45 = vsel %vm9149_vm9, %v7124_v42, %v7144_v11  ;;  %v1883_v35 = vmul.f32 %v7144_v11, %v7149_v60 }
 0x2f3   : > { %1634 = vrot.lane.b32.xlu1 %v1623_v44, %s9181_s24  ;;  %1527 = vrot.lane.b32.xlu0 %v1517_v10, %s9132_s29  ;;  %v1715_v44 = vpack.c.bf16 %v1710_v52, %v1705_v20  ;;  %v6015_v10 = vld [vmem:[%s9183_s2 + $0x4] ss:$16 sps:$4 sm:$0xff]   ;;  %s9184_s29 = smov 120   ;;  %v1886_v20 = vmul.f32 %v1872_v32, %v6981_v57  ;;  %v1887_v42 = vmul.f32 %v1873_v45, %v6999_v30 }
 0x2f4   : > { %2884 = vmatprep.mubr.bf16.mxu0 %v6015_v10  ;;  %2970 = vmatprep.mubr.bf16.mxu1 %v6015_v10 }
 0x2f5   : > { %v7160_v38 = vpop.permute.xlu1 %1955  ;;  %v7162_v48 = vpop.permute.xlu0 %1953 }
 0x2f6   : > { %v1959_v10 = vsel %vm430_vm0, %v7142_v41, %v7162_v48 }
 0x2f7   : > { %1638 = vrot.lane.b32.xlu1 %v1625_v13, %s9181_s24  ;;  %1636 = vrot.lane.b32.xlu0 %v1624_v7, %s9181_s24  ;;  %v1798_v13 = vmul.f32 %v1784_v6, %v6999_v30  ;;  %v1890_v6 = vpack.c.bf16 %v1885_v24, %v1880_v47  ;;  %v1968_v36 = vmul.f32 %v1959_v10, %v6967_v1 }
 0x2f9   : > { %v7178_v0 = vpop.permute.xlu1 %2038  ;;  %v7180_v14 = vpop.permute.xlu0 %1957 }
 0x2fb   : > { %1632 = vrot.lane.b32.xlu1 %v1622_v50, %s9181_s24  ;;  %1640 = vrot.lane.b32.xlu0 %v1626_v21, %s9181_s24  ;;  %v1803_v50 = vpack.c.bf16 %v1798_v13, %v1793_v49  ;;  %v1799_v21 = vmul.f32 %v7113_v9, %v7152_v33  ;;  %v1800_v9 = vpack.c.bf16 %v1795_v54, %v1790_v51 }
 0x2fc   : > { %v1961_v51 = vsel %vm430_vm0, %v7160_v38, %v7180_v14 }
 0x2fd   : > { %v7195_v31 = vpop.permute.xlu1 %2042  ;;  %v7197_v23 = vpop.permute.xlu0 %2040  ;;  %v1804_v55 = vpack.c.bf16 %v1799_v21, %v1794_v18  ;;  %v1970_v18 = vmul.f32 %v1961_v51, %v6996_v37  ;;  %v1975_v21 = vmul.f32 %v1961_v51, %v6999_v30 }
 0x2ff   : > { %1725 = vrot.lane.b32.xlu1 %v1713_v19, %s9182_s22  ;;  %1723 = vrot.lane.b32.xlu0 %v1712_v46, %s9182_s22  ;;  %v1881_v19 = vmul.f32 %v1872_v32, %v6978_v56  ;;  %v1980_v24 = vpack.c.bf16 %v1975_v21, %v1970_v18 }
 0x301   : > { %v7208_v27 = vpop.permute.xlu1 %2125  ;;  %v7210_v43 = vpop.permute.xlu0 %2044  ;;  %v1891_v26 = vpack.c.bf16 %v1886_v20, %v1881_v19  ;;  %v1972_v19 = vmul.f32 %v7142_v41, %v6962_v39 }
 0x303   : > { %1729 = vrot.lane.b32.xlu1 %v1715_v44, %s9182_s22  ;;  %1727 = vrot.lane.b32.xlu0 %v1714_v58, %s9182_s22  ;;  %v1888_v44 = vmul.f32 %v7144_v11, %v7152_v33  ;;  %v1882_v58 = vmul.f32 %v1873_v45, %v6996_v37  ;;  %v1960_v11 = vsel %vm430_vm0, %v7162_v48, %v7160_v38 }
 0x304   : > { %v1969_v54 = vmul.f32 %v1960_v11, %v6978_v56  ;;  %v1967_v38 = vmul.f32 %v7142_v41, %v6959_v16  ;;  %v1976_v45 = vmul.f32 %v7180_v14, %v7152_v33  ;;  %v2047_v41 = vsel %vm519_vm1, %v7197_v23, %v7195_v31 }
 0x305   : > { %v7229_v7 = vpop.permute.xlu1 %2129  ;;  %v7231_v34 = vpop.permute.xlu0 %2127  ;;  %v1893_v8 = vpack.c.bf16 %v1888_v44, %v1883_v35  ;;  %v1892_v48 = vpack.c.bf16 %v1887_v42, %v1882_v58 }
 0x306   : > { %v1977_v35 = vpack.c.bf16 %v1972_v19, %v1967_v38  ;;  %v2054_v38 = vmul.f32 %v7178_v0, %v6959_v16  ;;  %v2059_v19 = vmul.f32 %v7178_v0, %v6962_v39 }
 0x307   : > { %1812 = vrot.lane.b32.xlu1 %v1801_v61, %s9184_s29  ;;  %1721 = vrot.lane.b32.xlu0 %v1711_v12, %s9182_s22  ;;  %v1973_v61 = vmul.f32 %v1959_v10, %v6970_v22  ;;  %v1884_v12 = vmul.f32 %v7111_v28, %v6962_v39 }
 0x309   : > { %v7241_v62 = vpop.permute.xlu1 %2212  ;;  %v7243_v17 = vpop.permute.xlu0 %2131  ;;  %v1889_v63 = vpack.c.bf16 %v1884_v12, %v1879_v40  ;;  %v2063_v40 = vmul.f32 %v7210_v43, %v7152_v33 }
 0x30b   : > { %1816 = vrot.lane.b32.xlu1 %v1803_v50, %s9184_s29  ;;  %1814 = vrot.lane.b32.xlu0 %v1802_v25, %s9184_s29  ;;  %v1974_v50 = vmul.f32 %v1960_v11, %v6981_v57  ;;  %v1978_v25 = vpack.c.bf16 %v1973_v61, %v1968_v36 }
 0x30d   : > { %v7259_v52 = vpop.permute.xlu1 %2216  ;;  %v7261_v46 = vpop.permute.xlu0 %2214  ;;  %v1979_v20 = vpack.c.bf16 %v1974_v50, %v1969_v54 }
 0x30f   : > { %1810 = vrot.lane.b32.xlu1 %v1800_v9, %s9184_s29  ;;  %1818 = vrot.lane.b32.xlu0 %v1804_v55, %s9184_s29  ;;  %v1971_v55 = vmul.f32 %v7180_v14, %v7149_v60  ;;  %v2061_v14 = vmul.f32 %v2047_v41, %v6981_v57 }
 0x311   : > { %v7274_v15 = vpop.permute.xlu1 %2299  ;;  %v7276_v53 = vpop.permute.xlu0 %2218  ;;  %v1981_v11 = vpack.c.bf16 %v1976_v45, %v1971_v55  ;;  %v2134_v55 = vsel %vm608_vm2, %v7231_v34, %v7229_v7 }
 0x313   : > { %1903 = vrot.lane.b32.xlu1 %v1891_v26, %s9185_s13  ;;  %1901 = vrot.lane.b32.xlu0 %v1890_v6, %s9185_s13  ;;  %v2046_v26 = vsel %vm519_vm1, %v7178_v0, %v7197_v23  ;;  %v2056_v6 = vmul.f32 %v2047_v41, %v6978_v56  ;;  %v2048_v23 = vsel %vm519_vm1, %v7195_v31, %v7210_v43 }
 0x314   : > { %v2055_v44 = vmul.f32 %v2046_v26, %v6967_v1  ;;  %v2060_v58 = vmul.f32 %v2046_v26, %v6970_v22  ;;  %v2062_v54 = vmul.f32 %v2048_v23, %v6999_v30  ;;  %v2133_v31 = vsel %vm608_vm2, %v7208_v27, %v7231_v34 }
 0x315   : > { %v7290_v49 = vpop.permute.xlu1 %2303  ;;  %v7292_v13 = vpop.permute.xlu0 %2301  ;;  %v2066_v61 = vpack.c.bf16 %v2061_v14, %v2056_v6  ;;  %v2147_v18 = vmul.f32 %v2133_v31, %v6970_v22  ;;  %v2146_v34 = vmul.f32 %v7208_v27, %v6962_v39 }
 0x316   : > { %v2065_v36 = vpack.c.bf16 %v2060_v58, %v2055_v44  ;;  %v2148_v44 = vmul.f32 %v2134_v55, %v6981_v57  ;;  %v2064_v58 = vpack.c.bf16 %v2059_v19, %v2054_v38 }
 0x317   : > { %1907 = vrot.lane.b32.xlu1 %v1893_v8, %s9185_s13  ;;  %1905 = vrot.lane.b32.xlu0 %v1892_v48, %s9185_s13  ;;  %v2058_v8 = vmul.f32 %v7210_v43, %v7149_v60  ;;  %v2057_v48 = vmul.f32 %v2048_v23, %v6996_v37  ;;  %v2142_v43 = vmul.f32 %v2133_v31, %v6967_v1 }
 0x318   : > { %v2145_v23 = vmul.f32 %v7243_v17, %v7149_v60 }
 0x319   : > { %v7307_v32 = vpop.permute.xlu1 %2386  ;;  %v7309_v28 = vpop.permute.xlu0 %2305  ;;  %v2152_v45 = vpack.c.bf16 %v2147_v18, %v2142_v43  ;;  %v2222_v18 = vsel %vm697_vm3, %v7259_v52, %v7276_v53 }
 0x31b   : > { %1989 = vrot.lane.b32.xlu1 %v1978_v25, %s9147_s1  ;;  %1899 = vrot.lane.b32.xlu0 %v1889_v63, %s9185_s13  ;;  %v2068_v63 = vpack.c.bf16 %v2063_v40, %v2058_v8  ;;  %v2220_v40 = vsel %vm697_vm3, %v7241_v62, %v7261_v46 }
 0x31c   : > { %v2229_v31 = vmul.f32 %v2220_v40, %v6967_v1 }
 0x31d   : > { %v7317_v9 = vpop.permute.xlu1 %2390  ;;  %v7319_v47 = vpop.permute.xlu0 %2388 }
 0x31f   : > { %1993 = vrot.lane.b32.xlu1 %v1980_v24, %s9147_s1  ;;  %1991 = vrot.lane.b32.xlu0 %v1979_v20, %s9147_s1  ;;  %v2067_v24 = vpack.c.bf16 %v2062_v54, %v2057_v48 }
 0x321   : > { %v1178_v42 = vpop.permute.xlu1 %1177  ;;  %v7337_v10 = vpop.permute.xlu0 %2392 }
 0x322   : > { %v1184_v25 = vsel %vm430_vm0, %v6950_v59, %v1178_v42  ;;  %v2135_v59 = vsel %vm608_vm2, %v7229_v7, %v7243_v17  ;;  %v2141_v7 = vmul.f32 %v7208_v27, %v6959_v16 }
 0x323   : > { %1987 = vrot.lane.b32.xlu1 %v1977_v35, %s9147_s1  ;;  %1995 = vrot.lane.b32.xlu0 %v1981_v11, %s9147_s1  ;;  %v2144_v26 = vmul.f32 %v2135_v59, %v6996_v37  ;;  %v2149_v0 = vmul.f32 %v2135_v59, %v6999_v30  ;;  %v2143_v35 = vmul.f32 %v2134_v55, %v6978_v56  ;;  %s9201_s1 = smov 1  }
 0x324   : > { %v2151_v54 = vpack.c.bf16 %v2146_v34, %v2141_v7  ;;  %v2232_v59 = vmul.f32 %v7276_v53, %v7149_v60  ;;  %v2228_v7 = vmul.f32 %v7241_v62, %v6959_v16  ;;  %v2233_v34 = vmul.f32 %v7241_v62, %v6962_v39 }
 0x325   : > { %v7348_v12 = vpop.permute.xlu1 %2473  ;;  %v1180_v51 = vpop.permute.xlu0 %1179  ;;  %v2153_v11 = vpack.c.bf16 %v2148_v44, %v2143_v35 }
 0x326   : > { %v1185_v50 = vsel %vm430_vm0, %v1178_v42, %v1180_v51  ;;  %v2154_v42 = vpack.c.bf16 %v2149_v0, %v2144_v26  ;;  %v2236_v26 = vmul.f32 %v2222_v18, %v6999_v30  ;;  %v2307_v0 = vsel %vm786_vm4, %v7274_v15, %v7292_v13 }
 0x327   : > { %2078 = vrot.lane.b32.xlu1 %v2066_v61, %s9145_s26  ;;  %2954 = vmatprep.subr.bf16.mxu1 %v1185_v50  ;;  %v2221_v61 = vsel %vm697_vm3, %v7261_v46, %v7259_v52  ;;  %v2234_v50 = vmul.f32 %v2220_v40, %v6970_v22  ;;  %v2321_v35 = vmul.f32 %v2307_v0, %v6970_v22 }
 0x328   : > { %2076 = vrot.lane.b32.xlu0 %v2065_v36, %s9145_s26  ;;  %2955 = vmatpush1.bf16.msra.mxu1 %v1184_v25  ;;  %v2150_v36 = vmul.f32 %v7243_v17, %v7152_v33  ;;  %v2230_v51 = vmul.f32 %v2221_v61, %v6978_v56  ;;  %v2235_v17 = vmul.f32 %v2221_v61, %v6981_v57 }
 0x329   : > { %v7362_v21 = vpop.permute.xlu1 %2477  ;;  %v7371_v20 = vpop.permute.xlu0 %2475  ;;  %v2239_v52 = vpack.c.bf16 %v2234_v50, %v2229_v31 }
 0x32a   : > { %v2155_v43 = vpack.c.bf16 %v2150_v36, %v2145_v23  ;;  %v2240_v19 = vpack.c.bf16 %v2235_v17, %v2230_v51  ;;  %v2308_v23 = vsel %vm786_vm4, %v7292_v13, %v7290_v49  ;;  %v2238_v17 = vpack.c.bf16 %v2233_v34, %v2228_v7 }
 0x32b   : > { %2082 = vrot.lane.b32.xlu1 %v2068_v63, %s9145_s26  ;;  %v2317_v40 = vmul.f32 %v2308_v23, %v6978_v56  ;;  %v2315_v13 = vmul.f32 %v7274_v15, %v6959_v16 }
 0x32c   : > { %2080 = vrot.lane.b32.xlu0 %v2067_v24, %s9145_s26  ;;  %v2237_v24 = vmul.f32 %v7276_v53, %v7152_v33  ;;  %v2316_v53 = vmul.f32 %v2307_v0, %v6967_v1  ;;  %v2396_v0 = vsel %vm736_vm5, %v7317_v9, %v7337_v10 }
 0x32d   : > { %v1263_v41 = vpop.permute.xlu1 %1262  ;;  %v7382_v6 = vpop.permute.xlu0 %2479  ;;  %v2405_v34 = vmul.f32 %v2396_v0, %v6996_v37 }
 0x32e   : > { %v2326_v36 = vpack.c.bf16 %v2321_v35, %v2316_v53 }
 0x32f   : > { %2163 = vrot.lane.b32.xlu1 %v2152_v45, %s9135_s18  ;;  %v2231_v45 = vmul.f32 %v2222_v18, %v6996_v37 }
 0x330   : > { %2074 = vrot.lane.b32.xlu0 %v2064_v58, %s9145_s26  ;;  %v2242_v58 = vpack.c.bf16 %v2237_v24, %v2232_v59  ;;  %s9196_s26 = smov 71  }
 0x331   : > { %v1267_v14 = vpop.permute.xlu1 %1266  ;;  %v1265_v8 = vpop.permute.xlu0 %1264 }
 0x332   : > { %v1272_v27 = vsel %vm9149_vm9, %v1263_v41, %v1265_v8  ;;  %v1273_v38 = vsel %vm9149_vm9, %v1265_v8, %v1267_v14 }
 0x333   : > { %2167 = vrot.lane.b32.xlu1 %v2154_v42, %s9135_s18  ;;  %2870 = vmatprep.subr.bf16.mxu0 %v1272_v27  ;;  %v2322_v27 = vmul.f32 %v2308_v23, %v6981_v57  ;;  %v2481_v23 = vsel %vm647_vm6, %v7348_v12, %v7371_v20 }
 0x334   : > { %2165 = vrot.lane.b32.xlu0 %v2153_v11, %s9135_s18  ;;  %v2241_v11 = vpack.c.bf16 %v2236_v26, %v2231_v45 }
 0x335   : > { %v1261_v48 = vpop.permute.xlu1 %1260  ;;  %v1269_v25 = vpop.permute.xlu0 %1268  ;;  %v2327_v50 = vpack.c.bf16 %v2322_v27, %v2317_v40  ;;  %v2402_v27 = vmul.f32 %v7307_v32, %v6959_v16 }
 0x336   : > { %v1271_v46 = vsel %vm9149_vm9, %v1261_v48, %v1263_v41  ;;  %v1274_v63 = vsel %vm9149_vm9, %v1267_v14, %v1269_v25  ;;  %v2309_v14 = vsel %vm786_vm4, %v7290_v49, %v7309_v28  ;;  %v2320_v48 = vmul.f32 %v7274_v15, %v6962_v39 }
 0x337   : > { %2161 = vrot.lane.b32.xlu1 %v2151_v54, %s9135_s18  ;;  %2871 = vmatpush1.bf16.msra.mxu0 %v1271_v46  ;;  %v2318_v61 = vmul.f32 %v2309_v14, %v6996_v37  ;;  %v2323_v62 = vmul.f32 %v2309_v14, %v6999_v30  ;;  %v2319_v25 = vmul.f32 %v7309_v28, %v7149_v60  ;;  %v7494_v14 = vld [vmem:[%s6376_s20 + $0x10] sm:$0xff]  ;;  %vm9150_vm9 = vcmask 392192  }
 0x338   : > { %2169 = vrot.lane.b32.xlu0 %v2155_v43, %s9135_s18  ;;  %2956 = vmatprep.subr.bf16.mxu1 %v1274_v63  ;;  %v2324_v43 = vmul.f32 %v7309_v28, %v7152_v33  ;;  %v2395_v46 = vsel %vm736_vm5, %v7319_v47, %v7317_v9  ;;  %v2394_v63 = vsel %vm736_vm5, %v7307_v32, %v7319_v47  ;;  %s9194_s18 = smov 64  }
 0x339   : > { %2957 = vmatpush1.bf16.msra.mxu1 %v1273_v38  ;;  %v7419_v55 = vpop.permute.xlu1 %2562  ;;  %v7426_v41 = vpop.permute.xlu0 %2560  ;;  %v2328_v31 = vpack.c.bf16 %v2323_v62, %v2318_v61  ;;  %v2404_v28 = vmul.f32 %v2395_v46, %v6978_v56  ;;  %v2325_v24 = vpack.c.bf16 %v2320_v48, %v2315_v13  ;;  %v2408_v47 = vmul.f32 %v2394_v63, %v6970_v22 }
 0x33a   : > { %v2329_v26 = vpack.c.bf16 %v2324_v43, %v2319_v25  ;;  %v2411_v22 = vmul.f32 %v7337_v10, %v7152_v33  ;;  %v2410_v9 = vmul.f32 %v2396_v0, %v6999_v30  ;;  %v2490_v61 = vmul.f32 %v2481_v23, %v7494_v14 }
 0x33b   : > { %2252 = vrot.lane.b32.xlu1 %v2240_v19, %s9137_s28  ;;  %v2409_v19 = vmul.f32 %v2395_v46, %v6981_v57 }
 0x33c   : > { %2250 = vrot.lane.b32.xlu0 %v2239_v52, %s9137_s28  ;;  %v2403_v52 = vmul.f32 %v2394_v63, %v6967_v1  ;;  %v2406_v1 = vmul.f32 %v7337_v10, %v7149_v60  ;;  %v2482_v10 = vsel %vm647_vm6, %v7371_v20, %v7362_v21  ;;  %v2415_v13 = vpack.c.bf16 %v2410_v9, %v2405_v34 }
 0x33d   : > { %v7432_v44 = vpop.permute.xlu1 %2566  ;;  %v7441_v42 = vpop.permute.xlu0 %2564  ;;  %v2414_v35 = vpack.c.bf16 %v2409_v19, %v2404_v28  ;;  %v2491_v20 = vmul.f32 %v2482_v10, %v6978_v56  ;;  %v2496_v48 = vmul.f32 %v2482_v10, %v6981_v57  ;;  %v2489_v56 = vmul.f32 %v7348_v12, %v6959_v16 }
 0x33e   : > { %v2413_v7 = vpack.c.bf16 %v2408_v47, %v2403_v52  ;;  %v2416_v40 = vpack.c.bf16 %v2411_v22, %v2406_v1  ;;  %v2494_v57 = vmul.f32 %v7348_v12, %v6962_v39  ;;  %v2498_v63 = vmul.f32 %v7382_v6, %v7152_v33  ;;  %v2539_v1 = vld [vmem:[%s6376_s20 + $0x50] sm:$0xff] }
 0x33f   : > { %2256 = vrot.lane.b32.xlu1 %v2242_v58, %s9137_s28  ;;  %v2569_v16 = vsel %vm558_vm7, %v7419_v55, %v7441_v42  ;;  %v2568_v12 = vsel %vm558_vm7, %v7426_v41, %v7419_v55  ;;  %v2570_v22 = vsel %vm558_vm7, %v7441_v42, %v7432_v44  ;;  %v2580_v34 = vmul.f32 %v7432_v44, %v7149_v60 }
 0x340   : > { %2254 = vrot.lane.b32.xlu0 %v2241_v11, %s9137_s28  ;;  %v7497_v11 = vld [vmem:[%s6376_s20 + $0x40] sm:$0xff]  ;;  %v2577_v55 = vmul.f32 %v2568_v12, %v7494_v14  ;;  %v2585_v9 = vmul.f32 %v7432_v44, %v7152_v33 }
 0x341   : > { %v1354_v8 = vpop.permute.xlu1 %1353  ;;  %v1352_v51 = vpop.permute.xlu0 %1351  ;;  %v2495_v62 = vmul.f32 %v2481_v23, %v7497_v11  ;;  %v1559_v44 = vpack.c.bf16 %v7497_v11, %v7494_v14 }
 0x342   : > { %v1361_v49 = vsel %vm9151_vm15, %v1352_v51, %v1354_v8 }
 0x343   : > { %2337 = vrot.lane.b32.xlu1 %v2326_v36, %s9139_s27  ;;  %2872 = vmatprep.subr.bf16.mxu0 %v1361_v49 }
 0x344   : > { %2248 = vrot.lane.b32.xlu0 %v2238_v17, %s9137_s28  ;;  %v2483_v17 = vsel %vm647_vm6, %v7362_v21, %v7382_v6  ;;  %s9191_s28 = smov 72  }
 0x345   : > { %v1358_v54 = vpop.permute.xlu1 %1357  ;;  %v1356_v18 = vpop.permute.xlu0 %1355 }
 0x346   : > { %v1363_v15 = vsel %vm9151_vm15, %v1356_v18, %v1358_v54  ;;  %v1362_v38 = vsel %vm9151_vm15, %v1354_v8, %v1356_v18  ;;  %v2500_v54 = vpack.c.bf16 %v2495_v62, %v2490_v61  ;;  %v2493_v18 = vmul.f32 %v7382_v6, %v7149_v60 }
 0x347   : > { %2341 = vrot.lane.b32.xlu1 %v2328_v31, %s9139_s27  ;;  %2958 = vmatprep.subr.bf16.mxu1 %v1363_v15  ;;  %v2492_v31 = vmul.f32 %v2483_v17, %v6996_v37  ;;  %v2501_v37 = vpack.c.bf16 %v2496_v48, %v2491_v20  ;;  %v7538_v15 = vld [vmem:[%s6376_s20 + $0x18] sm:$0xff] }
 0x348   : > { %2339 = vrot.lane.b32.xlu0 %v2327_v50, %s9139_s27  ;;  %2959 = vmatpush1.bf16.msra.mxu1 %v1362_v38  ;;  %v7541_v38 = vld [vmem:[%s6376_s20 + $0x48] sm:$0xff] }
 0x349   : > { %v7475_v59 = vpop.permute.xlu1 %2647  ;;  %v1350_v45 = vpop.permute.xlu0 %1349  ;;  %v2583_v52 = vmul.f32 %v2569_v16, %v7541_v38 }
 0x34a   : > { %v1360_v53 = vsel %vm9151_vm15, %v1350_v45, %v1352_v51  ;;  %v2407_v51 = vmul.f32 %v7307_v32, %v6962_v39  ;;  %v2497_v32 = vmul.f32 %v2483_v17, %v6999_v30  ;;  %v2499_v45 = vpack.c.bf16 %v2494_v57, %v2489_v56  ;;  %v2536_v17 = vld [vmem:[%s6376_s20 + $0x38] sm:$0xff] }
 0x34b   : > { %2335 = vrot.lane.b32.xlu1 %v2325_v24, %s9139_s27  ;;  %2873 = vmatpush1.bf16.msra.mxu0 %v1360_v53  ;;  %v2578_v24 = vmul.f32 %v2569_v16, %v7538_v15  ;;  %v2503_v53 = vpack.c.bf16 %v2498_v63, %v2493_v18 }
 0x34c   : > { %2343 = vrot.lane.b32.xlu0 %v2329_v26, %s9139_s27  ;;  %v2412_v25 = vpack.c.bf16 %v2407_v51, %v2402_v27  ;;  %v2502_v30 = vpack.c.bf16 %v2497_v32, %v2492_v31  ;;  %v2582_v26 = vmul.f32 %v2568_v12, %v7497_v11  ;;  %v2531_v51 = vld [vmem:[%s6376_s20 + $0x8] sm:$0xff]  ;;  %v2590_v32 = vpack.c.bf16 %v2585_v9, %v2580_v34  ;;  %v3032_v34 = vld [vmem:[%s9104_s4] sm:$0xff]  ;;  %s9190_s27 = smov 73  }
 0x34d   : > { %v7489_v58 = vpop.permute.xlu1 %2651  ;;  %v7502_v36 = vpop.permute.xlu0 %2649  ;;  %v2588_v23 = vpack.c.bf16 %v2583_v52, %v2578_v24  ;;  %v2668_v12 = vmul.f32 %v7475_v59, %v2536_v17 }
 0x34e   : > { %v2655_v42 = vsel %vm469_vm8, %v7475_v59, %v7502_v36  ;;  %v2587_v27 = vpack.c.bf16 %v2582_v26, %v2577_v55 }
 0x34f   : > { %2426 = vrot.lane.b32.xlu1 %v2414_v35, %s9141_s23  ;;  %v2534_v35 = vld [vmem:[%s6376_s20 + $0x20] sm:$0xff]  ;;  %v2664_v48 = vmul.f32 %v2655_v42, %v7494_v14  ;;  %v2656_v14 = vsel %vm469_vm8, %v7502_v36, %v7489_v58  ;;  %s9195_s20 = smov 65  }
 0x350   : > { %2424 = vrot.lane.b32.xlu0 %v2413_v7, %s9141_s23  ;;  %v1561_v61 = vpack.c.bf16 %v2539_v1, %v2534_v35  ;;  %v2579_v62 = vmul.f32 %v2570_v22, %v2534_v35  ;;  %v2665_v63 = vmul.f32 %v2656_v14, %v7538_v15  ;;  %v2670_v16 = vmul.f32 %v2656_v14, %v7541_v38 }
 0x351   : > { %v1441_v8 = vpop.permute.xlu1 %1440  ;;  %v7518_v49 = vpop.permute.xlu0 %2653 }
 0x352   : > { %v2657_v56 = vsel %vm469_vm8, %v7489_v58, %v7518_v49  ;;  %v2675_v24 = vpack.c.bf16 %v2670_v16, %v2665_v63 }
 0x353   : > { %2430 = vrot.lane.b32.xlu1 %v2416_v40, %s9141_s23 }
 0x354   : > { %2428 = vrot.lane.b32.xlu0 %v2415_v13, %s9141_s23 }
 0x355   : > { %v1445_v50 = vpop.permute.xlu1 %1444  ;;  %v1443_v21 = vpop.permute.xlu0 %1442 }
 0x356   : > { %v1450_v43 = vsel %vm9152_vm14, %v1441_v8, %v1443_v21  ;;  %v1451_v19 = vsel %vm9152_vm14, %v1443_v21, %v1445_v50  ;;  %v2576_v21 = vmul.f32 %v7426_v41, %v2531_v51 }
 0x357   : > { %2511 = vrot.lane.b32.xlu1 %v2500_v54, %s9143_s30  ;;  %2874 = vmatprep.subr.bf16.mxu0 %v1450_v43  ;;  %v2669_v54 = vmul.f32 %v2655_v42, %v7497_v11  ;;  %v3052_v42 = vld [vmem:[%s9105_s5] sm:$0xff] }
 0x358   : > { %2422 = vrot.lane.b32.xlu0 %v2412_v25, %s9141_s23  ;;  %v2581_v25 = vmul.f32 %v7426_v41, %v2536_v17  ;;  %s9193_s23 = smov 63  }
 0x359   : > { %v1439_v46 = vpop.permute.xlu1 %1438  ;;  %v1447_v28 = vpop.permute.xlu0 %1446  ;;  %v2674_v41 = vpack.c.bf16 %v2669_v54, %v2664_v48 }
 0x35a   : > { %v1449_v39 = vsel %vm9152_vm14, %v1439_v46, %v1441_v8  ;;  %v1452_v6 = vsel %vm9152_vm14, %v1445_v50, %v1447_v28  ;;  %v2584_v8 = vmul.f32 %v2570_v22, %v2539_v1  ;;  %v1560_v50 = vpack.c.bf16 %v7541_v38, %v7538_v15 }
 0x35b   : > { %2515 = vrot.lane.b32.xlu1 %v2502_v30, %s9143_s30  ;;  %2875 = vmatpush1.bf16.msra.mxu0 %v1449_v39  ;;  %v2666_v46 = vmul.f32 %v2657_v56, %v2534_v35  ;;  %v2671_v30 = vmul.f32 %v2657_v56, %v2539_v1  ;;  %v2586_v58 = vpack.c.bf16 %v2581_v25, %v2576_v21  ;;  %v2817_v35 = vld [vmem:[%s9186_s3] sm:$0xff] }
 0x35c   : > { %2513 = vrot.lane.b32.xlu0 %v2501_v37, %s9143_s30  ;;  %2960 = vmatprep.subr.bf16.mxu1 %v1452_v6  ;;  %v2589_v43 = vpack.c.bf16 %v2584_v8, %v2579_v62  ;;  %v1558_v37 = vpack.c.bf16 %v2536_v17, %v2531_v51  ;;  %v2663_v39 = vmul.f32 %v7475_v59, %v2531_v51  ;;  %v6016_v62 = vld [vmem:[%s9183_s2 + $0xc] ss:$16 sps:$4 sm:$0xff]   ;;  %v7654_v56 = vld [vmem:[#allocation7 + $0x1] ss:$8 sm:$0xf] }
 0x35d   : > { %2961 = vmatpush1.bf16.msra.mxu1 %v1451_v19  ;;  %v1532_v47 = vpop.permute.xlu1 %1531  ;;  %v1530_v0 = vpop.permute.xlu0 %1529  ;;  %v2676_v19 = vpack.c.bf16 %v2671_v30, %v2666_v46  ;;  %v2667_v15 = vmul.f32 %v7518_v49, %v7149_v60  ;;  %v2672_v38 = vmul.f32 %v7518_v49, %v7152_v33  ;;  %v2818_v49 = vld [vmem:[%s9186_s3 + $0x8] sm:$0xff]  ;;  %s9206_s3 = smov 56  }
 0x35e   : > { %v1539_v7 = vsel %vm1537_vm13, %v1530_v0, %v1532_v47  ;;  %v2673_v26 = vpack.c.bf16 %v2668_v12, %v2663_v39  ;;  %v3053_v51 = vld [vmem:[%s9105_s5 + $0x8] sm:$0xff] }
 0x35f   : > { %2509 = vrot.lane.b32.xlu1 %v2499_v45, %s9143_s30  ;;  %2876 = vmatprep.subr.bf16.mxu0 %v1539_v7 }
 0x360   : > { %2517 = vrot.lane.b32.xlu0 %v2503_v53, %s9143_s30  ;;  %s9192_s30 = smov 57  }
 0x361   : > { %v1536_v10 = vpop.permute.xlu1 %1535  ;;  %v1534_v40 = vpop.permute.xlu0 %1533 }
 0x362   : > { %v1541_v13 = vsel %vm1537_vm13, %v1534_v40, %v1536_v10  ;;  %v1540_v20 = vsel %vm1537_vm13, %v1532_v47, %v1534_v40  ;;  %v6013_v10 = vld [vmem:[%s9183_s2] ss:$16 sps:$4 sm:$0xff]  }
 0x363   : > { %2600 = vrot.lane.b32.xlu1 %v2588_v23, %s9153_s21  ;;  %2962 = vmatprep.subr.bf16.mxu1 %v1541_v13  ;;  %v3033_v23 = vld [vmem:[%s9104_s4 + $0x8] sm:$0xff] }
 0x364   : > { %2598 = vrot.lane.b32.xlu0 %v2587_v27, %s9153_s21  ;;  %2963 = vmatpush1.bf16.msra.mxu1 %v1540_v20  ;;  %v3087_v40 = vld [vmem:[#allocation7] ss:$8 sm:$0xf] }
 0x365   : > { %v1635_v31 = vpop.permute.xlu1 %1634  ;;  %v1528_v57 = vpop.permute.xlu0 %1527  ;;  %2964 = vmatprep.subr.bf16.mxu1 %v1561_v61  ;;  %v3102_v20 = vrot.slane %v3087_v40, %v6388_v3  ;;  %v3114_v25 = vrot.slane %v3087_v40, %v6390_v4 }
 0x366   : > { %v1538_v11 = vsel %vm1537_vm13, %v1528_v57, %v1530_v0  ;;  %v2677_v0 = vpack.c.bf16 %v2672_v38, %v2667_v15 }
 0x367   : > { %2604 = vrot.lane.b32.xlu1 %v2590_v32, %s9153_s21  ;;  %2877 = vmatpush1.bf16.msra.mxu0 %v1538_v11  ;;  %v3193_v11 = vrot.slane %v7654_v56, %v6388_v3 }
 0x368   : > { %2602 = vrot.lane.b32.xlu0 %v2589_v43, %s9153_s21  ;;  %2878 = vmatprep.subr.bf16.mxu0 %v1559_v44  ;;  %v3106_v44 = vrot.slane %v3087_v40, %v6392_v5 }
 0x369   : > { %v1639_v18 = vpop.permute.xlu1 %1638  ;;  %2965 = vmatpush1.bf16.msra.mxu1 %v1560_v50  ;;  %v1637_v28 = vpop.permute.xlu0 %1636  ;;  %v3110_v50 = vrot.slane %v3087_v40, %v6386_v2 }
 0x36a   : > { %v1644_v36 = vsel %vm1498_vm12, %v1635_v31, %v1637_v28  ;;  %v1645_v59 = vsel %vm1498_vm12, %v1637_v28, %v1639_v18 }
 0x36b   : > { %2685 = vrot.lane.b32.xlu1 %v2674_v41, %s9155_s19  ;;  %2879 = vmatpush1.bf16.msra.mxu0 %v1558_v37 }
 0x36c   : > { %2596 = vrot.lane.b32.xlu0 %v2586_v58, %s9153_s21  ;;  %2880 = vmatprep.subr.bf16.mxu0 %v1644_v36 }
 0x36d   : > { %v1633_v6 = vpop.permute.xlu1 %1632  ;;  %v1641_v52 = vpop.permute.xlu0 %1640 }
 0x36e   : > { %v1643_v47 = vsel %vm1498_vm12, %v1633_v6, %v1635_v31  ;;  %v1646_v45 = vsel %vm1498_vm12, %v1639_v18, %v1641_v52  ;;  %v3201_v18 = vrot.slane %v7654_v56, %v6386_v2 }
 0x36f   : > { %2689 = vrot.lane.b32.xlu1 %v2676_v19, %s9155_s19  ;;  %2881 = vmatpush1.bf16.msra.mxu0 %v1643_v47 }
 0x370   : > { %2687 = vrot.lane.b32.xlu0 %v2675_v24, %s9155_s19  ;;  %2966 = vmatprep.subr.bf16.mxu1 %v1646_v45 }
 0x371   : > { %v1726_v55 = vpop.permute.xlu1 %1725  ;;  %2967 = vmatpush1.bf16.msra.mxu1 %v1645_v59  ;;  %v1724_v60 = vpop.permute.xlu0 %1723 }
 0x372   : > { %v1733_v33 = vsel %vm1409_vm11, %v1724_v60, %v1726_v55 }
 0x373   : > { %2683 = vrot.lane.b32.xlu1 %v2673_v26, %s9155_s19  ;;  %2882 = vmatprep.subr.bf16.mxu0 %v1733_v33 }
 0x374   : > { %2691 = vrot.lane.b32.xlu0 %v2677_v0, %s9155_s19 }
 0x375   : > { %v1730_v53 = vpop.permute.xlu1 %1729  ;;  %v1728_v1 = vpop.permute.xlu0 %1727 }
 0x376   : > { %v1735_v22 = vsel %vm1409_vm11, %v1728_v1, %v1730_v53  ;;  %v1734_v7 = vsel %vm1409_vm11, %v1726_v55, %v1728_v1 }
 0x377   : > { %2826 = vperm.xlu1 %6012, %v2818_v49   ;;  %2968 = vmatprep.subr.bf16.mxu1 %v1735_v22 }
 0x378   : > { %2821 = vperm.xlu0 %6011, %v2817_v35   ;;  %2969 = vmatpush1.bf16.msra.mxu1 %v1734_v7 }
 0x379   : > { %v1813_v9 = vpop.permute.xlu1 %1812  ;;  %v1722_v61 = vpop.permute.xlu0 %1721 }
 0x37a   : > { %v1732_v8 = vsel %vm1409_vm11, %v1722_v61, %v1724_v60 }
 0x37b   : > { %3036 = vperm.xlu1 %6012, %v3032_v34   ;;  %2883 = vmatpush1.bf16.msra.mxu0 %v1732_v8 }
 0x37c   : > { %3041 = vperm.xlu0 %6011, %v3033_v23   ;;  %2971 = vmatmul.mubr.bf16.vlgmr.msra.gmra.mrb[0].mxu1 %v6013_v10 }
 0x37d   : > { %v1817_v27 = vpop.permute.xlu1 %1816  ;;  %v1815_v17 = vpop.permute.xlu0 %1814  ;;  %5888 = vmatprep.mubr.msk.bf16.mxu1 %vm9150_vm9, %v6016_v62 }
 0x37e   : > { %v1822_v13 = vsel %vm1320_vm10, %v1813_v9, %v1815_v17  ;;  %2885 = vmatmul.mubr.bf16.vlgmr.msra.gmra.mrb[0].mxu0 %v6013_v10  ;;  %v1823_v21 = vsel %vm1320_vm10, %v1815_v17, %v1817_v27 }
 0x37f   : > { %3056 = vperm.xlu1 %6012, %v3052_v42   ;;  %2895 = vmatprep.subr.bf16.mxu0 %v1822_v13 }
 0x380   : > { %3061 = vperm.xlu0 %6011, %v3053_v51   ;;  %5887 = vmatprep.mubr.msk.bf16.mxu0 %vm9150_vm9, %v6016_v62  ;;  %vm9187_vm9 = vcmask 973824  }
 0x381   : > { %v1811_v48 = vpop.permute.xlu1 %1810  ;;  %v1819_v31 = vpop.permute.xlu0 %1818  ;;  %vm9188_vm15 = vmmov %vm9187_vm9 }
 0x382   : > { %v1821_v54 = vsel %vm1320_vm10, %v1811_v48, %v1813_v9  ;;  %v1824_v32 = vsel %vm1320_vm10, %v1817_v27, %v1819_v31  ;;  %vm9189_vm14 = vmmov %vm9187_vm9 }
 0x383   : > { %2896 = vmatpush1.bf16.msra.mxu0 %v1821_v54  ;;  %3115 = vrot.lane.b32.xlu1 %v3102_v20, %s9155_s19 }
 0x384   : > { %2981 = vmatprep.subr.bf16.mxu1 %v1824_v32  ;;  %3117 = vrot.lane.b32.xlu0 %v3106_v44, %s9155_s19 }
 0x385   : > { %2982 = vmatpush1.bf16.msra.mxu1 %v1823_v21  ;;  %v1904_v43 = vpop.permute.xlu1 %1903  ;;  %v1902_v57 = vpop.permute.xlu0 %1901 }
 0x386   : > { %v1911_v14 = vsel %vm9187_vm9, %v1902_v57, %v1904_v43 }
 0x387   : > { %3119 = vrot.lane.b32.xlu1 %v3110_v50, %s9155_s19  ;;  %2897 = vmatprep.subr.bf16.mxu0 %v1911_v14 }
 0x388   : > { %3121 = vrot.lane.b32.xlu0 %v3114_v25, %s9155_s19  ;;  %s9203_s19 = smov 8  }
 0x389   : > { %v1908_v37 = vpop.permute.xlu1 %1907  ;;  %v1906_v41 = vpop.permute.xlu0 %1905 }
 0x38a   : > { %v1913_v46 = vsel %vm9188_vm15, %v1906_v41, %v1908_v37  ;;  %v1912_v30 = vsel %vm9189_vm14, %v1904_v43, %v1906_v41  ;;  %vm9207_vm14 = vmmov %vm9187_vm9 }
 0x38b   : > { %2983 = vmatprep.subr.bf16.mxu1 %v1913_v46  ;;  %vm9208_vm15 = vmmov %vm9187_vm9 }
 0x38c   : > { %3206 = vrot.lane.b32.xlu0 %v3193_v11, %s9153_s21  ;;  %2984 = vmatpush1.bf16.msra.mxu1 %v1912_v30 }
 0x38d   : > { %v1990_v63 = vpop.permute.xlu1 %1989  ;;  %v1900_v16 = vpop.permute.xlu0 %1899 }
 0x38e   : > { %v1910_v28 = vsel %vm9187_vm9, %v1900_v16, %v1902_v57 }
 0x38f   : > { %2898 = vmatpush1.bf16.msra.mxu0 %v1910_v28 }
 0x390   : > { %3210 = vrot.lane.b32.xlu0 %v3201_v18, %s9153_s21 }
 0x391   : > { %v1994_v58 = vpop.permute.xlu1 %1993  ;;  %v1992_v36 = vpop.permute.xlu0 %1991 }
 0x392   : > { %v1998_v39 = vsel %vm469_vm8, %v1990_v63, %v1992_v36  ;;  %v1999_v15 = vsel %vm469_vm8, %v1992_v36, %v1994_v58 }
 0x393   : > { %2899 = vmatprep.subr.bf16.mxu0 %v1998_v39 }
 0x395   : > { %v1988_v12 = vpop.permute.xlu1 %1987  ;;  %v1996_v19 = vpop.permute.xlu0 %1995 }
 0x396   : > { %v1997_v6 = vsel %vm469_vm8, %v1988_v12, %v1990_v63  ;;  %v2000_v24 = vsel %vm469_vm8, %v1994_v58, %v1996_v19 }
 0x397   : > { %2900 = vmatpush1.bf16.msra.mxu0 %v1997_v6  ;;  %2985 = vmatprep.subr.bf16.mxu1 %v2000_v24 }
 0x398   : > { %2986 = vmatpush1.bf16.msra.mxu1 %v1999_v15 }
 0x399   : > { %v2079_v38 = vpop.permute.xlu1 %2078 }
 0x39a   : > { %v2077_v52 = vpop.permute.xlu0 %2076 }
 0x39b   : > { %v2085_v47 = vsel %vm558_vm7, %v2077_v52, %v2079_v38 }
 0x39c   : > { %2901 = vmatprep.subr.bf16.mxu0 %v2085_v47 }
 0x39d   : > { %v2083_v45 = vpop.permute.xlu1 %2082 }
 0x39e   : > { %v2081_v59 = vpop.permute.xlu0 %2080 }
 0x39f   : > { %v2087_v55 = vsel %vm558_vm7, %v2081_v59, %v2083_v45  ;;  %v2086_v26 = vsel %vm558_vm7, %v2079_v38, %v2081_v59 }
 0x3a0   : > { %2987 = vmatprep.subr.bf16.mxu1 %v2087_v55 }
 0x3a1   : > { %2988 = vmatpush1.bf16.msra.mxu1 %v2086_v26  ;;  %v2164_v60 = vpop.permute.xlu1 %2163 }
 0x3a2   : > { %v2075_v0 = vpop.permute.xlu0 %2074 }
 0x3a3   : > { %v2084_v33 = vsel %vm558_vm7, %v2075_v0, %v2077_v52 }
 0x3a4   : > { %2902 = vmatpush1.bf16.msra.mxu0 %v2084_v33 }
 0x3a5   : > { %v2168_v49 = vpop.permute.xlu1 %2167 }
 0x3a6   : > { %v2166_v53 = vpop.permute.xlu0 %2165 }
 0x3a7   : > { %v2172_v35 = vsel %vm647_vm6, %v2164_v60, %v2166_v53  ;;  %v2173_v9 = vsel %vm647_vm6, %v2166_v53, %v2168_v49 }
 0x3a8   : > { %2903 = vmatprep.subr.bf16.mxu0 %v2172_v35  ;;  %v6018_v35 = vld [vmem:[%s9183_s2 + $0x8] ss:$16 sps:$4 sm:$0xff]   ;;  %s9205_s2 = smov 55  }
 0x3a9   : > { %v2162_v1 = vpop.permute.xlu1 %2161 }
 0x3aa   : > { %v2171_v22 = vsel %vm647_vm6, %v2162_v1, %v2164_v60  ;;  %v2170_v7 = vpop.permute.xlu0 %2169 }
 0x3ab   : > { %2904 = vmatpush1.bf16.msra.mxu0 %v2171_v22  ;;  %v2174_v34 = vsel %vm647_vm6, %v2168_v49, %v2170_v7 }
 0x3ac   : > { %2989 = vmatprep.subr.bf16.mxu1 %v2174_v34 }
 0x3ad   : > { %2990 = vmatpush1.bf16.msra.mxu1 %v2173_v9  ;;  %v2253_v23 = vpop.permute.xlu1 %2252 }
 0x3ae   : > { %v2251_v10 = vpop.permute.xlu0 %2250 }
 0x3af   : > { %v2259_v61 = vsel %vm736_vm5, %v2251_v10, %v2253_v23 }
 0x3b0   : > { %2905 = vmatprep.subr.bf16.mxu0 %v2259_v61  ;;  %v7718_v61 = vunpack.c.l.bf16 %v6176_v29 }
 0x3b1   : > { %v2257_v62 = vpop.permute.xlu1 %2256 }
 0x3b2   : > { %v2255_v8 = vpop.permute.xlu0 %2254 }
 0x3b3   : > { %v2261_v42 = vsel %vm736_vm5, %v2255_v8, %v2257_v62  ;;  %v2260_v40 = vsel %vm736_vm5, %v2253_v23, %v2255_v8  ;;  %v7721_v62 = vunpack.c.h.bf16 %v6176_v29  ;;  %v3197_v29 = vrot.slane %v7654_v56, %v6392_v5 }
 0x3b4   : > { %2991 = vmatprep.subr.bf16.mxu1 %v2261_v42 }
 0x3b5   : > { %2992 = vmatpush1.bf16.msra.mxu1 %v2260_v40  ;;  %v2338_v27 = vpop.permute.xlu1 %2337 }
 0x3b6   : > { %v2249_v51 = vpop.permute.xlu0 %2248 }
 0x3b7   : > { %v2258_v17 = vsel %vm736_vm5, %v2249_v51, %v2251_v10 }
 0x3b8   : > { %2906 = vmatpush1.bf16.msra.mxu0 %v2258_v17 }
 0x3b9   : > { %v2342_v13 = vpop.permute.xlu1 %2341 }
 0x3ba   : > { %v2340_v20 = vpop.permute.xlu0 %2339 }
 0x3bb   : > { %v2346_v44 = vsel %vm786_vm4, %v2338_v27, %v2340_v20  ;;  %v2347_v50 = vsel %vm786_vm4, %v2340_v20, %v2342_v13 }
 0x3bc   : > { %2907 = vmatprep.subr.bf16.mxu0 %v2346_v44  ;;  %v3205_v44 = vrot.slane %v7654_v56, %v6390_v4 }
 0x3bd   : > { %v2336_v48 = vpop.permute.xlu1 %2335 }
 0x3be   : > { %v2345_v54 = vsel %vm786_vm4, %v2336_v48, %v2338_v27  ;;  %v2344_v31 = vpop.permute.xlu0 %2343 }
 0x3bf   : > { %2908 = vmatpush1.bf16.msra.mxu0 %v2345_v54  ;;  %v2348_v32 = vsel %vm786_vm4, %v2342_v13, %v2344_v31  ;;  %v3269_v31 = vld [vmem:[#allocation7 + $0x2] ss:$8 sm:$0xf] }
 0x3c0   : > { %2993 = vmatprep.subr.bf16.mxu1 %v2348_v32  ;;  %v3292_v56 = vrot.slane %v3269_v31, %v6386_v2 }
 0x3c1   : > { %2994 = vmatpush1.bf16.msra.mxu1 %v2347_v50  ;;  %v2427_v21 = vpop.permute.xlu1 %2426  ;;  %v3284_v50 = vrot.slane %v3269_v31, %v6388_v3 }
 0x3c2   : > { %v2425_v25 = vpop.permute.xlu0 %2424 }
 0x3c3   : > { %v2433_v43 = vsel %vm697_vm3, %v2425_v25, %v2427_v21 }
 0x3c4   : > { %2909 = vmatprep.subr.bf16.mxu0 %v2433_v43  ;;  %v3360_v43 = vld [vmem:[#allocation7 + $0x3] ss:$8 sm:$0xf] }
 0x3c5   : > { %v2431_v57 = vpop.permute.xlu1 %2430 }
 0x3c6   : > { %v2429_v14 = vpop.permute.xlu0 %2428 }
 0x3c7   : > { %v2435_v11 = vsel %vm697_vm3, %v2429_v14, %v2431_v57  ;;  %v2434_v37 = vsel %vm697_vm3, %v2427_v21, %v2429_v14  ;;  %v3288_v21 = vrot.slane %v3269_v31, %v6392_v5  ;;  %v3375_v57 = vrot.slane %v3360_v43, %v6388_v3 }
 0x3c8   : > { %2995 = vmatprep.subr.bf16.mxu1 %v2435_v11  ;;  %v3379_v14 = vrot.slane %v3360_v43, %v6392_v5  ;;  %v3383_v11 = vrot.slane %v3360_v43, %v6386_v2 }
 0x3c9   : > { %2996 = vmatpush1.bf16.msra.mxu1 %v2434_v37  ;;  %v2512_v41 = vpop.permute.xlu1 %2511  ;;  %v3387_v37 = vrot.slane %v3360_v43, %v6390_v4 }
 0x3ca   : > { %v2423_v46 = vpop.permute.xlu0 %2422 }
 0x3cb   : > { %v2432_v30 = vsel %vm697_vm3, %v2423_v46, %v2425_v25  ;;  %v3296_v25 = vrot.slane %v3269_v31, %v6390_v4 }
 0x3cc   : > { %2910 = vmatpush1.bf16.msra.mxu0 %v2432_v30 }
 0x3cd   : > { %v2516_v18 = vpop.permute.xlu1 %2515 }
 0x3ce   : > { %v2514_v63 = vpop.permute.xlu0 %2513 }
 0x3cf   : > { %v2520_v16 = vsel %vm608_vm2, %v2512_v41, %v2514_v63  ;;  %v2521_v12 = vsel %vm608_vm2, %v2514_v63, %v2516_v18 }
 0x3d0   : > { %2911 = vmatprep.subr.bf16.mxu0 %v2520_v16  ;;  %v3542_v16 = vld [vmem:[#allocation7 + $0x5] ss:$8 sm:$0xf] }
 0x3d1   : > { %v2510_v28 = vpop.permute.xlu1 %2509 }
 0x3d2   : > { %v2519_v58 = vsel %vm608_vm2, %v2510_v28, %v2512_v41  ;;  %v2518_v36 = vpop.permute.xlu0 %2517  ;;  %v3451_v41 = vld [vmem:[#allocation7 + $0x4] ss:$8 sm:$0xf]  ;;  %v3557_v28 = vrot.slane %v3542_v16, %v6388_v3 }
 0x3d3   : > { %2912 = vmatpush1.bf16.msra.mxu0 %v2519_v58  ;;  %v2522_v39 = vsel %vm608_vm2, %v2516_v18, %v2518_v36  ;;  %v3466_v46 = vrot.slane %v3451_v41, %v6388_v3  ;;  %v3470_v30 = vrot.slane %v3451_v41, %v6392_v5  ;;  %v3474_v18 = vrot.slane %v3451_v41, %v6386_v2 }
 0x3d4   : > { %2997 = vmatprep.subr.bf16.mxu1 %v2522_v39  ;;  %v3478_v63 = vrot.slane %v3451_v41, %v6390_v4  ;;  %v3561_v58 = vrot.slane %v3542_v16, %v6392_v5  ;;  %v3565_v36 = vrot.slane %v3542_v16, %v6386_v2  ;;  %v3569_v39 = vrot.slane %v3542_v16, %v6390_v4 }
 0x3d5   : > { %2998 = vmatpush1.bf16.msra.mxu1 %v2521_v12  ;;  %v2601_v6 = vpop.permute.xlu1 %2600  ;;  %v3633_v12 = vld [vmem:[#allocation7 + $0x6] ss:$8 sm:$0xf] }
 0x3d6   : > { %v2599_v19 = vpop.permute.xlu0 %2598 }
 0x3d7   : > { %v2607_v24 = vsel %vm519_vm1, %v2599_v19, %v2601_v6 }
 0x3d8   : > { %2913 = vmatprep.subr.bf16.mxu0 %v2607_v24  ;;  %v3656_v24 = vrot.slane %v3633_v12, %v6386_v2 }
 0x3d9   : > { %v2605_v15 = vpop.permute.xlu1 %2604 }
 0x3da   : > { %v2603_v38 = vpop.permute.xlu0 %2602 }
 0x3db   : > { %v2609_v52 = vsel %vm519_vm1, %v2603_v38, %v2605_v15  ;;  %v2608_v47 = vsel %vm519_vm1, %v2601_v6, %v2603_v38  ;;  %v3648_v6 = vrot.slane %v3633_v12, %v6388_v3  ;;  %v3660_v15 = vrot.slane %v3633_v12, %v6390_v4  ;;  %v3724_v38 = vld [vmem:[#allocation7 + $0x7] ss:$8 sm:$0xf] }
 0x3dc   : > { %2999 = vmatprep.subr.bf16.mxu1 %v2609_v52  ;;  %v3739_v52 = vrot.slane %v3724_v38, %v6388_v3 }
 0x3dd   : > { %3000 = vmatpush1.bf16.msra.mxu1 %v2608_v47  ;;  %v2686_v45 = vpop.permute.xlu1 %2685  ;;  %v3743_v47 = vrot.slane %v3724_v38, %v6392_v5 }
 0x3de   : > { %v2597_v59 = vpop.permute.xlu0 %2596 }
 0x3df   : > { %v2606_v55 = vsel %vm519_vm1, %v2597_v59, %v2599_v19  ;;  %v3652_v19 = vrot.slane %v3633_v12, %v6392_v5  ;;  %v3751_v59 = vrot.slane %v3724_v38, %v6390_v4 }
 0x3e0   : > { %2914 = vmatpush1.bf16.msra.mxu0 %v2606_v55  ;;  %v3815_v55 = vld [vmem:[#allocation7 + $0x20] ss:$8 sm:$0xf] }
 0x3e1   : > { %v2690_v26 = vpop.permute.xlu1 %2689 }
 0x3e2   : > { %v2688_v60 = vpop.permute.xlu0 %2687 }
 0x3e3   : > { %v2694_v0 = vsel %vm430_vm0, %v2686_v45, %v2688_v60  ;;  %v2695_v22 = vsel %vm430_vm0, %v2688_v60, %v2690_v26  ;;  %v3834_v60 = vrot.slane %v3815_v55, %v6392_v5 }
 0x3e4   : > { %2915 = vmatprep.subr.bf16.mxu0 %v2694_v0  ;;  %v3838_v0 = vrot.slane %v3815_v55, %v6386_v2 }
 0x3e5   : > { %v2684_v33 = vpop.permute.xlu1 %2683 }
 0x3e6   : > { %v2693_v49 = vsel %vm430_vm0, %v2684_v33, %v2686_v45  ;;  %v2692_v53 = vpop.permute.xlu0 %2691  ;;  %v3747_v45 = vrot.slane %v3724_v38, %v6386_v2  ;;  %v3842_v33 = vrot.slane %v3815_v55, %v6390_v4 }
 0x3e7   : > { %2916 = vmatpush1.bf16.msra.mxu0 %v2693_v49  ;;  %v2696_v1 = vsel %vm430_vm0, %v2690_v26, %v2692_v53  ;;  %v3830_v26 = vrot.slane %v3815_v55, %v6388_v3  ;;  %v3906_v49 = vld [vmem:[#allocation7 + $0x21] ss:$8 sm:$0xf] }
 0x3e8   : > { %3001 = vmatprep.subr.bf16.mxu1 %v2696_v1  ;;  %v3921_v53 = vrot.slane %v3906_v49, %v6388_v3  ;;  %v3929_v1 = vrot.slane %v3906_v49, %v6386_v2 }
 0x3e9   : > { %3002 = vmatpush1.bf16.msra.mxu1 %v2695_v22  ;;  %v3933_v22 = vrot.slane %v3906_v49, %v6390_v4 }
 0x3ea   : > { %2928 = vmatmul.mubr.bf16.vlgmr.msra.gmra.mrb[0].mxu0 %v6018_v35 }
 0x3ec   : > { %3014 = vmatmul.mubr.bf16.vlgmr.msra.gmra.mrb[0].mxu1 %v6018_v35  ;;  %v3925_v35 = vrot.slane %v3906_v49, %v6392_v5 }
 0x3f6   : > { %v7707_v7 = vpop.permute.xlu1 %2826 }
 0x3f7   : > { %v7709_v34 = vpop.permute.xlu0 %2821 }
 0x3fa   : > { %v7711_v9 = vpop.permute.xlu1 %3036 }
 0x3fb   : > { %v7713_v23 = vpop.permute.xlu0 %3041 }
 0x3fe   : > { %v7715_v10 = vpop.permute.xlu1 %3056 }
 0x3ff   : > { %v7723_v8 = vpop.permute.xlu0 %3061 }
 0x402   : > { %v7725_v42 = vpop.permute.xlu1 %3115 }
 0x403   : > { %v3131_v40 = vmul.f32 %v7725_v42, %v7718_v61  ;;  %v3136_v27 = vmul.f32 %v7725_v42, %v7721_v62  ;;  %v7731_v51 = vpop.permute.xlu0 %3117 }
 0x405   : > { %v3141_v17 = vpack.c.bf16 %v3136_v27, %v3131_v40  ;;  %v7811_v40 = vld [vmem:[#allocation7 + $0x22] ss:$8 sm:$0xf] }
 0x406   : > { %v4012_v27 = vrot.slane %v7811_v40, %v6388_v3 }
 0x407   : > { %3151 = vrot.lane.b32.xlu1 %v3141_v17, %s9190_s27  ;;  %v7734_v13 = vpop.permute.xlu0 %3121  ;;  %v4016_v17 = vrot.slane %v7811_v40, %v6392_v5 }
 0x40b   : > { %3208 = vrot.lane.b32.xlu1 %v3197_v29, %s9153_s21  ;;  %v7739_v20 = vpop.permute.xlu0 %3206  ;;  %v4020_v29 = vrot.slane %v7811_v40, %v6386_v2 }
 0x40c   : > { %v3222_v48 = vmul.f32 %v7739_v20, %v7718_v61  ;;  %v3227_v54 = vmul.f32 %v7739_v20, %v7721_v62 }
 0x40e   : > { %v3232_v32 = vpack.c.bf16 %v3227_v54, %v3222_v48 }
 0x40f   : > { %3212 = vrot.lane.b32.xlu1 %v3205_v44, %s9153_s21  ;;  %v7824_v44 = vpop.permute.xlu1 %3119  ;;  %s9202_s21 = smov 7  }
 0x410   : > { %3242 = vrot.lane.b32.xlu0 %v3232_v32, %s9191_s28 }
 0x413   : > { %3297 = vrot.lane.b32.xlu1 %v3284_v50, %s9192_s30 }
 0x414   : > { %3299 = vrot.lane.b32.xlu0 %v3288_v21, %s9192_s30 }
 0x417   : > { %3301 = vrot.lane.b32.xlu1 %v3292_v56, %s9192_s30 }
 0x418   : > { %3303 = vrot.lane.b32.xlu0 %v3296_v25, %s9192_s30 }
 0x41b   : > { %3388 = vrot.lane.b32.xlu1 %v3375_v57, %s9193_s23 }
 0x41c   : > { %3390 = vrot.lane.b32.xlu0 %v3379_v14, %s9193_s23 }
 0x41f   : > { %3392 = vrot.lane.b32.xlu1 %v3383_v11, %s9193_s23 }
 0x420   : > { %3394 = vrot.lane.b32.xlu0 %v3387_v37, %s9193_s23 }
 0x423   : > { %3479 = vrot.lane.b32.xlu1 %v3466_v46, %s9194_s18 }
 0x424   : > { %3481 = vrot.lane.b32.xlu0 %v3470_v30, %s9194_s18 }
 0x427   : > { %3483 = vrot.lane.b32.xlu1 %v3474_v18, %s9194_s18 }
 0x428   : > { %3485 = vrot.lane.b32.xlu0 %v3478_v63, %s9194_s18 }
 0x42b   : > { %3570 = vrot.lane.b32.xlu1 %v3557_v28, %s9195_s20 }
 0x42c   : > { %3572 = vrot.lane.b32.xlu0 %v3561_v58, %s9195_s20 }
 0x42f   : > { %3574 = vrot.lane.b32.xlu1 %v3565_v36, %s9195_s20 }
 0x430   : > { %3576 = vrot.lane.b32.xlu0 %v3569_v39, %s9195_s20 }
 0x433   : > { %3661 = vrot.lane.b32.xlu1 %v3648_v6, %s9196_s26 }
 0x434   : > { %3663 = vrot.lane.b32.xlu0 %v3652_v19, %s9196_s26 }
 0x437   : > { %3665 = vrot.lane.b32.xlu1 %v3656_v24, %s9196_s26 }
 0x438   : > { %3667 = vrot.lane.b32.xlu0 %v3660_v15, %s9196_s26 }
 0x43b   : > { %3752 = vrot.lane.b32.xlu1 %v3739_v52, %s9191_s28 }
 0x43c   : > { %3754 = vrot.lane.b32.xlu0 %v3743_v47, %s9191_s28 }
 0x43f   : > { %3756 = vrot.lane.b32.xlu1 %v3747_v45, %s9191_s28 }
 0x440   : > { %3758 = vrot.lane.b32.xlu0 %v3751_v59, %s9191_s28 }
 0x443   : > { %3843 = vrot.lane.b32.xlu1 %v3830_v26, %s9190_s27 }
 0x444   : > { %3845 = vrot.lane.b32.xlu0 %v3834_v60, %s9190_s27 }
 0x447   : > { %3847 = vrot.lane.b32.xlu1 %v3838_v0, %s9190_s27 }
 0x448   : > { %3849 = vrot.lane.b32.xlu0 %v3842_v33, %s9190_s27 }
 0x44b   : > { %3934 = vrot.lane.b32.xlu1 %v3921_v53, %s9185_s13 }
 0x44c   : > { %3936 = vrot.lane.b32.xlu0 %v3925_v35, %s9185_s13 }
 0x44f   : > { %3938 = vrot.lane.b32.xlu1 %v3929_v1, %s9185_s13 }
 0x450   : > { %3940 = vrot.lane.b32.xlu0 %v3933_v22, %s9185_s13 }
 0x453   : > { %4025 = vrot.lane.b32.xlu1 %v4012_v27, %s9184_s29 }
 0x454   : > { %4027 = vrot.lane.b32.xlu0 %v4016_v17, %s9184_s29 }
 0x457   : > { %4029 = vrot.lane.b32.xlu1 %v4020_v29, %s9184_s29 }
 0x479   : > { %v7834_v58 = vpop.permute.xlu1 %3151 }
 0x47d   : > { %v3209_v33 = vpop.permute.xlu1 %3208 }
 0x4bd   : > { %v2929_v48 = vpop.f32.mrb[0].mxu0 }
 0x4be   : > { %v5901_v54 = vadd.f32 %v2929_v48, %v7709_v34  ;;  %v2931_v31 = vpop.f32.mrb[1].mxu0  ;;  %v3213_v48 = vpop.permute.xlu1 %3212 }
 0x4bf   : > { %v5902_v32 = vadd.f32 %v2931_v31, %v7709_v34  ;;  %v3015_v50 = vpop.f32.mrb[0].mxu1  ;;  %v2933_v21 = vpop.f32.mrb[2].mxu0 }
 0x4c0   : > { %v3024_v56 = vmax.f32 %v5901_v54, 0.0  ;;  %v5905_v25 = vadd.f32 %v3015_v50, %v7709_v34  ;;  %v5903_v43 = vadd.f32 %v2933_v21, %v7707_v7  ;;  %v3017_v57 = vpop.f32.mrb[1].mxu1  ;;  %v2935_v14 = vpop.f32.mrb[3].mxu0  ;;  %v3214_v54 = vsel %vm519_vm1, %v7739_v20, %v3209_v33 }
 0x4c1   : > { %v3025_v11 = vmax.f32 %v5902_v32, 0.0  ;;  %v5906_v37 = vadd.f32 %v3017_v57, %v7709_v34  ;;  %v5904_v41 = vadd.f32 %v2935_v14, %v7707_v7  ;;  %v3019_v46 = vpop.f32.mrb[2].mxu1  ;;  %v3125_v21 = vsel %vm430_vm0, %v7824_v44, %v7734_v13 }
 0x4c2   : > { %v3044_v30 = vmul.f32 %v7711_v9, %v3024_v56  ;;  %v3026_v18 = vmax.f32 %v5905_v25, 0.0  ;;  %v3028_v63 = vmax.f32 %v5903_v43, 0.0  ;;  %v5907_v16 = vadd.f32 %v3019_v46, %v7707_v7  ;;  %v3021_v28 = vpop.f32.mrb[3].mxu1 }
 0x4c3   : > { %v3045_v36 = vmul.f32 %v7711_v9, %v3025_v11  ;;  %v3027_v39 = vmax.f32 %v5906_v37, 0.0  ;;  %v3029_v12 = vmax.f32 %v5904_v41, 0.0  ;;  %v5908_v6 = vadd.f32 %v3021_v28, %v7707_v7 }
 0x4c4   : > { %v3046_v34 = vmul.f32 %v7711_v9, %v3026_v18  ;;  %v3048_v19 = vmul.f32 %v7713_v23, %v3028_v63  ;;  %v3030_v24 = vmax.f32 %v5907_v16, 0.0  ;;  %v3064_v47 = vadd.f32 %v7715_v10, %v3044_v30 }
 0x4c5   : > { %v3047_v15 = vmul.f32 %v7711_v9, %v3027_v39  ;;  %v3049_v38 = vmul.f32 %v7713_v23, %v3029_v12  ;;  %v3031_v52 = vmax.f32 %v5908_v6, 0.0  ;;  %v3065_v55 = vadd.f32 %v7715_v10, %v3045_v36 }
 0x4c6   : > { %v3068_v45 = vadd.f32 %v7723_v8, %v3048_v19  ;;  %v3050_v59 = vmul.f32 %v7713_v23, %v3030_v24  ;;  %v3066_v60 = vadd.f32 %v7715_v10, %v3046_v34  ;;  %v3124_v30 = vsel %vm430_vm0, %v7731_v51, %v7824_v44 }
 0x4c7   : > { %v3069_v7 = vadd.f32 %v7723_v8, %v3049_v38  ;;  %v3051_v26 = vmul.f32 %v7713_v23, %v3031_v52  ;;  %v3067_v49 = vadd.f32 %v7715_v10, %v3047_v15  ;;  %v3123_v10 = vsel %vm430_vm0, %v7725_v42, %v7731_v51  ;;  %v7922_v52 = vpop.permute.xlu1 %3297 }
 0x4c8   : > { %v7849_v0 = vpack.c.bf16 %v3068_v45, %v3064_v47  ;;  %v3070_v9 = vadd.f32 %v7723_v8, %v3050_v59  ;;  %v4088_v45 = vld [vmem:[#allocation7 + $0x23] ss:$8 sm:$0xf] }
 0x4c9   : > { %v7853_v53 = vpack.c.bf16 %v3069_v7, %v3065_v55  ;;  %v3071_v35 = vadd.f32 %v7723_v8, %v3051_v26  ;;  %v3211_v8 = vpop.permute.xlu0 %3210  ;;  %v4024_v55 = vrot.slane %v7811_v40, %v6390_v4  ;;  %v4115_v40 = vrot.slane %v4088_v45, %v6390_v4 }
 0x4ca   : > { %9197 = vst [vmem:[#allocation16_spill] sm:$0xff] %v7849_v0  ;;  %v7856_v1 = vpack.c.bf16 %v3070_v9, %v3066_v60  ;;  %v7861_v27 = vunpack.c.l.bf16 %v7849_v0  ;;  %v7864_v23 = vunpack.c.h.bf16 %v7849_v0  ;;  %v3216_v31 = vsel %vm519_vm1, %v3211_v8, %v3213_v48 }
 0x4cb   : > { %9198 = vst [vmem:[#allocation17_spill] sm:$0xff] %v7853_v53  ;;  %v7858_v22 = vpack.c.bf16 %v3071_v35, %v3067_v49  ;;  %v7884_v56 = vunpack.c.l.bf16 %v7853_v53  ;;  %v7889_v43 = vunpack.c.h.bf16 %v7853_v53  ;;  %v3215_v11 = vsel %vm519_vm1, %v3209_v33, %v3211_v8  ;;  %v7932_v26 = vpop.permute.xlu1 %3301  ;;  %v4179_v33 = vld [vmem:[#allocation7 + $0x24] ss:$8 sm:$0xf] }
 0x4cc   : > { %9199 = vst [vmem:[#allocation18_spill] sm:$0xff] %v7856_v1  ;;  %v7867_v17 = vunpack.c.l.bf16 %v7856_v1  ;;  %v7870_v29 = vunpack.c.h.bf16 %v7856_v1  ;;  %v3132_v32 = vmul.f32 %v3123_v10, %v7861_v27  ;;  %v3137_v50 = vmul.f32 %v3123_v10, %v7864_v23 }
 0x4cd   : > { %9200 = vst [vmem:[#allocation19_spill] sm:$0xff] %v7858_v22  ;;  %v3223_v42 = vmul.f32 %v3214_v54, %v7861_v27  ;;  %v3228_v25 = vmul.f32 %v3214_v54, %v7864_v23  ;;  %v7901_v18 = vunpack.c.l.bf16 %v7858_v22  ;;  %v7905_v63 = vunpack.c.h.bf16 %v7858_v22  ;;  %v7919_v38 = vpop.permute.xlu0 %3242 }
 0x4ce   : > { %v3142_v20 = vpack.c.bf16 %v3137_v50, %v3132_v32  ;;  %v3134_v57 = vmul.f32 %v3125_v21, %v7867_v17  ;;  %v3139_v14 = vmul.f32 %v3125_v21, %v7870_v29  ;;  %v3225_v41 = vmul.f32 %v3216_v31, %v7867_v17 }
 0x4cf   : > { %v3233_v37 = vpack.c.bf16 %v3228_v25, %v3223_v42  ;;  %v3230_v46 = vmul.f32 %v3216_v31, %v7870_v29  ;;  %v3224_v28 = vmul.f32 %v3215_v11, %v7884_v56  ;;  %v3229_v36 = vmul.f32 %v3215_v11, %v7889_v43  ;;  %v7942_v35 = vpop.permute.xlu1 %3388  ;;  %v4278_v31 = vld [vmem:[#allocation7 + $0x26] ss:$8 sm:$0xf] }
 0x4d0   : > { %3153 = vrot.lane.b32.xlu0 %v3142_v20, %s9190_s27  ;;  %v3144_v16 = vpack.c.bf16 %v3139_v14, %v3134_v57  ;;  %v3133_v12 = vmul.f32 %v3124_v30, %v7884_v56  ;;  %v3138_v6 = vmul.f32 %v3124_v30, %v7889_v43  ;;  %v3226_v44 = vmul.f32 %v3213_v48, %v7901_v18  ;;  %v4369_v14 = vld [vmem:[#allocation7 + $0x27] ss:$8 sm:$0xf] }
 0x4d1   : > { %3244 = vrot.lane.b32.xlu1 %v3233_v37, %s9191_s28  ;;  %v3235_v39 = vpack.c.bf16 %v3230_v46, %v3225_v41  ;;  %v3234_v51 = vpack.c.bf16 %v3229_v36, %v3224_v28  ;;  %v3231_v34 = vmul.f32 %v3213_v48, %v7905_v63  ;;  %v3135_v24 = vmul.f32 %v7734_v13, %v7901_v18  ;;  %v7930_v7 = vpop.permute.xlu0 %3299  ;;  %v4460_v28 = vld [vmem:[#allocation7 + $0x40] ss:$8 sm:$0xf] }
 0x4d2   : > { %v3143_v19 = vpack.c.bf16 %v3138_v6, %v3133_v12  ;;  %v3140_v15 = vmul.f32 %v7734_v13, %v7905_v63  ;;  %v4103_v13 = vrot.slane %v4088_v45, %v6388_v3  ;;  %v4107_v60 = vrot.slane %v4088_v45, %v6392_v5 }
 0x4d3   : > { %v3236_v47 = vpack.c.bf16 %v3231_v34, %v3226_v44  ;;  %v4111_v9 = vrot.slane %v4088_v45, %v6386_v2  ;;  %v4194_v10 = vrot.slane %v4179_v33, %v6388_v3  ;;  %v4198_v8 = vrot.slane %v4179_v33, %v6392_v5  ;;  %v7952_v32 = vpop.permute.xlu1 %3392 }
 0x4d4   : > { %3157 = vrot.lane.b32.xlu0 %v3144_v16, %s9190_s27  ;;  %v3145_v59 = vpack.c.bf16 %v3140_v15, %v3135_v24  ;;  %v4202_v48 = vrot.slane %v4179_v33, %v6386_v2  ;;  %v4206_v50 = vrot.slane %v4179_v33, %v6390_v4  ;;  %v4293_v21 = vrot.slane %v4278_v31, %v6388_v3 }
 0x4d5   : > { %3248 = vrot.lane.b32.xlu1 %v3235_v39, %s9191_s28  ;;  %v7938_v49 = vpop.permute.xlu0 %3303  ;;  %v4297_v25 = vrot.slane %v4278_v31, %v6392_v5  ;;  %v4301_v57 = vrot.slane %v4278_v31, %v6386_v2  ;;  %v4305_v11 = vrot.slane %v4278_v31, %v6390_v4  ;;  %v4384_v37 = vrot.slane %v4369_v14, %v6388_v3 }
 0x4d6   : > { %v4388_v30 = vrot.slane %v4369_v14, %v6392_v5  ;;  %v4392_v16 = vrot.slane %v4369_v14, %v6386_v2  ;;  %v4396_v39 = vrot.slane %v4369_v14, %v6390_v4  ;;  %v4475_v6 = vrot.slane %v4460_v28, %v6388_v3 }
 0x4d7   : > { %v7962_v20 = vpop.permute.xlu1 %3479  ;;  %v4483_v44 = vrot.slane %v4460_v28, %v6386_v2  ;;  %v4487_v15 = vrot.slane %v4460_v28, %v6390_v4  ;;  %v3305_v45 = vsel %vm608_vm2, %v7922_v52, %v7930_v7  ;;  %v3317_v14 = vmul.f32 %v7938_v49, %v7901_v18 }
 0x4d8   : > { %3246 = vrot.lane.b32.xlu0 %v3234_v51, %s9191_s28  ;;  %v4479_v51 = vrot.slane %v4460_v28, %v6392_v5  ;;  %v3314_v33 = vmul.f32 %v3305_v45, %v7861_v27 }
 0x4d9   : > { %3155 = vrot.lane.b32.xlu1 %v3143_v19, %s9190_s27  ;;  %v7950_v54 = vpop.permute.xlu0 %3390  ;;  %v4551_v19 = vld [vmem:[#allocation7 + $0x41] ss:$8 sm:$0xf] }
 0x4db   : > { %v7972_v46 = vpop.permute.xlu1 %3483 }
 0x4dc   : > { %3250 = vrot.lane.b32.xlu0 %v3236_v47, %s9191_s28  ;;  %v4566_v47 = vrot.slane %v4551_v19, %v6388_v3 }
 0x4dd   : > { %3159 = vrot.lane.b32.xlu1 %v3145_v59, %s9190_s27  ;;  %v7958_v42 = vpop.permute.xlu0 %3394 }
 0x4df   : > { %v7982_v12 = vpop.permute.xlu1 %3570 }
 0x4e0   : > { %4031 = vrot.lane.b32.xlu0 %v4024_v55, %s9184_s29  ;;  %v4570_v55 = vrot.slane %v4551_v19, %v6392_v5 }
 0x4e1   : > { %4116 = vrot.lane.b32.xlu1 %v4103_v13, %s9182_s22  ;;  %v7970_v41 = vpop.permute.xlu0 %3481 }
 0x4e3   : > { %v7992_v24 = vpop.permute.xlu1 %3574 }
 0x4e4   : > { %4118 = vrot.lane.b32.xlu0 %v4107_v60, %s9182_s22  ;;  %v4574_v60 = vrot.slane %v4551_v19, %v6386_v2 }
 0x4e5   : > { %4120 = vrot.lane.b32.xlu1 %v4111_v9, %s9182_s22  ;;  %v7978_v36 = vpop.permute.xlu0 %3485  ;;  %v3306_v9 = vsel %vm608_vm2, %v7930_v7, %v7932_v26 }
 0x4e6   : > { %v3315_v31 = vmul.f32 %v3306_v9, %v7884_v56  ;;  %v3320_v7 = vmul.f32 %v3306_v9, %v7889_v43 }
 0x4e7   : > { %v8005_v13 = vpop.permute.xlu1 %3661 }
 0x4e8   : > { %4122 = vrot.lane.b32.xlu0 %v4115_v40, %s9182_s22  ;;  %v3319_v40 = vmul.f32 %v3305_v45, %v7864_v23  ;;  %v3397_v45 = vsel %vm697_vm3, %v7950_v54, %v7952_v32 }
 0x4e9   : > { %4207 = vrot.lane.b32.xlu1 %v4194_v10, %s9181_s24  ;;  %v7990_v34 = vpop.permute.xlu0 %3572  ;;  %v3307_v10 = vsel %vm608_vm2, %v7932_v26, %v7938_v49  ;;  %v3325_v26 = vpack.c.bf16 %v3320_v7, %v3315_v31 }
 0x4ec   : > { %4209 = vrot.lane.b32.xlu0 %v4198_v8, %s9181_s24  ;;  %v4578_v8 = vrot.slane %v4551_v19, %v6390_v4 }
 0x4ed   : > { %4211 = vrot.lane.b32.xlu1 %v4202_v48, %s9181_s24  ;;  %v8001_v59 = vpop.permute.xlu0 %3576 }
 0x4f0   : > { %4213 = vrot.lane.b32.xlu0 %v4206_v50, %s9181_s24  ;;  %v8024_v50 = vpop.permute.xlu1 %3665 }
 0x4f1   : > { %4306 = vrot.lane.b32.xlu1 %v4293_v21, %s9201_s1  ;;  %v8020_v48 = vpop.permute.xlu0 %3663  ;;  %v3324_v21 = vpack.c.bf16 %v3319_v40, %v3314_v33  ;;  %v3398_v40 = vsel %vm697_vm3, %v7952_v32, %v7958_v42  ;;  %v3408_v32 = vmul.f32 %v7958_v42, %v7901_v18 }
 0x4f4   : > { %4308 = vrot.lane.b32.xlu0 %v4297_v25, %s9201_s1  ;;  %v3316_v25 = vmul.f32 %v3307_v10, %v7867_v17 }
 0x4f5   : > { %4310 = vrot.lane.b32.xlu1 %v4301_v57, %s9201_s1  ;;  %v3321_v57 = vmul.f32 %v3307_v10, %v7870_v29  ;;  %v8038_v28 = vpop.permute.xlu0 %3667  ;;  %v3406_v10 = vmul.f32 %v3397_v45, %v7884_v56 }
 0x4f8   : > { %4312 = vrot.lane.b32.xlu0 %v4305_v11, %s9201_s1  ;;  %v3322_v11 = vmul.f32 %v7938_v49, %v7905_v63 }
 0x4f9   : > { %4397 = vrot.lane.b32.xlu1 %v4384_v37, %s9202_s21  ;;  %v3313_v37 = vmul.f32 %v7922_v52, %v7718_v61  ;;  %v8048_v19 = vpop.permute.xlu0 %3754 }
 0x4fc   : > { %4399 = vrot.lane.b32.xlu0 %v4388_v30, %s9202_s21  ;;  %v3318_v30 = vmul.f32 %v7922_v52, %v7721_v62 }
 0x4fd   : > { %4401 = vrot.lane.b32.xlu1 %v4392_v16, %s9202_s21  ;;  %v3326_v16 = vpack.c.bf16 %v3321_v57, %v3316_v25  ;;  %v3412_v25 = vmul.f32 %v3398_v40, %v7870_v29 }
 0x500   : > { %4403 = vrot.lane.b32.xlu0 %v4396_v39, %s9202_s21  ;;  %v8041_v39 = vpop.permute.xlu1 %3752 }
 0x501   : > { %4488 = vrot.lane.b32.xlu1 %v4475_v6, %s9203_s19  ;;  %v4642_v6 = vld [vmem:[#allocation7 + $0x42] ss:$8 sm:$0xf] }
 0x502   : > { %v4657_v49 = vrot.slane %v4642_v6, %v6388_v3  ;;  %v4661_v52 = vrot.slane %v4642_v6, %v6392_v5 }
 0x504   : > { %4490 = vrot.lane.b32.xlu0 %v4479_v51, %s9203_s19  ;;  %v3327_v51 = vpack.c.bf16 %v3322_v11, %v3317_v14  ;;  %v3404_v14 = vmul.f32 %v7942_v35, %v7718_v61  ;;  %v3409_v11 = vmul.f32 %v7942_v35, %v7721_v62 }
 0x505   : > { %4492 = vrot.lane.b32.xlu1 %v4483_v44, %s9203_s19  ;;  %v3323_v44 = vpack.c.bf16 %v3318_v30, %v3313_v37 }
 0x508   : > { %4494 = vrot.lane.b32.xlu0 %v4487_v15, %s9203_s19  ;;  %v3396_v15 = vsel %vm697_vm3, %v7942_v35, %v7950_v54  ;;  %v3411_v54 = vmul.f32 %v3397_v45, %v7889_v43 }
 0x509   : > { %4579 = vrot.lane.b32.xlu1 %v4566_v47, %s9204_s0  ;;  %v8053_v47 = vpop.permute.xlu1 %3756  ;;  %v3405_v9 = vmul.f32 %v3396_v15, %v7861_v27  ;;  %v3410_v33 = vmul.f32 %v3396_v15, %v7864_v23 }
 0x50a   : > { %v3416_v57 = vpack.c.bf16 %v3411_v54, %v3406_v10 }
 0x50b   : > { %v3415_v7 = vpack.c.bf16 %v3410_v33, %v3405_v9  ;;  %v3489_v33 = vsel %vm786_vm4, %v7972_v46, %v7978_v36 }
 0x50c   : > { %4581 = vrot.lane.b32.xlu0 %v4570_v55, %s9204_s0  ;;  %v4665_v55 = vrot.slane %v4642_v6, %v6386_v2 }
 0x50d   : > { %4583 = vrot.lane.b32.xlu1 %v4574_v60, %s9204_s0  ;;  %v4669_v60 = vrot.slane %v4642_v6, %v6390_v4  ;;  %v8072_v31 = vpop.permute.xlu1 %3843 }
 0x510   : > { %4585 = vrot.lane.b32.xlu0 %v4578_v8, %s9204_s0  ;;  %v8069_v8 = vpop.permute.xlu0 %3758 }
 0x511   : > { %3335 = vrot.lane.b32.xlu1 %v3324_v21, %s9196_s26  ;;  %v3407_v21 = vmul.f32 %v3398_v40, %v7867_v17  ;;  %v8089_v6 = vpop.permute.xlu1 %3847 }
 0x513   : > { %v3417_v30 = vpack.c.bf16 %v3412_v25, %v3407_v21  ;;  %v3498_v25 = vmul.f32 %v3489_v33, %v7867_v17 }
 0x514   : > { %3337 = vrot.lane.b32.xlu0 %v3325_v26, %s9196_s26  ;;  %v3413_v26 = vmul.f32 %v7958_v42, %v7905_v63  ;;  %v8087_v37 = vpop.permute.xlu0 %3845 }
 0x515   : > { %3339 = vrot.lane.b32.xlu1 %v3326_v16, %s9196_s26  ;;  %v4733_v16 = vld [vmem:[#allocation7 + $0x43] ss:$8 sm:$0xf]  ;;  %v8101_v15 = vpop.permute.xlu1 %3934 }
 0x516   : > { %v4748_v42 = vrot.slane %v4733_v16, %v6388_v3  ;;  %v4752_v35 = vrot.slane %v4733_v16, %v6392_v5  ;;  %v4756_v45 = vrot.slane %v4733_v16, %v6386_v2  ;;  %v4760_v40 = vrot.slane %v4733_v16, %v6390_v4 }
 0x518   : > { %3341 = vrot.lane.b32.xlu0 %v3327_v51, %s9196_s26  ;;  %v3418_v51 = vpack.c.bf16 %v3413_v26, %v3408_v32  ;;  %v3499_v32 = vmul.f32 %v7978_v36, %v7901_v18  ;;  %v3504_v26 = vmul.f32 %v7978_v36, %v7905_v63 }
 0x519   : > { %3333 = vrot.lane.b32.xlu1 %v3323_v44, %s9196_s26  ;;  %v3414_v44 = vpack.c.bf16 %v3409_v11, %v3404_v14  ;;  %v3495_v14 = vmul.f32 %v7962_v20, %v7718_v61  ;;  %v3500_v11 = vmul.f32 %v7962_v20, %v7721_v62 }
 0x51c   : > { %4670 = vrot.lane.b32.xlu0 %v4657_v49, %s9205_s2  ;;  %v3487_v49 = vsel %vm786_vm4, %v7962_v20, %v7970_v41 }
 0x51d   : > { %4672 = vrot.lane.b32.xlu1 %v4661_v52, %s9205_s2  ;;  %v8097_v52 = vpop.permute.xlu0 %3849  ;;  %v3501_v9 = vmul.f32 %v3487_v49, %v7864_v23 }
 0x520   : > { %4674 = vrot.lane.b32.xlu0 %v4665_v55, %s9205_s2  ;;  %v3488_v55 = vsel %vm786_vm4, %v7970_v41, %v7972_v46 }
 0x521   : > { %4676 = vrot.lane.b32.xlu1 %v4669_v60, %s9205_s2  ;;  %v3496_v60 = vmul.f32 %v3487_v49, %v7861_v27  ;;  %v8116_v10 = vpop.permute.xlu0 %3936  ;;  %v3497_v54 = vmul.f32 %v3488_v55, %v7884_v56  ;;  %v3502_v41 = vmul.f32 %v3488_v55, %v7889_v43  ;;  %v3505_v49 = vpack.c.bf16 %v3500_v11, %v3495_v14 }
 0x523   : > { %v3506_v21 = vpack.c.bf16 %v3501_v9, %v3496_v60  ;;  %v3507_v46 = vpack.c.bf16 %v3502_v41, %v3497_v54  ;;  %v3579_v60 = vsel %vm736_vm5, %v7990_v34, %v7992_v24 }
 0x524   : > { %3426 = vrot.lane.b32.xlu0 %v3415_v7, %s9195_s20  ;;  %v8120_v7 = vpop.permute.xlu1 %3938 }
 0x525   : > { %3428 = vrot.lane.b32.xlu1 %v3416_v57, %s9195_s20  ;;  %v3503_v57 = vmul.f32 %v3489_v33, %v7870_v29  ;;  %v8134_v16 = vpop.permute.xlu0 %3940 }
 0x528   : > { %3430 = vrot.lane.b32.xlu0 %v3417_v30, %s9195_s20  ;;  %v3508_v30 = vpack.c.bf16 %v3503_v57, %v3498_v25  ;;  %v3593_v57 = vmul.f32 %v3579_v60, %v7889_v43 }
 0x529   : > { %3432 = vrot.lane.b32.xlu1 %v3418_v51, %s9195_s20  ;;  %v8137_v51 = vpop.permute.xlu1 %4025 }
 0x52c   : > { %3424 = vrot.lane.b32.xlu0 %v3414_v44, %s9195_s20  ;;  %v3509_v44 = vpack.c.bf16 %v3504_v26, %v3499_v32 }
 0x52d   : > { %4761 = vrot.lane.b32.xlu1 %v4748_v42, %s9206_s3  ;;  %v4824_v42 = vld [vmem:[#allocation7 + $0x44] ss:$8 sm:$0xf]  ;;  %v8149_v55 = vpop.permute.xlu1 %4029 }
 0x52e   : > { %v4839_v36 = vrot.slane %v4824_v42, %v6388_v3  ;;  %v4843_v20 = vrot.slane %v4824_v42, %v6392_v5  ;;  %v4847_v9 = vrot.slane %v4824_v42, %v6386_v2  ;;  %v4851_v33 = vrot.slane %v4824_v42, %v6390_v4 }
 0x52f   : > { %v3595_v42 = vmul.f32 %v8001_v59, %v7905_v63 }
 0x530   : > { %4763 = vrot.lane.b32.xlu0 %v4752_v35, %s9206_s3  ;;  %v8144_v35 = vpop.permute.xlu0 %4027 }
 0x531   : > { %4765 = vrot.lane.b32.xlu1 %v4756_v45, %s9206_s3  ;;  %v3578_v45 = vsel %vm736_vm5, %v7982_v12, %v7990_v34  ;;  %v3588_v34 = vmul.f32 %v3579_v60, %v7884_v56 }
 0x532   : > { %v3587_v54 = vmul.f32 %v3578_v45, %v7861_v27  ;;  %v3592_v41 = vmul.f32 %v3578_v45, %v7864_v23  ;;  %v4915_v45 = vld [vmem:[#allocation7 + $0x45] ss:$8 sm:$0xf] }
 0x534   : > { %4767 = vrot.lane.b32.xlu0 %v4760_v40, %s9206_s3  ;;  %v3597_v32 = vpack.c.bf16 %v3592_v41, %v3587_v54  ;;  %v4930_v54 = vrot.slane %v4915_v45, %v6388_v3 }
 0x535   : > { %3517 = vrot.lane.b32.xlu1 %v3506_v21, %s9194_s18  ;;  %v3580_v21 = vsel %vm736_vm5, %v7992_v24, %v8001_v59  ;;  %v3590_v24 = vmul.f32 %v8001_v59, %v7901_v18 }
 0x536   : > { %v3589_v26 = vmul.f32 %v3580_v21, %v7867_v17  ;;  %v3594_v14 = vmul.f32 %v3580_v21, %v7870_v29 }
 0x538   : > { %3519 = vrot.lane.b32.xlu0 %v3507_v46, %s9194_s18 }
 0x539   : > { %3521 = vrot.lane.b32.xlu1 %v3508_v30, %s9194_s18  ;;  %v3598_v30 = vpack.c.bf16 %v3593_v57, %v3588_v34  ;;  %v3669_v57 = vsel %vm647_vm6, %v8005_v13, %v8020_v48 }
 0x53c   : > { %3523 = vrot.lane.b32.xlu0 %v3509_v44, %s9194_s18  ;;  %v3586_v44 = vmul.f32 %v7982_v12, %v7718_v61 }
 0x53d   : > { %3515 = vrot.lane.b32.xlu1 %v3505_v49, %s9194_s18  ;;  %v3591_v49 = vmul.f32 %v7982_v12, %v7721_v62 }
 0x53f   : > { %v3596_v21 = vpack.c.bf16 %v3591_v49, %v3586_v44  ;;  %v3678_v49 = vmul.f32 %v3669_v57, %v7861_v27 }
 0x540   : > { %4852 = vrot.lane.b32.xlu0 %v4839_v36, %s9192_s30 }
 0x541   : > { %4854 = vrot.lane.b32.xlu1 %v4843_v20, %s9192_s30  ;;  %v3599_v20 = vpack.c.bf16 %v3594_v14, %v3589_v26  ;;  %v4934_v26 = vrot.slane %v4915_v45, %v6392_v5  ;;  %v4938_v14 = vrot.slane %v4915_v45, %v6386_v2 }
 0x542   : > { %v3154_v40 = vpop.permute.xlu0 %3153 }
 0x543   : > { %v3245_v25 = vpop.permute.xlu1 %3244  ;;  %v3161_v59 = vsel %vm469_vm8, %v7834_v58, %v3154_v40 }
 0x544   : > { %4856 = vrot.lane.b32.xlu0 %v4847_v9, %s9192_s30  ;;  %v3600_v9 = vpack.c.bf16 %v3595_v42, %v3590_v24  ;;  %v3252_v58 = vsel %vm558_vm7, %v7919_v38, %v3245_v25  ;;  %v3670_v42 = vsel %vm647_vm6, %v8020_v48, %v8024_v50  ;;  %v3683_v38 = vmul.f32 %v3669_v57, %v7864_v23 }
 0x545   : > { %4858 = vrot.lane.b32.xlu1 %v4851_v33, %s9192_s30 }
 0x546   : > { %v3158_v46 = vpop.permute.xlu0 %3157 }
 0x547   : > { %v3249_v11 = vpop.permute.xlu1 %3248 }
 0x548   : > { %3608 = vrot.lane.b32.xlu0 %v3597_v32, %s9193_s23 }
 0x549   : > { %3610 = vrot.lane.b32.xlu1 %v3598_v30, %s9193_s23 }
 0x54a   : > { %v3247_v36 = vpop.permute.xlu0 %3246 }
 0x54b   : > { %v3156_v60 = vpop.permute.xlu1 %3155  ;;  %v3253_v12 = vsel %vm558_vm7, %v3245_v25, %v3247_v36  ;;  %v3671_v25 = vsel %vm647_vm6, %v8024_v50, %v8038_v28 }
 0x54c   : > { %3612 = vrot.lane.b32.xlu0 %v3599_v20, %s9193_s23  ;;  %v3162_v33 = vsel %vm469_vm8, %v3154_v40, %v3156_v60  ;;  %v3163_v40 = vsel %vm469_vm8, %v3156_v60, %v3158_v46  ;;  %v3254_v20 = vsel %vm558_vm7, %v3247_v36, %v3249_v11  ;;  %v3679_v60 = vmul.f32 %v3670_v42, %v7884_v56 }
 0x54d   : > { %3614 = vrot.lane.b32.xlu1 %v3600_v9, %s9193_s23  ;;  %5588 = vmatprep.subr.bf16.mxu0 %v3162_v33  ;;  %v3684_v9 = vmul.f32 %v3670_v42, %v7889_v43  ;;  %v3680_v50 = vmul.f32 %v3671_v25, %v7867_v17  ;;  %v3681_v36 = vmul.f32 %v8038_v28, %v7901_v18 }
 0x54e   : > { %5589 = vmatpush1.bf16.msra.mxu0 %v3161_v59  ;;  %v3251_v41 = vpop.permute.xlu0 %3250  ;;  %v3688_v59 = vpack.c.bf16 %v3683_v38, %v3678_v49  ;;  %v3760_v42 = vsel %vm558_vm7, %v8041_v39, %v8048_v19  ;;  %v3761_v38 = vsel %vm558_vm7, %v8048_v19, %v8053_v47 }
 0x54f   : > { %v3160_v34 = vpop.permute.xlu1 %3159  ;;  %5590 = vmatprep.subr.bf16.mxu0 %v3253_v12  ;;  %v3255_v30 = vsel %vm558_vm7, %v3249_v11, %v3251_v41  ;;  %v3689_v11 = vpack.c.bf16 %v3684_v9, %v3679_v60  ;;  %v3686_v12 = vmul.f32 %v8038_v28, %v7905_v63  ;;  %v3677_v41 = vmul.f32 %v8005_v13, %v7718_v61 }
 0x550   : > { %3606 = vrot.lane.b32.xlu0 %v3596_v21, %s9193_s23  ;;  %v3164_v32 = vsel %vm469_vm8, %v3158_v46, %v3160_v34  ;;  %v4942_v46 = vrot.slane %v4915_v45, %v6390_v4  ;;  %v3682_v21 = vmul.f32 %v8005_v13, %v7721_v62  ;;  %v3769_v60 = vmul.f32 %v3760_v42, %v7861_v27 }
 0x551   : > { %4943 = vrot.lane.b32.xlu1 %v4930_v54, %s9193_s23  ;;  %5670 = vmatprep.subr.bf16.mxu1 %v3164_v32  ;;  %v3685_v54 = vmul.f32 %v3671_v25, %v7870_v29  ;;  %v5006_v32 = vld [vmem:[#allocation7 + $0x46] ss:$8 sm:$0xf]  ;;  %v3774_v9 = vmul.f32 %v3760_v42, %v7864_v23  ;;  %v3770_v19 = vmul.f32 %v3761_v38, %v7884_v56  ;;  %v5097_v42 = vld [vmem:[#allocation7 + $0x47] ss:$8 sm:$0xf] }
 0x552   : > { %5591 = vmatpush1.bf16.msra.mxu0 %v3252_v58  ;;  %5671 = vmatpush1.bf16.msra.mxu1 %v3163_v40  ;;  %v8198_v24 = vpop.permute.xlu0 %4031  ;;  %v3691_v58 = vpack.c.bf16 %v3686_v12, %v3681_v36  ;;  %v3687_v28 = vpack.c.bf16 %v3682_v21, %v3677_v41  ;;  %v5025_v13 = vrot.slane %v5006_v32, %v6392_v5 }
 0x553   : > { %v8203_v44 = vpop.permute.xlu1 %4116  ;;  %5672 = vmatprep.subr.bf16.mxu1 %v3255_v30  ;;  %v3690_v57 = vpack.c.bf16 %v3685_v54, %v3680_v50  ;;  %v5029_v25 = vrot.slane %v5006_v32, %v6386_v2  ;;  %v3775_v54 = vmul.f32 %v3761_v38, %v7889_v43  ;;  %v3779_v36 = vpack.c.bf16 %v3774_v9, %v3769_v60 }
 0x554   : > { %4945 = vrot.lane.b32.xlu0 %v4934_v26, %s9193_s23 }
 0x555   : > { %4947 = vrot.lane.b32.xlu1 %v4938_v14, %s9193_s23  ;;  %v5021_v14 = vrot.slane %v5006_v32, %v6388_v3 }
 0x556   : > { %5673 = vmatpush1.bf16.msra.mxu1 %v3254_v20  ;;  %v8214_v48 = vpop.permute.xlu0 %4118 }
 0x557   : > { %v8218_v33 = vpop.permute.xlu1 %4120 }
 0x558   : > { %4949 = vrot.lane.b32.xlu0 %v4942_v46, %s9193_s23  ;;  %v5033_v46 = vrot.slane %v5006_v32, %v6390_v4  ;;  %v3777_v32 = vmul.f32 %v8069_v8, %v7905_v63 }
 0x559   : > { %3699 = vrot.lane.b32.xlu1 %v3688_v59, %s9192_s30  ;;  %v3762_v59 = vsel %vm558_vm7, %v8053_v47, %v8069_v8  ;;  %v3780_v47 = vpack.c.bf16 %v3775_v54, %v3770_v19  ;;  %v5120_v19 = vrot.slane %v5097_v42, %v6386_v2 }
 0x55a   : > { %v8224_v45 = vpop.permute.xlu0 %4122  ;;  %v3771_v12 = vmul.f32 %v3762_v59, %v7867_v17  ;;  %v3776_v41 = vmul.f32 %v3762_v59, %v7870_v29  ;;  %v5116_v59 = vrot.slane %v5097_v42, %v6392_v5 }
 0x55b   : > { %v8234_v34 = vpop.permute.xlu1 %4207 }
 0x55c   : > { %3701 = vrot.lane.b32.xlu0 %v3689_v11, %s9192_s30 }
 0x55d   : > { %3703 = vrot.lane.b32.xlu1 %v3690_v57, %s9192_s30  ;;  %v3772_v57 = vmul.f32 %v8069_v8, %v7901_v18  ;;  %v5112_v8 = vrot.slane %v5097_v42, %v6388_v3 }
 0x55e   : > { %v8238_v26 = vpop.permute.xlu0 %4209 }
 0x55f   : > { %v8240_v40 = vpop.permute.xlu1 %4211 }
 0x560   : > { %3705 = vrot.lane.b32.xlu0 %v3691_v58, %s9192_s30  ;;  %v3768_v58 = vmul.f32 %v8041_v39, %v7718_v61 }
 0x561   : > { %3697 = vrot.lane.b32.xlu1 %v3687_v28, %s9192_s30  ;;  %v3773_v28 = vmul.f32 %v8041_v39, %v7721_v62  ;;  %v3851_v39 = vsel %vm469_vm8, %v8072_v31, %v8087_v37 }
 0x562   : > { %v8246_v30 = vpop.permute.xlu0 %4213 }
 0x563   : > { %v8251_v49 = vpop.permute.xlu1 %4306  ;;  %v3778_v60 = vpack.c.bf16 %v3773_v28, %v3768_v58 }
 0x564   : > { %5034 = vrot.lane.b32.xlu0 %v5021_v14, %s9194_s18 }
 0x565   : > { %5036 = vrot.lane.b32.xlu1 %v5025_v13, %s9194_s18  ;;  %v3781_v13 = vpack.c.bf16 %v3776_v41, %v3771_v12  ;;  %v3860_v41 = vmul.f32 %v3851_v39, %v7861_v27 }
 0x566   : > { %v8260_v20 = vpop.permute.xlu0 %4308 }
 0x567   : > { %v8267_v50 = vpop.permute.xlu1 %4310 }
 0x568   : > { %5038 = vrot.lane.b32.xlu0 %v5029_v25, %s9194_s18  ;;  %v3782_v25 = vpack.c.bf16 %v3777_v32, %v3772_v57  ;;  %v3853_v57 = vsel %vm469_vm8, %v8089_v6, %v8097_v52  ;;  %v5124_v32 = vrot.slane %v5097_v42, %v6390_v4 }
 0x569   : > { %5040 = vrot.lane.b32.xlu1 %v5033_v46, %s9194_s18 }
 0x56a   : > { %v8273_v11 = vpop.permute.xlu0 %4312 }
 0x56b   : > { %v8277_v21 = vpop.permute.xlu1 %4397 }
 0x56c   : > { %3790 = vrot.lane.b32.xlu0 %v3779_v36, %s9206_s3  ;;  %v3852_v36 = vsel %vm469_vm8, %v8087_v37, %v8089_v6 }
 0x56d   : > { %3792 = vrot.lane.b32.xlu1 %v3780_v47, %s9206_s3  ;;  %v3865_v47 = vmul.f32 %v3851_v39, %v7864_v23  ;;  %v3861_v37 = vmul.f32 %v3852_v36, %v7884_v56  ;;  %v3866_v28 = vmul.f32 %v3852_v36, %v7889_v43  ;;  %v3863_v39 = vmul.f32 %v8097_v52, %v7901_v18 }
 0x56e   : > { %v8289_v14 = vpop.permute.xlu0 %4399  ;;  %v3864_v36 = vmul.f32 %v8072_v31, %v7721_v62 }
 0x56f   : > { %v8291_v38 = vpop.permute.xlu1 %4401  ;;  %v3871_v42 = vpack.c.bf16 %v3866_v28, %v3861_v37 }
 0x570   : > { %3794 = vrot.lane.b32.xlu0 %v3781_v13, %s9206_s3 }
 0x571   : > { %3796 = vrot.lane.b32.xlu1 %v3782_v25, %s9206_s3  ;;  %v3870_v25 = vpack.c.bf16 %v3865_v47, %v3860_v41 }
 0x572   : > { %v8296_v46 = vpop.permute.xlu0 %4403 }
 0x573   : > { %v8298_v9 = vpop.permute.xlu1 %4488 }
 0x574   : > { %3788 = vrot.lane.b32.xlu0 %v3778_v60, %s9206_s3  ;;  %v3867_v60 = vmul.f32 %v3853_v57, %v7870_v29 }
 0x575   : > { %5125 = vrot.lane.b32.xlu1 %v5112_v8, %s9195_s20  ;;  %v3862_v8 = vmul.f32 %v3853_v57, %v7867_v17  ;;  %v5188_v57 = vld [vmem:[#allocation7 + $0x60] ss:$8 sm:$0xf] }
 0x576   : > { %v8307_v54 = vpop.permute.xlu0 %4490 }
 0x577   : > { %v8312_v12 = vpop.permute.xlu1 %4492  ;;  %v3872_v47 = vpack.c.bf16 %v3867_v60, %v3862_v8  ;;  %v3942_v8 = vsel %vm9207_vm14, %v8101_v15, %v8116_v10  ;;  %vm9209_vm14 = vcmask 56320  }
 0x578   : > { %5127 = vrot.lane.b32.xlu0 %v5116_v59, %s9195_s20  ;;  %v3868_v59 = vmul.f32 %v8097_v52, %v7905_v63  ;;  %v5203_v52 = vrot.slane %v5188_v57, %v6388_v3 }
 0x579   : > { %5129 = vrot.lane.b32.xlu1 %v5120_v19, %s9195_s20  ;;  %v3859_v19 = vmul.f32 %v8072_v31, %v7718_v61  ;;  %v5207_v31 = vrot.slane %v5188_v57, %v6392_v5 }
 0x57a   : > { %v8322_v58 = vpop.permute.xlu0 %4494  ;;  %v3873_v37 = vpack.c.bf16 %v3868_v59, %v3863_v39  ;;  %v3943_v39 = vsel %vm9208_vm15, %v8116_v10, %v8120_v7  ;;  %v5211_v59 = vrot.slane %v5188_v57, %v6386_v2  ;;  %v3944_v10 = vsel %vm9187_vm9, %v8120_v7, %v8134_v16  ;;  %vm9210_vm15 = vmmov %vm9209_vm14 }
 0x57b   : > { %v8326_v13 = vpop.permute.xlu1 %4579  ;;  %v3957_v0 = vmul.f32 %v3943_v39, %v7889_v43  ;;  %v3958_v22 = vmul.f32 %v3944_v10, %v7870_v29  ;;  %vm9211_vm9 = vmmov %vm9209_vm14 }
 0x57c   : > { %5131 = vrot.lane.b32.xlu0 %v5124_v32, %s9195_s20 }
 0x57d   : > { %3881 = vrot.lane.b32.xlu1 %v3870_v25, %s9205_s2  ;;  %v3869_v25 = vpack.c.bf16 %v3864_v36, %v3859_v19  ;;  %v5215_v19 = vrot.slane %v5188_v57, %v6390_v4  ;;  %v3951_v36 = vmul.f32 %v3942_v8, %v7861_v27 }
 0x57e   : > { %v8332_v6 = vpop.permute.xlu0 %4581 }
 0x57f   : > { %v8342_v41 = vpop.permute.xlu1 %4583 }
 0x580   : > { %3883 = vrot.lane.b32.xlu0 %v3871_v42, %s9205_s2 }
 0x581   : > { %3885 = vrot.lane.b32.xlu1 %v3872_v47, %s9205_s2  ;;  %v3956_v47 = vmul.f32 %v3942_v8, %v7864_v23 }
 0x582   : > { %v8346_v32 = vpop.permute.xlu0 %4585 }
 0x583   : > { %v3336_v28 = vpop.permute.xlu1 %3335  ;;  %v3961_v8 = vpack.c.bf16 %v3956_v47, %v3951_v36  ;;  %v5279_v36 = vld [vmem:[#allocation7 + $0x61] ss:$8 sm:$0xf] }
 0x584   : > { %3887 = vrot.lane.b32.xlu0 %v3873_v37, %s9205_s2 }
 0x585   : > { %3879 = vrot.lane.b32.xlu1 %v3869_v25, %s9205_s2  ;;  %v3952_v25 = vmul.f32 %v3943_v39, %v7884_v56  ;;  %v3953_v39 = vmul.f32 %v3944_v10, %v7867_v17 }
 0x586   : > { %v3338_v1 = vpop.permute.xlu0 %3337 }
 0x587   : > { %v3340_v60 = vpop.permute.xlu1 %3339  ;;  %v3344_v42 = vsel %vm647_vm6, %v3336_v28, %v3338_v1  ;;  %v3962_v53 = vpack.c.bf16 %v3957_v0, %v3952_v25  ;;  %v3963_v0 = vpack.c.bf16 %v3958_v22, %v3953_v39 }
 0x588   : > { %5216 = vrot.lane.b32.xlu0 %v5203_v52, %s9196_s26  ;;  %5592 = vmatprep.subr.bf16.mxu0 %v3344_v42  ;;  %v3345_v57 = vsel %vm647_vm6, %v3338_v1, %v3340_v60  ;;  %v3950_v1 = vmul.f32 %v8101_v15, %v7718_v61 }
 0x589   : > { %5218 = vrot.lane.b32.xlu1 %v5207_v31, %s9196_s26 }
 0x58a   : > { %v3342_v37 = vpop.permute.xlu0 %3341 }
 0x58b   : > { %v3334_v52 = vpop.permute.xlu1 %3333  ;;  %v3346_v42 = vsel %vm647_vm6, %v3340_v60, %v3342_v37  ;;  %v3955_v60 = vmul.f32 %v8101_v15, %v7721_v62  ;;  %v4033_v15 = vsel %vm1320_vm10, %v8137_v51, %v8144_v35 }
 0x58c   : > { %v3343_v31 = vsel %vm647_vm6, %v3334_v52, %v3336_v28  ;;  %5220 = vrot.lane.b32.xlu0 %v5211_v59, %s9196_s26  ;;  %5674 = vmatprep.subr.bf16.mxu1 %v3346_v42  ;;  %v3954_v28 = vmul.f32 %v8134_v16, %v7901_v18  ;;  %v3959_v59 = vmul.f32 %v8134_v16, %v7905_v63 }
 0x58d   : > { %5222 = vrot.lane.b32.xlu1 %v5215_v19, %s9196_s26  ;;  %5593 = vmatpush1.bf16.msra.mxu0 %v3343_v31  ;;  %v5294_v16 = vrot.slane %v5279_v36, %v6388_v3  ;;  %v3960_v10 = vpack.c.bf16 %v3955_v60, %v3950_v1  ;;  %v5298_v42 = vrot.slane %v5279_v36, %v6392_v5 }
 0x58e   : > { %5675 = vmatpush1.bf16.msra.mxu1 %v3345_v57  ;;  %v8377_v7 = vpop.permute.xlu0 %4670  ;;  %v3964_v25 = vpack.c.bf16 %v3959_v59, %v3954_v28  ;;  %v5302_v31 = vrot.slane %v5279_v36, %v6386_v2  ;;  %v4047_v39 = vmul.f32 %v4033_v15, %v7864_v23  ;;  %v4034_v28 = vsel %vm1320_vm10, %v8144_v35, %v8149_v55 }
 0x58f   : > { %v8383_v37 = vpop.permute.xlu1 %4672  ;;  %v4035_v60 = vsel %vm1320_vm10, %v8149_v55, %v8198_v24  ;;  %v4048_v35 = vmul.f32 %v4034_v28, %v7889_v43 }
 0x590   : > { %3972 = vrot.lane.b32.xlu0 %v3961_v8, %s9204_s0  ;;  %v4042_v8 = vmul.f32 %v4033_v15, %v7861_v27  ;;  %v4044_v15 = vmul.f32 %v4035_v60, %v7867_v17  ;;  %v4049_v55 = vmul.f32 %v4035_v60, %v7870_v29 }
 0x591   : > { %3974 = vrot.lane.b32.xlu1 %v3962_v53, %s9204_s0 }
 0x592   : > { %v8391_v19 = vpop.permute.xlu0 %4674 }
 0x593   : > { %v8393_v47 = vpop.permute.xlu1 %4676 }
 0x594   : > { %3976 = vrot.lane.b32.xlu0 %v3963_v0, %s9204_s0 }
 0x595   : > { %3978 = vrot.lane.b32.xlu1 %v3964_v25, %s9204_s0  ;;  %v5306_v25 = vrot.slane %v5279_v36, %v6390_v4 }
 0x596   : > { %v3427_v53 = vpop.permute.xlu0 %3426 }
 0x597   : > { %v3429_v52 = vpop.permute.xlu1 %3428 }
 0x598   : > { %3970 = vrot.lane.b32.xlu0 %v3960_v10, %s9204_s0  ;;  %v3435_v22 = vsel %vm736_vm5, %v3427_v53, %v3429_v52 }
 0x599   : > { %5307 = vrot.lane.b32.xlu1 %v5294_v16, %s9191_s28  ;;  %5594 = vmatprep.subr.bf16.mxu0 %v3435_v22  ;;  %v4043_v16 = vmul.f32 %v4034_v28, %v7884_v56 }
 0x59a   : > { %v3431_v57 = vpop.permute.xlu0 %3430 }
 0x59b   : > { %v3433_v59 = vpop.permute.xlu1 %3432  ;;  %v3436_v1 = vsel %vm736_vm5, %v3429_v52, %v3431_v57  ;;  %v4052_v52 = vpack.c.bf16 %v4047_v39, %v4042_v8  ;;  %v4053_v36 = vpack.c.bf16 %v4048_v35, %v4043_v16  ;;  %v4041_v39 = vmul.f32 %v8137_v51, %v7718_v61 }
 0x59c   : > { %5309 = vrot.lane.b32.xlu0 %v5298_v42, %s9191_s28  ;;  %v3437_v0 = vsel %vm736_vm5, %v3431_v57, %v3433_v59  ;;  %v4050_v57 = vmul.f32 %v8198_v24, %v7905_v63  ;;  %v4054_v59 = vpack.c.bf16 %v4049_v55, %v4044_v15  ;;  %v4125_v55 = vsel %vm1409_vm11, %v8214_v48, %v8218_v33 }
 0x59d   : > { %5311 = vrot.lane.b32.xlu1 %v5302_v31, %s9191_s28  ;;  %5676 = vmatprep.subr.bf16.mxu1 %v3437_v0  ;;  %v4045_v31 = vmul.f32 %v8198_v24, %v7901_v18 }
 0x59e   : > { %5677 = vmatpush1.bf16.msra.mxu1 %v3436_v1  ;;  %v3425_v10 = vpop.permute.xlu0 %3424  ;;  %v5370_v1 = vld [vmem:[#allocation7 + $0x62] ss:$8 sm:$0xf] }
 0x59f   : > { %v8423_v22 = vpop.permute.xlu1 %4761  ;;  %v3434_v42 = vsel %vm736_vm5, %v3425_v10, %v3427_v53  ;;  %v4046_v53 = vmul.f32 %v8137_v51, %v7721_v62  ;;  %v4055_v0 = vpack.c.bf16 %v4050_v57, %v4045_v31  ;;  %v5385_v16 = vrot.slane %v5370_v1, %v6388_v3 }
 0x5a0   : > { %5313 = vrot.lane.b32.xlu0 %v5306_v25, %s9191_s28  ;;  %5595 = vmatpush1.bf16.msra.mxu0 %v3434_v42  ;;  %v5389_v51 = vrot.slane %v5370_v1, %v6392_v5  ;;  %v4124_v10 = vsel %vm1409_vm11, %v8203_v44, %v8214_v48  ;;  %v5393_v3 = vrot.slane %v5370_v1, %v6386_v2 }
 0x5a1   : > { %4063 = vrot.lane.b32.xlu1 %v4052_v52, %s9203_s19  ;;  %v4051_v25 = vpack.c.bf16 %v4046_v53, %v4041_v39  ;;  %v5397_v5 = vrot.slane %v5370_v1, %v6390_v4  ;;  %v4133_v42 = vmul.f32 %v4124_v10, %v7861_v27  ;;  %v4134_v57 = vmul.f32 %v4125_v55, %v7884_v56 }
 0x5a2   : > { %v8432_v8 = vpop.permute.xlu0 %4763  ;;  %v4139_v39 = vmul.f32 %v4125_v55, %v7889_v43  ;;  %v4126_v48 = vsel %vm1409_vm11, %v8218_v33, %v8224_v45 }
 0x5a3   : > { %v8438_v28 = vpop.permute.xlu1 %4765 }
 0x5a4   : > { %4065 = vrot.lane.b32.xlu0 %v4053_v36, %s9203_s19  ;;  %v4138_v36 = vmul.f32 %v4124_v10, %v7864_v23 }
 0x5a5   : > { %4067 = vrot.lane.b32.xlu1 %v4054_v59, %s9203_s19 }
 0x5a6   : > { %v8442_v60 = vpop.permute.xlu0 %4767  ;;  %v4143_v1 = vpack.c.bf16 %v4138_v36, %v4133_v42 }
 0x5a7   : > { %v3518_v24 = vpop.permute.xlu1 %3517 }
 0x5a8   : > { %4069 = vrot.lane.b32.xlu0 %v4055_v0, %s9203_s19  ;;  %v4135_v0 = vmul.f32 %v4126_v48, %v7867_v17 }
 0x5a9   : > { %4061 = vrot.lane.b32.xlu1 %v4051_v25, %s9203_s19  ;;  %v4140_v25 = vmul.f32 %v4126_v48, %v7870_v29  ;;  %s6177_s19 = smov [#allocation9]  }
 0x5aa   : > { %v3520_v35 = vpop.permute.xlu0 %3519 }
 0x5ab   : > { %v3522_v52 = vpop.permute.xlu1 %3521  ;;  %v3526_v15 = vsel %vm786_vm4, %v3518_v24, %v3520_v35 }
 0x5ac   : > { %5398 = vrot.lane.b32.xlu0 %v5385_v16, %s9190_s27  ;;  %5596 = vmatprep.subr.bf16.mxu0 %v3526_v15  ;;  %v3527_v4 = vsel %vm786_vm4, %v3520_v35, %v3522_v52  ;;  %v4144_v16 = vpack.c.bf16 %v4139_v39, %v4134_v57  ;;  %v4215_v35 = vsel %vm1498_vm12, %v8234_v34, %v8238_v26 }
 0x5ad   : > { %5400 = vrot.lane.b32.xlu1 %v5389_v51, %s9190_s27  ;;  %v4141_v51 = vmul.f32 %v8224_v45, %v7905_v63  ;;  %v4137_v15 = vmul.f32 %v8203_v44, %v7721_v62  ;;  %v4229_v42 = vmul.f32 %v4215_v35, %v7864_v23  ;;  %v4217_v57 = vsel %vm1498_vm12, %v8240_v40, %v8246_v30 }
 0x5ae   : > { %v3524_v31 = vpop.permute.xlu0 %3523 }
 0x5af   : > { %v3516_v53 = vpop.permute.xlu1 %3515  ;;  %v3528_v2 = vsel %vm786_vm4, %v3522_v52, %v3524_v31  ;;  %v4132_v52 = vmul.f32 %v8203_v44, %v7718_v61 }
 0x5b0   : > { %v3525_v59 = vsel %vm786_vm4, %v3516_v53, %v3518_v24  ;;  %5402 = vrot.lane.b32.xlu0 %v5393_v3, %s9190_s27  ;;  %5678 = vmatprep.subr.bf16.mxu1 %v3528_v2  ;;  %v4136_v24 = vmul.f32 %v8224_v45, %v7901_v18  ;;  %v4145_v3 = vpack.c.bf16 %v4140_v25, %v4135_v0 }
 0x5b1   : > { %5404 = vrot.lane.b32.xlu1 %v5397_v5, %s9190_s27  ;;  %5597 = vmatpush1.bf16.msra.mxu0 %v3525_v59  ;;  %v4216_v45 = vsel %vm1498_vm12, %v8238_v26, %v8240_v40  ;;  %v4224_v5 = vmul.f32 %v4215_v35, %v7861_v27  ;;  %v4142_v48 = vpack.c.bf16 %v4137_v15, %v4132_v52 }
 0x5b2   : > { %5679 = vmatpush1.bf16.msra.mxu1 %v3527_v4  ;;  %v8473_v33 = vpop.permute.xlu0 %4852  ;;  %v4146_v31 = vpack.c.bf16 %v4141_v51, %v4136_v24  ;;  %v4225_v44 = vmul.f32 %v4216_v45, %v7884_v56  ;;  %v4230_v39 = vmul.f32 %v4216_v45, %v7889_v43  ;;  %v4226_v2 = vmul.f32 %v4217_v57, %v7867_v17 }
 0x5b3   : > { %v8479_v10 = vpop.permute.xlu1 %4854  ;;  %v4234_v53 = vpack.c.bf16 %v4229_v42, %v4224_v5  ;;  %v4231_v59 = vmul.f32 %v4217_v57, %v7870_v29  ;;  %v4228_v0 = vmul.f32 %v8234_v34, %v7721_v62  ;;  %v4232_v24 = vmul.f32 %v8246_v30, %v7905_v63 }
 0x5b4   : > { %4154 = vrot.lane.b32.xlu0 %v4143_v1, %s9202_s21  ;;  %v4223_v1 = vmul.f32 %v8234_v34, %v7718_v61  ;;  %v4235_v25 = vpack.c.bf16 %v4230_v39, %v4225_v44  ;;  %v4314_v35 = vsel %vm1537_vm13, %v8251_v49, %v8260_v20  ;;  %v4315_v34 = vsel %vm1537_vm13, %v8260_v20, %v8267_v50 }
 0x5b5   : > { %4156 = vrot.lane.b32.xlu1 %v4144_v16, %s9202_s21  ;;  %v4227_v16 = vmul.f32 %v8246_v30, %v7901_v18  ;;  %v4236_v15 = vpack.c.bf16 %v4231_v59, %v4226_v2  ;;  %v4323_v30 = vmul.f32 %v4314_v35, %v7884_v56  ;;  %v4328_v5 = vmul.f32 %v4314_v35, %v7889_v43 }
 0x5b6   : > { %v8490_v55 = vpop.permute.xlu0 %4856  ;;  %v4324_v44 = vmul.f32 %v4315_v34, %v7867_v17  ;;  %v4329_v39 = vmul.f32 %v4315_v34, %v7870_v29  ;;  %v4316_v20 = vsel %vm1537_vm13, %v8267_v50, %v8273_v11  ;;  %v4326_v50 = vmul.f32 %v8273_v11, %v7718_v61 }
 0x5b7   : > { %v8497_v36 = vpop.permute.xlu1 %4858  ;;  %v4237_v57 = vpack.c.bf16 %v4232_v24, %v4227_v16  ;;  %v4333_v2 = vpack.c.bf16 %v4328_v5, %v4323_v30  ;;  %v4325_v59 = vmul.f32 %v4316_v20, %v7901_v18  ;;  %v4322_v16 = vmul.f32 %v8251_v49, %v7861_v27 }
 0x5b8   : > { %4158 = vrot.lane.b32.xlu0 %v4145_v3, %s9202_s21  ;;  %v4327_v24 = vmul.f32 %v8251_v49, %v7864_v23 }
 0x5b9   : > { %4160 = vrot.lane.b32.xlu1 %v4146_v31, %s9202_s21  ;;  %v4233_v31 = vpack.c.bf16 %v4228_v0, %v4223_v1  ;;  %v4334_v1 = vpack.c.bf16 %v4329_v39, %v4324_v44  ;;  %v4331_v0 = vmul.f32 %v8273_v11, %v7721_v62  ;;  %v4406_v11 = vsel %vm9210_vm15, %v8289_v14, %v8291_v38 }
 0x5ba   : > { %v3609_v26 = vpop.permute.xlu0 %3608  ;;  %v4415_v49 = vmul.f32 %v4406_v11, %v7867_v17  ;;  %v4420_v30 = vmul.f32 %v4406_v11, %v7870_v29 }
 0x5bb   : > { %v3611_v4 = vpop.permute.xlu1 %3610  ;;  %v4336_v34 = vpack.c.bf16 %v4331_v0, %v4326_v50 }
 0x5bc   : > { %4152 = vrot.lane.b32.xlu0 %v4142_v48, %s9202_s21  ;;  %v3617_v40 = vsel %vm697_vm3, %v3609_v26, %v3611_v4 }
 0x5bd   : > { %4245 = vrot.lane.b32.xlu1 %v4234_v53, %s9201_s1  ;;  %5598 = vmatprep.subr.bf16.mxu0 %v3617_v40 }
 0x5be   : > { %v3613_v51 = vpop.permute.xlu0 %3612 }
 0x5bf   : > { %v3615_v52 = vpop.permute.xlu1 %3614  ;;  %v3618_v3 = vsel %vm697_vm3, %v3611_v4, %v3613_v51  ;;  %v4330_v4 = vmul.f32 %v4316_v20, %v7905_v63  ;;  %v4425_v20 = vpack.c.bf16 %v4420_v30, %v4415_v49 }
 0x5c0   : > { %4247 = vrot.lane.b32.xlu0 %v4235_v25, %s9201_s1  ;;  %v3619_v45 = vsel %vm697_vm3, %v3613_v51, %v3615_v52  ;;  %v4405_v25 = vsel %vm9209_vm14, %v8277_v21, %v8289_v14  ;;  %v4332_v14 = vpack.c.bf16 %v4327_v24, %v4322_v16  ;;  %vm9212_vm14 = vcmask 64512   ;;  %v8594_v16 = vld [vmem:[%s9106_s6] sm:$0xff] }
 0x5c1   : > { %4249 = vrot.lane.b32.xlu1 %v4236_v15, %s9201_s1  ;;  %5680 = vmatprep.subr.bf16.mxu1 %v3619_v45  ;;  %v4335_v35 = vpack.c.bf16 %v4330_v4, %v4325_v59  ;;  %v4414_v52 = vmul.f32 %v4405_v25, %v7884_v56  ;;  %v4419_v15 = vmul.f32 %v4405_v25, %v7889_v43  ;;  %vm9213_vm15 = vmmov %vm9212_vm14 }
 0x5c2   : > { %5681 = vmatpush1.bf16.msra.mxu1 %v3618_v3  ;;  %v3607_v42 = vpop.permute.xlu0 %3606  ;;  %v4407_v45 = vsel %vm9211_vm9, %v8291_v38, %v8296_v46  ;;  %v4413_v38 = vmul.f32 %v8277_v21, %v7861_v27  ;;  %v4418_v4 = vmul.f32 %v8277_v21, %v7864_v23  ;;  %v5890_v21 = vcombine.high %v8594_v16, %v8594_v16  ;;  %vm9214_vm9 = vmmov %vm9212_vm14 }
 0x5c3   : > { %v8536_v48 = vpop.permute.xlu1 %4943  ;;  %v3616_v53 = vsel %vm697_vm3, %v3607_v42, %v3609_v26  ;;  %v4424_v42 = vpack.c.bf16 %v4419_v15, %v4414_v52 }
 0x5c4   : > { %4251 = vrot.lane.b32.xlu0 %v4237_v57, %s9201_s1  ;;  %5599 = vmatpush1.bf16.msra.mxu0 %v3616_v53  ;;  %v4421_v57 = vmul.f32 %v4407_v45, %v7905_v63  ;;  %v4417_v53 = vmul.f32 %v8296_v46, %v7718_v61  ;;  %v4423_v30 = vpack.c.bf16 %v4418_v4, %v4413_v38 }
 0x5c5   : > { %4243 = vrot.lane.b32.xlu1 %v4233_v31, %s9201_s1  ;;  %v4416_v31 = vmul.f32 %v4407_v45, %v7901_v18  ;;  %5702 = vmatprep.mubr.bf16.mxu1 %v5890_v21  ;;  %v4498_v45 = vsel %vm9214_vm9, %v8312_v12, %v8322_v58 }
 0x5c6   : > { %v8543_v40 = vpop.permute.xlu0 %4945  ;;  %5620 = vmatprep.mubr.bf16.mxu0 %v5890_v21 }
 0x5c7   : > { %v8549_v26 = vpop.permute.xlu1 %4947  ;;  %v4426_v0 = vpack.c.bf16 %v4421_v57, %v4416_v31 }
 0x5c8   : > { %4344 = vrot.lane.b32.xlu0 %v4333_v2, %s9181_s24  ;;  %v4422_v2 = vmul.f32 %v8296_v46, %v7721_v62  ;;  %v4497_v46 = vsel %vm9213_vm15, %v8307_v54, %v8312_v12  ;;  %v4513_v12 = vmul.f32 %v8322_v58, %v7721_v62 }
 0x5c9   : > { %4346 = vrot.lane.b32.xlu1 %v4334_v1, %s9181_s24  ;;  %v4496_v1 = vsel %vm9212_vm14, %v8298_v9, %v8307_v54  ;;  %vm9215_vm14 = vcmask 72704  }
 0x5ca   : > { %v8560_v51 = vpop.permute.xlu0 %4949  ;;  %v4505_v11 = vmul.f32 %v4496_v1, %v7884_v56  ;;  %v4510_v52 = vmul.f32 %v4496_v1, %v7889_v43  ;;  %v4427_v54 = vpack.c.bf16 %v4422_v2, %v4417_v53  ;;  %v4587_v38 = vsel %vm9215_vm14, %v8326_v13, %v8332_v6  ;;  %vm9216_vm15 = vmmov %vm9215_vm14 }
 0x5cb   : > { %v3700_v3 = vpop.permute.xlu1 %3699  ;;  %v4509_v53 = vmul.f32 %v8298_v9, %v7864_v23  ;;  %v4596_v4 = vmul.f32 %v4587_v38, %v7884_v56  ;;  %v4601_v1 = vmul.f32 %v4587_v38, %v7889_v43  ;;  %vm9217_vm9 = vmmov %vm9215_vm14 }
 0x5cc   : > { %4348 = vrot.lane.b32.xlu0 %v4335_v35, %s9181_s24  ;;  %vm9218_vm14 = vmmov %vm9217_vm9 }
 0x5cd   : > { %4350 = vrot.lane.b32.xlu1 %v4336_v34, %s9181_s24  ;;  %v4511_v34 = vmul.f32 %v4497_v46, %v7870_v29 }
 0x5ce   : > { %v3702_v5 = vpop.permute.xlu0 %3701 }
 0x5cf   : > { %v3704_v44 = vpop.permute.xlu1 %3703  ;;  %v3708_v39 = vsel %vm608_vm2, %v3700_v3, %v3702_v5 }
 0x5d0   : > { %4342 = vrot.lane.b32.xlu0 %v4332_v14, %s9181_s24  ;;  %5600 = vmatprep.subr.bf16.mxu0 %v3708_v39  ;;  %v3709_v35 = vsel %vm608_vm2, %v3702_v5, %v3704_v44  ;;  %v4515_v5 = vpack.c.bf16 %v4510_v52, %v4505_v11  ;;  %v4507_v14 = vmul.f32 %v4498_v45, %v7901_v18 }
 0x5d1   : > { %4435 = vrot.lane.b32.xlu1 %v4424_v42, %s9182_s22  ;;  %v4512_v42 = vmul.f32 %v4498_v45, %v7905_v63  ;;  %v4599_v45 = vmul.f32 %v8346_v32, %v7718_v61 }
 0x5d2   : > { %v3706_v59 = vpop.permute.xlu0 %3705 }
 0x5d3   : > { %v3698_v50 = vpop.permute.xlu1 %3697  ;;  %v3710_v25 = vsel %vm608_vm2, %v3704_v44, %v3706_v59  ;;  %v4508_v44 = vmul.f32 %v8322_v58, %v7718_v61  ;;  %v4517_v59 = vpack.c.bf16 %v4512_v42, %v4507_v14  ;;  %v4588_v58 = vsel %vm9216_vm15, %v8332_v6, %v8342_v41  ;;  %vm9219_vm15 = vmmov %vm9217_vm9 }
 0x5d4   : > { %v3707_v24 = vsel %vm608_vm2, %v3698_v50, %v3700_v3  ;;  %4437 = vrot.lane.b32.xlu0 %v4425_v20, %s9182_s22  ;;  %5682 = vmatprep.subr.bf16.mxu1 %v3710_v25  ;;  %v4506_v3 = vmul.f32 %v4497_v46, %v7867_v17  ;;  %v4504_v20 = vmul.f32 %v8298_v9, %v7861_v27 }
 0x5d5   : > { %4439 = vrot.lane.b32.xlu1 %v4426_v0, %s9182_s22  ;;  %5601 = vmatpush1.bf16.msra.mxu0 %v3707_v24  ;;  %v4518_v0 = vpack.c.bf16 %v4513_v12, %v4508_v44  ;;  %v4589_v25 = vsel %vm9217_vm9, %v8342_v41, %v8346_v32  ;;  %v4597_v46 = vmul.f32 %v4588_v58, %v7867_v17 }
 0x5d6   : > { %5683 = vmatpush1.bf16.msra.mxu1 %v3709_v35  ;;  %v8607_v15 = vpop.permute.xlu0 %5034  ;;  %v4516_v57 = vpack.c.bf16 %v4511_v34, %v4506_v3  ;;  %v4602_v6 = vmul.f32 %v4588_v58, %v7870_v29  ;;  %v4514_v21 = vpack.c.bf16 %v4509_v53, %v4504_v20  ;;  %v4606_v35 = vpack.c.bf16 %v4601_v1, %v4596_v4 }
 0x5d7   : > { %v8614_v49 = vpop.permute.xlu1 %5036  ;;  %v4598_v11 = vmul.f32 %v4589_v25, %v7901_v18  ;;  %v4603_v52 = vmul.f32 %v4589_v25, %v7905_v63  ;;  %v4595_v42 = vmul.f32 %v8326_v13, %v7861_v27  ;;  %v4695_v25 = vmul.f32 %v8393_v47, %v7721_v62 }
 0x5d8   : > { %4441 = vrot.lane.b32.xlu0 %v4427_v54, %s9182_s22  ;;  %v4607_v34 = vpack.c.bf16 %v4602_v6, %v4597_v46 }
 0x5d9   : > { %4433 = vrot.lane.b32.xlu1 %v4423_v30, %s9182_s22  ;;  %v4604_v30 = vmul.f32 %v8346_v32, %v7721_v62  ;;  %v4608_v38 = vpack.c.bf16 %v4603_v52, %v4598_v11  ;;  %v4679_v32 = vsel %vm430_vm0, %v8383_v37, %v8391_v19 }
 0x5da   : > { %v8620_v31 = vpop.permute.xlu0 %5038  ;;  %v4688_v58 = vmul.f32 %v4679_v32, %v7867_v17 }
 0x5db   : > { %v8626_v39 = vpop.permute.xlu1 %5040 }
 0x5dc   : > { %4526 = vrot.lane.b32.xlu0 %v4515_v5, %s9184_s29  ;;  %v4678_v5 = vsel %vm430_vm0, %v8377_v7, %v8383_v37  ;;  %v4693_v37 = vmul.f32 %v4679_v32, %v7870_v29 }
 0x5dd   : > { %4528 = vrot.lane.b32.xlu1 %v4516_v57, %s9184_s29  ;;  %v4600_v57 = vmul.f32 %v8326_v13, %v7864_v23  ;;  %v4687_v20 = vmul.f32 %v4678_v5, %v7884_v56  ;;  %v4692_v53 = vmul.f32 %v4678_v5, %v7889_v43  ;;  %v4609_v13 = vpack.c.bf16 %v4604_v30, %v4599_v45 }
 0x5de   : > { %v3791_v2 = vpop.permute.xlu0 %3790  ;;  %v4698_v6 = vpack.c.bf16 %v4693_v37, %v4688_v58  ;;  %v4771_v5 = vsel %vm519_vm1, %v8438_v28, %v8442_v60  ;;  %v4786_v58 = vmul.f32 %v8442_v60, %v7721_v62  ;;  %v4860_v37 = vsel %vm608_vm2, %v8473_v33, %v8479_v10 }
 0x5df   : > { %v3793_v50 = vpop.permute.xlu1 %3792  ;;  %v4605_v1 = vpack.c.bf16 %v4600_v57, %v4595_v42 }
 0x5e0   : > { %4530 = vrot.lane.b32.xlu0 %v4517_v59, %s9184_s29  ;;  %v3799_v9 = vsel %vm519_vm1, %v3791_v2, %v3793_v50 }
 0x5e1   : > { %4532 = vrot.lane.b32.xlu1 %v4518_v0, %s9184_s29  ;;  %5602 = vmatprep.subr.bf16.mxu0 %v3799_v9  ;;  %v4690_v0 = vmul.f32 %v8393_v47, %v7718_v61 }
 0x5e2   : > { %v3795_v24 = vpop.permute.xlu0 %3794 }
 0x5e3   : > { %v3797_v54 = vpop.permute.xlu1 %3796  ;;  %v3800_v41 = vsel %vm519_vm1, %v3793_v50, %v3795_v24  ;;  %v4697_v50 = vpack.c.bf16 %v4692_v53, %v4687_v20 }
 0x5e4   : > { %4524 = vrot.lane.b32.xlu0 %v4514_v21, %s9184_s29  ;;  %v3801_v3 = vsel %vm519_vm1, %v3795_v24, %v3797_v54  ;;  %v4769_v21 = vsel %vm519_vm1, %v8423_v22, %v8432_v8  ;;  %v4700_v54 = vpack.c.bf16 %v4695_v25, %v4690_v0  ;;  %v4782_v0 = vmul.f32 %v8423_v22, %v7864_v23 }
 0x5e5   : > { %4617 = vrot.lane.b32.xlu1 %v4606_v35, %s9185_s13  ;;  %5684 = vmatprep.subr.bf16.mxu1 %v3801_v3  ;;  %v4686_v35 = vmul.f32 %v8377_v7, %v7861_v27  ;;  %v4778_v3 = vmul.f32 %v4769_v21, %v7884_v56 }
 0x5e6   : > { %5685 = vmatpush1.bf16.msra.mxu1 %v3800_v41  ;;  %v3789_v14 = vpop.permute.xlu0 %3788  ;;  %v4770_v41 = vsel %vm519_vm1, %v8432_v8, %v8438_v28 }
 0x5e7   : > { %v8667_v44 = vpop.permute.xlu1 %5125  ;;  %v3798_v12 = vsel %vm519_vm1, %v3789_v14, %v3791_v2  ;;  %v4680_v2 = vsel %vm430_vm0, %v8391_v19, %v8393_v47  ;;  %v4691_v47 = vmul.f32 %v8377_v7, %v7864_v23  ;;  %v4779_v7 = vmul.f32 %v4770_v41, %v7867_v17 }
 0x5e8   : > { %4619 = vrot.lane.b32.xlu0 %v4607_v34, %s9185_s13  ;;  %5603 = vmatpush1.bf16.msra.mxu0 %v3798_v12  ;;  %v4689_v19 = vmul.f32 %v4680_v2, %v7901_v18  ;;  %v4694_v9 = vmul.f32 %v4680_v2, %v7905_v63  ;;  %v4783_v34 = vmul.f32 %v4769_v21, %v7889_v43 }
 0x5e9   : > { %4621 = vrot.lane.b32.xlu1 %v4608_v38, %s9185_s13  ;;  %v4784_v8 = vmul.f32 %v4770_v41, %v7870_v29  ;;  %v4696_v42 = vpack.c.bf16 %v4691_v47, %v4686_v35  ;;  %v4780_v12 = vmul.f32 %v4771_v5, %v7901_v18  ;;  %v4785_v38 = vmul.f32 %v4771_v5, %v7905_v63 }
 0x5ea   : > { %v8677_v59 = vpop.permute.xlu0 %5127  ;;  %v4699_v11 = vpack.c.bf16 %v4694_v9, %v4689_v19  ;;  %v4788_v57 = vpack.c.bf16 %v4783_v34, %v4778_v3  ;;  %v4781_v2 = vmul.f32 %v8442_v60, %v7718_v61  ;;  %v4861_v60 = vsel %vm608_vm2, %v8479_v10, %v8490_v55 }
 0x5eb   : > { %v8684_v4 = vpop.permute.xlu1 %5129  ;;  %v4790_v19 = vpack.c.bf16 %v4785_v38, %v4780_v12  ;;  %v4869_v9 = vmul.f32 %v4860_v37, %v7884_v56  ;;  %v4870_v35 = vmul.f32 %v4861_v60, %v7867_v17  ;;  %v4875_v47 = vmul.f32 %v4861_v60, %v7870_v29 }
 0x5ec   : > { %4623 = vrot.lane.b32.xlu0 %v4609_v13, %s9185_s13  ;;  %v4789_v13 = vpack.c.bf16 %v4784_v8, %v4779_v7  ;;  %v4791_v21 = vpack.c.bf16 %v4786_v58, %v4781_v2  ;;  %v4877_v41 = vmul.f32 %v8497_v36, %v7721_v62  ;;  %v4951_v5 = vsel %vm697_vm3, %v8536_v48, %v8543_v40 }
 0x5ed   : > { %4615 = vrot.lane.b32.xlu1 %v4605_v1, %s9185_s13  ;;  %v4873_v8 = vmul.f32 %v8473_v33, %v7864_v23  ;;  %v4952_v12 = vsel %vm697_vm3, %v8543_v40, %v8549_v26  ;;  %v4960_v38 = vmul.f32 %v4951_v5, %v7884_v56 }
 0x5ee   : > { %v8694_v46 = vpop.permute.xlu0 %5131  ;;  %v4961_v40 = vmul.f32 %v4952_v12, %v7867_v17 }
 0x5ef   : > { %v3882_v24 = vpop.permute.xlu1 %3881 }
 0x5f0   : > { %4708 = vrot.lane.b32.xlu0 %v4697_v50, %s9190_s27  ;;  %v4777_v50 = vmul.f32 %v8423_v22, %v7861_v27  ;;  %v4862_v22 = vsel %vm608_vm2, %v8490_v55, %v8497_v36 }
 0x5f1   : > { %4710 = vrot.lane.b32.xlu1 %v4698_v6, %s9190_s27  ;;  %v4874_v6 = vmul.f32 %v4860_v37, %v7889_v43  ;;  %v4871_v55 = vmul.f32 %v4862_v22, %v7901_v18  ;;  %v4876_v3 = vmul.f32 %v4862_v22, %v7905_v63 }
 0x5f2   : > { %v3884_v52 = vpop.permute.xlu0 %3883 }
 0x5f3   : > { %v3886_v45 = vpop.permute.xlu1 %3885  ;;  %v3890_v30 = vsel %vm430_vm0, %v3882_v24, %v3884_v52 }
 0x5f4   : > { %4712 = vrot.lane.b32.xlu0 %v4699_v11, %s9190_s27  ;;  %5604 = vmatprep.subr.bf16.mxu0 %v3890_v30  ;;  %v3891_v53 = vsel %vm430_vm0, %v3884_v52, %v3886_v45  ;;  %v4787_v11 = vpack.c.bf16 %v4782_v0, %v4777_v50  ;;  %v4879_v52 = vpack.c.bf16 %v4874_v6, %v4869_v9 }
 0x5f5   : > { %4714 = vrot.lane.b32.xlu1 %v4700_v54, %s9190_s27  ;;  %v4872_v54 = vmul.f32 %v8497_v36, %v7718_v61  ;;  %v4868_v36 = vmul.f32 %v8473_v33, %v7861_v27  ;;  %v4963_v9 = vmul.f32 %v8560_v51, %v7718_v61  ;;  %v4968_v6 = vmul.f32 %v8560_v51, %v7721_v62 }
 0x5f6   : > { %v3888_v14 = vpop.permute.xlu0 %3887 }
 0x5f7   : > { %v3880_v32 = vpop.permute.xlu1 %3879  ;;  %v3892_v20 = vsel %vm430_vm0, %v3886_v45, %v3888_v14  ;;  %v4880_v45 = vpack.c.bf16 %v4875_v47, %v4870_v35  ;;  %v4881_v14 = vpack.c.bf16 %v4876_v3, %v4871_v55  ;;  %v4878_v58 = vpack.c.bf16 %v4873_v8, %v4868_v36 }
 0x5f8   : > { %v3889_v28 = vsel %vm430_vm0, %v3880_v32, %v3882_v24  ;;  %4706 = vrot.lane.b32.xlu0 %v4696_v42, %s9190_s27  ;;  %5686 = vmatprep.subr.bf16.mxu1 %v3892_v20  ;;  %v4965_v32 = vmul.f32 %v4951_v5, %v7889_v43  ;;  %v4959_v35 = vmul.f32 %v8536_v48, %v7861_v27 }
 0x5f9   : > { %4799 = vrot.lane.b32.xlu1 %v4788_v57, %s9191_s28  ;;  %5605 = vmatpush1.bf16.msra.mxu0 %v3889_v28  ;;  %v4882_v57 = vpack.c.bf16 %v4877_v41, %v4872_v54  ;;  %v4964_v47 = vmul.f32 %v8536_v48, %v7864_v23  ;;  %v5043_v54 = vsel %vm786_vm4, %v8614_v49, %v8620_v31 }
 0x5fa   : > { %5687 = vmatpush1.bf16.msra.mxu1 %v3891_v53  ;;  %v8732_v1 = vpop.permute.xlu0 %5216  ;;  %v4953_v53 = vsel %vm697_vm3, %v8549_v26, %v8560_v51  ;;  %v4970_v37 = vpack.c.bf16 %v4965_v32, %v4960_v38  ;;  %v4973_v3 = vpack.c.bf16 %v4968_v6, %v4963_v9  ;;  %v5044_v48 = vsel %vm786_vm4, %v8620_v31, %v8626_v39 }
 0x5fb   : > { %v8738_v25 = vpop.permute.xlu1 %5218  ;;  %v4962_v50 = vmul.f32 %v4953_v53, %v7901_v18  ;;  %v4967_v0 = vmul.f32 %v4953_v53, %v7905_v63  ;;  %v5059_v36 = vmul.f32 %v8626_v39, %v7721_v62  ;;  %v5053_v8 = vmul.f32 %v5044_v48, %v7901_v18 }
 0x5fc   : > { %4801 = vrot.lane.b32.xlu0 %v4789_v13, %s9191_s28  ;;  %v4966_v13 = vmul.f32 %v4952_v12, %v7870_v29  ;;  %v5058_v31 = vmul.f32 %v5044_v48, %v7905_v63  ;;  %v5133_v38 = vsel %vm736_vm5, %v8667_v44, %v8677_v59  ;;  %v5055_v32 = vmul.f32 %v8607_v15, %v7864_v23 }
 0x5fd   : > { %4803 = vrot.lane.b32.xlu1 %v4790_v19, %s9191_s28 }
 0x5fe   : > { %v8747_v24 = vpop.permute.xlu0 %5220  ;;  %v4971_v60 = vpack.c.bf16 %v4966_v13, %v4961_v40  ;;  %v5142_v40 = vmul.f32 %v5133_v38, %v7884_v56  ;;  %v5147_v13 = vmul.f32 %v5133_v38, %v7889_v43 }
 0x5ff   : > { %v8754_v10 = vpop.permute.xlu1 %5222 }
 0x600   : > { %4805 = vrot.lane.b32.xlu0 %v4791_v21, %s9191_s28  ;;  %v5042_v21 = vsel %vm786_vm4, %v8607_v15, %v8614_v49  ;;  %v5152_v9 = vpack.c.bf16 %v5147_v13, %v5142_v40 }
 0x601   : > { %4797 = vrot.lane.b32.xlu1 %v4787_v11, %s9191_s28  ;;  %v5051_v51 = vmul.f32 %v5042_v21, %v7884_v56  ;;  %v5056_v41 = vmul.f32 %v5042_v21, %v7889_v43 }
 0x602   : > { %v3973_v34 = vpop.permute.xlu0 %3972 }
 0x603   : > { %v3975_v30 = vpop.permute.xlu1 %3974  ;;  %v5061_v5 = vpack.c.bf16 %v5056_v41, %v5051_v51  ;;  %v5141_v41 = vmul.f32 %v8667_v44, %v7861_v27 }
 0x604   : > { %4890 = vrot.lane.b32.xlu0 %v4879_v52, %s9196_s26  ;;  %v3981_v7 = vsel %vm9218_vm14, %v3973_v34, %v3975_v30  ;;  %vm9220_vm14 = vmmov %vm9217_vm9  ;;  %v4972_v52 = vpack.c.bf16 %v4967_v0, %v4962_v50 }
 0x605   : > { %4892 = vrot.lane.b32.xlu1 %v4880_v45, %s9196_s26  ;;  %5606 = vmatprep.subr.bf16.mxu0 %v3981_v7  ;;  %v5057_v45 = vmul.f32 %v5043_v54, %v7870_v29  ;;  %v5054_v7 = vmul.f32 %v8626_v39, %v7718_v61  ;;  %v5050_v39 = vmul.f32 %v8607_v15, %v7861_v27 }
 0x606   : > { %v3977_v42 = vpop.permute.xlu0 %3976 }
 0x607   : > { %v3979_v20 = vpop.permute.xlu1 %3978  ;;  %v3982_v28 = vsel %vm9219_vm15, %v3975_v30, %v3977_v42  ;;  %v4969_v30 = vpack.c.bf16 %v4964_v47, %v4959_v35  ;;  %vm9221_vm15 = vcmask 64512   ;;  %v5064_v53 = vpack.c.bf16 %v5059_v36, %v5054_v7 }
 0x608   : > { %4894 = vrot.lane.b32.xlu0 %v4881_v14, %s9196_s26  ;;  %v3983_v33 = vsel %vm9217_vm9, %v3977_v42, %v3979_v20  ;;  %v5063_v20 = vpack.c.bf16 %v5058_v31, %v5053_v8  ;;  %vm9222_vm9 = vmmov %vm9221_vm15  ;;  %v5145_v47 = vmul.f32 %v8694_v46, %v7718_v61 }
 0x609   : > { %4896 = vrot.lane.b32.xlu1 %v4882_v57, %s9196_s26  ;;  %5688 = vmatprep.subr.bf16.mxu1 %v3983_v33  ;;  %v5134_v33 = vsel %vm736_vm5, %v8677_v59, %v8684_v4 }
 0x60a   : > { %5689 = vmatpush1.bf16.msra.mxu1 %v3982_v28  ;;  %v3971_v2 = vpop.permute.xlu0 %3970  ;;  %v5143_v59 = vmul.f32 %v5134_v33, %v7867_v17  ;;  %v5148_v0 = vmul.f32 %v5134_v33, %v7870_v29  ;;  %v5237_v33 = vmul.f32 %v8732_v1, %v7864_v23 }
 0x60b   : > { %v8790_v26 = vpop.permute.xlu1 %5307  ;;  %v3980_v19 = vsel %vm9220_vm14, %v3971_v2, %v3973_v34  ;;  %v5052_v34 = vmul.f32 %v5043_v54, %v7867_v17  ;;  %vm9223_vm14 = vmmov %vm9222_vm9  ;;  %v5224_v54 = vsel %vm647_vm6, %v8732_v1, %v8738_v25 }
 0x60c   : > { %4888 = vrot.lane.b32.xlu0 %v4878_v58, %s9196_s26  ;;  %5607 = vmatpush1.bf16.msra.mxu0 %v3980_v19  ;;  %v5153_v35 = vpack.c.bf16 %v5148_v0, %v5143_v59 }
 0x60d   : > { %4981 = vrot.lane.b32.xlu1 %v4970_v37, %s9195_s20  ;;  %v5062_v42 = vpack.c.bf16 %v5057_v45, %v5052_v34  ;;  %v5135_v37 = vsel %vm736_vm5, %v8684_v4, %v8694_v46  ;;  %v5225_v45 = vsel %vm647_vm6, %v8738_v25, %v8747_v24 }
 0x60e   : > { %v8802_v22 = vpop.permute.xlu0 %5309  ;;  %v5144_v4 = vmul.f32 %v5135_v37, %v7901_v18  ;;  %v5149_v6 = vmul.f32 %v5135_v37, %v7905_v63  ;;  %v5234_v7 = vmul.f32 %v5225_v45, %v7867_v17  ;;  %v5239_v36 = vmul.f32 %v5225_v45, %v7870_v29 }
 0x60f   : > { %v8808_v11 = vpop.permute.xlu1 %5311  ;;  %v5328_v45 = vmul.f32 %v8790_v26, %v7864_v23 }
 0x610   : > { %4983 = vrot.lane.b32.xlu0 %v4971_v60, %s9195_s20  ;;  %v5060_v60 = vpack.c.bf16 %v5055_v32, %v5050_v39  ;;  %v5154_v34 = vpack.c.bf16 %v5149_v6, %v5144_v4  ;;  %v5244_v39 = vpack.c.bf16 %v5239_v36, %v5234_v7 }
 0x611   : > { %4985 = vrot.lane.b32.xlu1 %v4972_v52, %s9195_s20  ;;  %v5150_v52 = vmul.f32 %v8694_v46, %v7721_v62  ;;  %v5233_v46 = vmul.f32 %v5224_v54, %v7884_v56 }
 0x612   : > { %v8817_v55 = vpop.permute.xlu0 %5313 }
 0x613   : > { %v4064_v49 = vpop.permute.xlu1 %4063  ;;  %v5317_v0 = vsel %vm558_vm7, %v8808_v11, %v8817_v55 }
 0x614   : > { %4987 = vrot.lane.b32.xlu0 %v4973_v3, %s9195_s20  ;;  %v5146_v3 = vmul.f32 %v8667_v44, %v7864_v23  ;;  %v5226_v44 = vsel %vm647_vm6, %v8747_v24, %v8754_v10  ;;  %v5241_v24 = vmul.f32 %v8754_v10, %v7721_v62  ;;  %v5326_v6 = vmul.f32 %v5317_v0, %v7901_v18 }
 0x615   : > { %4979 = vrot.lane.b32.xlu1 %v4969_v30, %s9195_s20 }
 0x616   : > { %v4066_v14 = vpop.permute.xlu0 %4065  ;;  %v5151_v25 = vpack.c.bf16 %v5146_v3, %v5141_v41  ;;  %v5327_v41 = vmul.f32 %v8817_v55, %v7718_v61  ;;  %v5332_v3 = vmul.f32 %v8817_v55, %v7721_v62 }
 0x617   : > { %v4068_v57 = vpop.permute.xlu1 %4067  ;;  %v4072_v12 = vsel %vm9221_vm15, %v4064_v49, %v4066_v14  ;;  %vm9224_vm15 = vmmov %vm9222_vm9 }
 0x618   : > { %5072 = vrot.lane.b32.xlu0 %v5061_v5, %s9194_s18  ;;  %5608 = vmatprep.subr.bf16.mxu0 %v4072_v12  ;;  %v4073_v50 = vsel %vm9224_vm15, %v4066_v14, %v4068_v57  ;;  %v5155_v5 = vpack.c.bf16 %v5150_v52, %v5145_v47  ;;  %v5240_v12 = vmul.f32 %v5226_v44, %v7905_v63 }
 0x619   : > { %5074 = vrot.lane.b32.xlu1 %v5062_v42, %s9194_s18  ;;  %v5236_v42 = vmul.f32 %v8754_v10, %v7718_v61  ;;  %v5232_v10 = vmul.f32 %v8732_v1, %v7861_v27 }
 0x61a   : > { %v4070_v28 = vpop.permute.xlu0 %4069 }
 0x61b   : > { %v4062_v2 = vpop.permute.xlu1 %4061  ;;  %v4074_v58 = vsel %vm9222_vm9, %v4068_v57, %v4070_v28  ;;  %vm9225_vm9 = vcmask 56320   ;;  %v5235_v57 = vmul.f32 %v5226_v44, %v7901_v18  ;;  %v5315_v28 = vsel %vm558_vm7, %v8790_v26, %v8802_v22 }
 0x61c   : > { %v4071_v15 = vsel %vm9223_vm14, %v4062_v2, %v4064_v49  ;;  %5076 = vrot.lane.b32.xlu0 %v5063_v20, %s9194_s18  ;;  %5690 = vmatprep.subr.bf16.mxu1 %v4074_v58  ;;  %v5238_v49 = vmul.f32 %v5224_v54, %v7889_v43  ;;  %vm9226_vm14 = vmmov %vm9225_vm9  ;;  %v5246_v40 = vpack.c.bf16 %v5241_v24, %v5236_v42 }
 0x61d   : > { %5078 = vrot.lane.b32.xlu1 %v5064_v53, %s9194_s18  ;;  %5609 = vmatpush1.bf16.msra.mxu0 %v4071_v15  ;;  %vm9227_vm15 = vmmov %vm9225_vm9  ;;  %v5245_v13 = vpack.c.bf16 %v5240_v12, %v5235_v57  ;;  %v5316_v58 = vsel %vm558_vm7, %v8802_v22, %v8808_v11  ;;  %v5324_v37 = vmul.f32 %v5315_v28, %v7884_v56  ;;  %v9229_v12 = vld [vmem:[#allocation19_spill] sm:$0xff] }
 0x61e   : > { %5691 = vmatpush1.bf16.msra.mxu1 %v4073_v50  ;;  %v8857_v19 = vpop.permute.xlu0 %5398  ;;  %v5243_v14 = vpack.c.bf16 %v5238_v49, %v5233_v46  ;;  %v5329_v15 = vmul.f32 %v5315_v28, %v7889_v43  ;;  %v5325_v1 = vmul.f32 %v5316_v58, %v7867_v17  ;;  %v5330_v22 = vmul.f32 %v5316_v58, %v7870_v29 }
 0x61f   : > { %v8861_v21 = vpop.permute.xlu1 %5400  ;;  %v5323_v11 = vmul.f32 %v8790_v26, %v7861_v27  ;;  %v5337_v26 = vpack.c.bf16 %v5332_v3, %v5327_v41 }
 0x620   : > { %5070 = vrot.lane.b32.xlu0 %v5060_v60, %s9194_s18  ;;  %v5334_v4 = vpack.c.bf16 %v5329_v15, %v5324_v37  ;;  %v5335_v54 = vpack.c.bf16 %v5330_v22, %v5325_v1  ;;  %v5406_v49 = vsel %vm469_vm8, %v8857_v19, %v8861_v21  ;;  %v8995_v1 = vld [vmem:[%s9106_s6 + $0x8] sm:$0xff] }
 0x621   : > { %5163 = vrot.lane.b32.xlu1 %v5152_v9, %s9193_s23  ;;  %v5242_v9 = vpack.c.bf16 %v5237_v33, %v5232_v10  ;;  %v5415_v36 = vmul.f32 %v5406_v49, %v7884_v56 }
 0x622   : > { %v8872_v51 = vpop.permute.xlu0 %5402 }
 0x623   : > { %v8878_v48 = vpop.permute.xlu1 %5404  ;;  %v5407_v44 = vsel %vm469_vm8, %v8861_v21, %v8872_v51  ;;  %v5333_v21 = vpack.c.bf16 %v5328_v45, %v5323_v11 }
 0x624   : > { %5165 = vrot.lane.b32.xlu0 %v5153_v35, %s9193_s23  ;;  %v5331_v35 = vmul.f32 %v5317_v0, %v7905_v63  ;;  %v5416_v42 = vmul.f32 %v5407_v44, %v7867_v17  ;;  %v5421_v24 = vmul.f32 %v5407_v44, %v7870_v29  ;;  %v9231_v17 = vld [vmem:[#allocation18_spill] sm:$0xff] }
 0x625   : > { %5167 = vrot.lane.b32.xlu1 %v5154_v34, %s9193_s23 }
 0x626   : > { %v4155_v30 = vpop.permute.xlu0 %4154  ;;  %v5336_v46 = vpack.c.bf16 %v5331_v35, %v5326_v6  ;;  %v5426_v28 = vpack.c.bf16 %v5421_v24, %v5416_v42  ;;  %v5892_v6 = vcombine.high %v8995_v1, %v8995_v1 }
 0x627   : > { %v4157_v8 = vpop.permute.xlu1 %4156 }
 0x628   : > { %5169 = vrot.lane.b32.xlu0 %v5155_v5, %s9193_s23  ;;  %v4163_v31 = vsel %vm9225_vm9, %v4155_v30, %v4157_v8 }
 0x629   : > { %5161 = vrot.lane.b32.xlu1 %v5151_v25, %s9193_s23  ;;  %5610 = vmatprep.subr.bf16.mxu0 %v4163_v31  ;;  %v9228_v25 = vld [vmem:[#allocation17_spill] sm:$0xff] }
 0x62a   : > { %v4159_v38 = vpop.permute.xlu0 %4158 }
 0x62b   : > { %v4161_v32 = vpop.permute.xlu1 %4160  ;;  %v4164_v20 = vsel %vm9226_vm14, %v4157_v8, %v4159_v38  ;;  %v5420_v8 = vmul.f32 %v5406_v49, %v7889_v43  ;;  %v9230_v43 = vld [vmem:[#allocation16_spill] sm:$0xff] }
 0x62c   : > { %5254 = vrot.lane.b32.xlu0 %v5243_v14, %s9192_s30  ;;  %v4165_v53 = vsel %vm9227_vm15, %v4159_v38, %v4161_v32  ;;  %v5408_v14 = vsel %vm469_vm8, %v8872_v51, %v8878_v48  ;;  %v5418_v32 = vmul.f32 %v8878_v48, %v7718_v61  ;;  %v5419_v61 = vmul.f32 %v8857_v19, %v7864_v23 }
 0x62d   : > { %5256 = vrot.lane.b32.xlu1 %v5244_v39, %s9192_s30  ;;  %5692 = vmatprep.subr.bf16.mxu1 %v4165_v53  ;;  %v5425_v38 = vpack.c.bf16 %v5420_v8, %v5415_v36  ;;  %v5417_v39 = vmul.f32 %v5408_v14, %v7901_v18  ;;  %v5422_v51 = vmul.f32 %v5408_v14, %v7905_v63 }
 0x62e   : > { %5693 = vmatpush1.bf16.msra.mxu1 %v4164_v20  ;;  %v4153_v2 = vpop.permute.xlu0 %4152  ;;  %v5423_v20 = vmul.f32 %v8878_v48, %v7721_v62  ;;  %v5414_v63 = vmul.f32 %v8857_v19, %v7861_v27  ;;  %v5566_v27 = vld [vmem:[%s9107_s7] sm:$0xff] }
 0x62f   : > { %v4246_v50 = vpop.permute.xlu1 %4245  ;;  %v4162_v59 = vsel %vm9225_vm9, %v4153_v2, %v4155_v30  ;;  %v5427_v33 = vpack.c.bf16 %v5422_v51, %v5417_v39  ;;  %v5756_v19 = vld [vmem:[%s9108_s8] sm:$0xff] }
 0x630   : > { %5258 = vrot.lane.b32.xlu0 %v5245_v13, %s9192_s30  ;;  %5611 = vmatpush1.bf16.msra.mxu0 %v4162_v59  ;;  %v5428_v48 = vpack.c.bf16 %v5423_v20, %v5418_v32  ;;  %v5424_v2 = vpack.c.bf16 %v5419_v61, %v5414_v63 }
 0x631   : > { %5260 = vrot.lane.b32.xlu1 %v5246_v40, %s9192_s30 }
 0x632   : > { %v4248_v60 = vpop.permute.xlu0 %4247 }
 0x633   : > { %v4250_v47 = vpop.permute.xlu1 %4249  ;;  %v4254_v52 = vsel %vm1537_vm13, %v4246_v50, %v4248_v60 }
 0x634   : > { %5252 = vrot.lane.b32.xlu0 %v5242_v9, %s9192_s30  ;;  %5612 = vmatprep.subr.bf16.mxu0 %v4254_v52  ;;  %v4255_v55 = vsel %vm1537_vm13, %v4248_v60, %v4250_v47  ;;  %v5889_v9 = vcombine.low %v8594_v16, %v8594_v16  ;;  %s5900_s30 = sshll.u32 %s6254_s17, 9  ;;  %s5781_s17 = scalar_lea.sflag [#allocation6], %s6372_s11 }
 0x635   : > { %5345 = vrot.lane.b32.xlu1 %v5334_v4, %s9206_s3  ;;  %s9056_s1 = scalar_lea.hbm %s9110_s10, %s5900_s30 }
 0x636   : > { %v4252_v34 = vpop.permute.xlu0 %4251 }
 0x637   : > { %v4244_v30 = vpop.permute.xlu1 %4243  ;;  %v4256_v5 = vsel %vm1537_vm13, %v4250_v47, %v4252_v34 }
 0x638   : > { %v4253_v7 = vsel %vm1537_vm13, %v4244_v30, %v4246_v50  ;;  %5347 = vrot.lane.b32.xlu0 %v5335_v54, %s9206_s3  ;;  %5694 = vmatprep.subr.bf16.mxu1 %v4256_v5  ;;  %v5766_v50 = vld [vmem:[%s9109_s9] sm:$0xff]  ;;  %vm9234_vm13 = vcmask 973824  }
 0x639   : > { %5349 = vrot.lane.b32.xlu1 %v5336_v46, %s9206_s3  ;;  %5613 = vmatpush1.bf16.msra.mxu0 %v4253_v7  ;;  %vm9235_vm14 = vmmov %vm9234_vm13 }
 0x63a   : > { %5614 = vmatprep.subr.bf16.mxu0 %v9228_v25  ;;  %5695 = vmatpush1.bf16.msra.mxu1 %v4255_v55  ;;  %v4345_v31 = vpop.permute.xlu0 %4344  ;;  %vm9236_vm15 = vmmov %vm9234_vm13 }
 0x63b   : > { %v4347_v57 = vpop.permute.xlu1 %4346  ;;  %5696 = vmatprep.subr.bf16.mxu1 %v9229_v12  ;;  %vm9237_vm9 = vmmov %vm9234_vm13 }
 0x63c   : > { %5351 = vrot.lane.b32.xlu0 %v5337_v26, %s9206_s3  ;;  %v4353_v56 = vsel %vm1498_vm12, %v4345_v31, %v4347_v57 }
 0x63d   : > { %5343 = vrot.lane.b32.xlu1 %v5333_v21, %s9206_s3  ;;  %5615 = vmatpush1.bf16.msra.mxu0 %v9230_v43  ;;  %s6085_s3 = sshll.u32 %s6177_s19, 4  ;;  %s6086_s3 = int_to_ptr.vmem [resolvable:$false] %s6085_s3 }
 0x63e   : > { %5616 = vmatprep.subr.bf16.mxu0 %v4353_v56  ;;  %5697 = vmatpush1.bf16.msra.mxu1 %v9231_v17  ;;  %v4349_v29 = vpop.permute.xlu0 %4348  ;;  %s6087_s21 = scalar_lea.vmem %s6086_s3, 1024 }
 0x63f   : > { %v4351_v53 = vpop.permute.xlu1 %4350  ;;  %v4354_v10 = vsel %vm1498_vm12, %v4347_v57, %v4349_v29 }
 0x640   : > { %5436 = vrot.lane.b32.xlu0 %v5425_v38, %s9205_s2  ;;  %v4355_v18 = vsel %vm1498_vm12, %v4349_v29, %v4351_v53 }
 0x641   : > { %5438 = vrot.lane.b32.xlu1 %v5426_v28, %s9205_s2  ;;  %5698 = vmatprep.subr.bf16.mxu1 %v4355_v18 }
 0x642   : > { %5699 = vmatpush1.bf16.msra.mxu1 %v4354_v10  ;;  %v4343_v62 = vpop.permute.xlu0 %4342 }
 0x643   : > { %v4436_v40 = vpop.permute.xlu1 %4435  ;;  %v4352_v13 = vsel %vm1498_vm12, %v4343_v62, %v4345_v31  ;;  %vm9232_vm12 = vcmask 392192  }
 0x644   : > { %5440 = vrot.lane.b32.xlu0 %v5427_v33, %s9205_s2  ;;  %5617 = vmatpush1.bf16.msra.mxu0 %v4352_v13 }
 0x645   : > { %5442 = vrot.lane.b32.xlu1 %v5428_v48, %s9205_s2 }
 0x646   : > { %v4438_v58 = vpop.permute.xlu0 %4437 }
 0x647   : > { %v4440_v37 = vpop.permute.xlu1 %4439  ;;  %v4444_v23 = vsel %vm1409_vm11, %v4436_v40, %v4438_v58 }
 0x648   : > { %5434 = vrot.lane.b32.xlu0 %v5424_v2, %s9205_s2  ;;  %5618 = vmatprep.subr.bf16.mxu0 %v4444_v23  ;;  %v4445_v60 = vsel %vm1409_vm11, %v4438_v58, %v4440_v37  ;;  %s5882_s2 = sshll.u32 %s6372_s11, 5 }
 0x649   : > { %5569 = vperm.xlu1 %6012, %v5566_v27   ;;  %s392_s23 = scalar_lea.vmem [#allocation9], %s5882_s2 }
 0x64a   : > { %v4442_v15 = vpop.permute.xlu0 %4441  ;;  %s5795_s18 = sshll.u32 %s392_s23, 4  ;;  %s9058_s18 = int_to_ptr.vmem [resolvable:$true] %s5795_s18 }
 0x64b   : > { %v4434_v59 = vpop.permute.xlu1 %4433  ;;  %v4446_v0 = vsel %vm1409_vm11, %v4440_v37, %v4442_v15  ;;  %s6081_s0 = scalar_lea.vmem %s9058_s18, 512  ;;  %p6088_p10 = scmp.lt.s32.totalorder %s9058_s18, %s6086_s3 }
 0x64c   : > { %v4443_v22 = vsel %vm1409_vm11, %v4434_v59, %v4436_v40  ;;  %5759 = vperm.xlu0 %6011, %v5756_v19   ;;  %5700 = vmatprep.subr.bf16.mxu1 %v4446_v0  ;;  %vm9233_vm11 = vmmov %vm9232_vm12  ;;  %p6082_p4 = scmp.ne.s32.totalorder %s9058_s18, %s6081_s0  ;;  %p6089_p13 = scmp.lt.s32.totalorder %s6087_s21, %s6081_s0 }
 0x64d   : > { %5769 = vperm.xlu1 %6012, %v5766_v50   ;;  %5619 = vmatpush1.bf16.msra.mxu0 %v4443_v22 }
 0x64e   : > { %5701 = vmatpush1.bf16.msra.mxu1 %v4445_v60  ;;  %v4527_v4 = vpop.permute.xlu0 %4526  ;;  %p6083_p6 = pnand %p6082_p4, %p6324_p12  ;;  %p6090_p3 = por %p6089_p13, %p6088_p10 }
 0x64f   : > { %v4529_v35 = vpop.permute.xlu1 %4528 }
 0x650   : > { %v4535_v47 = vsel %vm1320_vm10, %v4527_v4, %v4529_v35  ;;  %5621 = vmatmul.mubr.bf16.vlgmr.msra.gmra.mrb[4].mxu0 %v5889_v9  ;;  %p6084_p8 = pneg %p6083_p6 }
 0x651   : > { %5629 = vmatprep.subr.bf16.mxu0 %v4535_v47  ;;  %5703 = vmatmul.mubr.bf16.vlgmr.msra.gmra.mrb[4].mxu1 %v5889_v9 }
 0x652   : > { %v4531_v52 = vpop.permute.xlu0 %4530  ;;  %5894 = vmatprep.mubr.msk.bf16.mxu1 %vm9232_vm12, %v5892_v6  ;;  %5893 = vmatprep.mubr.msk.bf16.mxu0 %vm9233_vm11, %v5892_v6  ;;  %p6091_p7 = pnand %p6090_p3, %p6084_p8 }
 0x653   : > { %v4533_v11 = vpop.permute.xlu1 %4532  ;;  %v4536_v54 = vsel %vm1320_vm10, %v4529_v35, %v4531_v52 }
 0x654   : > { %v4537_v16 = vsel %vm1320_vm10, %v4531_v52, %v4533_v11 }
 0x655   : > { %5711 = vmatprep.subr.bf16.mxu1 %v4537_v16 }
 0x656   : > { %5712 = vmatpush1.bf16.msra.mxu1 %v4536_v54  ;;  %v4525_v41 = vpop.permute.xlu0 %4524 }
 0x657   : > { %v4618_v3 = vpop.permute.xlu1 %4617  ;;  %v4534_v34 = vsel %vm1320_vm10, %v4525_v41, %v4527_v4 }
 0x658   : > { %5630 = vmatpush1.bf16.msra.mxu0 %v4534_v34 }
 0x65a   : > { %v4620_v45 = vpop.permute.xlu0 %4619 }
 0x65b   : > { %v4622_v46 = vpop.permute.xlu1 %4621  ;;  %v4626_v49 = vsel %vm9234_vm13, %v4618_v3, %v4620_v45 }
 0x65c   : > { %5631 = vmatprep.subr.bf16.mxu0 %v4626_v49  ;;  %v4627_v7 = vsel %vm9236_vm15, %v4620_v45, %v4622_v46 }
 0x65e   : > { %v4624_v30 = vpop.permute.xlu0 %4623 }
 0x65f   : > { %v4616_v5 = vpop.permute.xlu1 %4615  ;;  %v4628_v44 = vsel %vm9235_vm14, %v4622_v46, %v4624_v30 }
 0x660   : > { %v4625_v55 = vsel %vm9237_vm9, %v4616_v5, %v4618_v3  ;;  %5713 = vmatprep.subr.bf16.mxu1 %v4628_v44 }
 0x661   : > { %5632 = vmatpush1.bf16.msra.mxu0 %v4625_v55  ;;  %5714 = vmatpush1.bf16.msra.mxu1 %v4627_v7 }
 0x662   : > { %v4709_v26 = vpop.permute.xlu0 %4708 }
 0x663   : > { %v4711_v36 = vpop.permute.xlu1 %4710 }
 0x664   : > { %v4717_v8 = vsel %vm469_vm8, %v4709_v26, %v4711_v36 }
 0x665   : > { %5633 = vmatprep.subr.bf16.mxu0 %v4717_v8 }
 0x666   : > { %v4713_v25 = vpop.permute.xlu0 %4712 }
 0x667   : > { %v4715_v31 = vpop.permute.xlu1 %4714  ;;  %v4718_v21 = vsel %vm469_vm8, %v4711_v36, %v4713_v25 }
 0x668   : > { %v4719_v14 = vsel %vm469_vm8, %v4713_v25, %v4715_v31 }
 0x669   : > { %5715 = vmatprep.subr.bf16.mxu1 %v4719_v14 }
 0x66a   : > { %5716 = vmatpush1.bf16.msra.mxu1 %v4718_v21  ;;  %v4707_v42 = vpop.permute.xlu0 %4706 }
 0x66b   : > { %v4800_v24 = vpop.permute.xlu1 %4799  ;;  %v4716_v57 = vsel %vm469_vm8, %v4707_v42, %v4709_v26 }
 0x66c   : > { %5634 = vmatpush1.bf16.msra.mxu0 %v4716_v57 }
 0x66e   : > { %v4802_v12 = vpop.permute.xlu0 %4801 }
 0x66f   : > { %v4804_v56 = vpop.permute.xlu1 %4803  ;;  %v4808_v43 = vsel %vm558_vm7, %v4800_v24, %v4802_v12 }
 0x670   : > { %5635 = vmatprep.subr.bf16.mxu0 %v4808_v43  ;;  %v4809_v17 = vsel %vm558_vm7, %v4802_v12, %v4804_v56 }
 0x672   : > { %v4806_v38 = vpop.permute.xlu0 %4805 }
 0x673   : > { %v4798_v39 = vpop.permute.xlu1 %4797  ;;  %v4810_v51 = vsel %vm558_vm7, %v4804_v56, %v4806_v38 }
 0x674   : > { %v4807_v29 = vsel %vm558_vm7, %v4798_v39, %v4800_v24  ;;  %5717 = vmatprep.subr.bf16.mxu1 %v4810_v51 }
 0x675   : > { %5636 = vmatpush1.bf16.msra.mxu0 %v4807_v29  ;;  %5718 = vmatpush1.bf16.msra.mxu1 %v4809_v17  ;;  %v5891_v17 = vcombine.low %v8995_v1, %v8995_v1 }
 0x676   : > { %v4891_v32 = vpop.permute.xlu0 %4890 }
 0x677   : > { %v4893_v20 = vpop.permute.xlu1 %4892 }
 0x678   : > { %v4899_v28 = vsel %vm647_vm6, %v4891_v32, %v4893_v20 }
 0x679   : > { %5637 = vmatprep.subr.bf16.mxu0 %v4899_v28 }
 0x67a   : > { %v4895_v53 = vpop.permute.xlu0 %4894 }
 0x67b   : > { %v4897_v10 = vpop.permute.xlu1 %4896  ;;  %v4900_v18 = vsel %vm647_vm6, %v4893_v20, %v4895_v53 }
 0x67c   : > { %v4901_v63 = vsel %vm647_vm6, %v4895_v53, %v4897_v10 }
 0x67d   : > { %5719 = vmatprep.subr.bf16.mxu1 %v4901_v63 }
 0x67e   : > { %5720 = vmatpush1.bf16.msra.mxu1 %v4900_v18  ;;  %v4889_v61 = vpop.permute.xlu0 %4888 }
 0x67f   : > { %v4982_v33 = vpop.permute.xlu1 %4981  ;;  %v4898_v62 = vsel %vm647_vm6, %v4889_v61, %v4891_v32 }
 0x680   : > { %5638 = vmatpush1.bf16.msra.mxu0 %v4898_v62 }
 0x682   : > { %v4984_v48 = vpop.permute.xlu0 %4983 }
 0x683   : > { %v4986_v40 = vpop.permute.xlu1 %4985  ;;  %v4990_v13 = vsel %vm736_vm5, %v4982_v33, %v4984_v48 }
 0x684   : > { %5639 = vmatprep.subr.bf16.mxu0 %v4990_v13  ;;  %v4991_v37 = vsel %vm736_vm5, %v4984_v48, %v4986_v40 }
 0x686   : > { %v4988_v2 = vpop.permute.xlu0 %4987 }
 0x687   : > { %v4980_v58 = vpop.permute.xlu1 %4979  ;;  %v4992_v27 = vsel %vm736_vm5, %v4986_v40, %v4988_v2 }
 0x688   : > { %v4989_v23 = vsel %vm736_vm5, %v4980_v58, %v4982_v33  ;;  %5721 = vmatprep.subr.bf16.mxu1 %v4992_v27 }
 0x689   : > { %5640 = vmatpush1.bf16.msra.mxu0 %v4989_v23  ;;  %5722 = vmatpush1.bf16.msra.mxu1 %v4991_v37 }
 0x68a   : > { %v5073_v19 = vpop.permute.xlu0 %5072 }
 0x68b   : > { %v5075_v15 = vpop.permute.xlu1 %5074 }
 0x68c   : > { %v5081_v50 = vsel %vm786_vm4, %v5073_v19, %v5075_v15 }
 0x68d   : > { %5641 = vmatprep.subr.bf16.mxu0 %v5081_v50 }
 0x68e   : > { %v5077_v59 = vpop.permute.xlu0 %5076 }
 0x68f   : > { %v5079_v0 = vpop.permute.xlu1 %5078  ;;  %v5082_v22 = vsel %vm786_vm4, %v5075_v15, %v5077_v59 }
 0x690   : > { %v5083_v60 = vsel %vm786_vm4, %v5077_v59, %v5079_v0 }
 0x691   : > { %5723 = vmatprep.subr.bf16.mxu1 %v5083_v60 }
 0x692   : > { %5724 = vmatpush1.bf16.msra.mxu1 %v5082_v22  ;;  %v5071_v9 = vpop.permute.xlu0 %5070 }
 0x693   : > { %v5164_v4 = vpop.permute.xlu1 %5163  ;;  %v5080_v6 = vsel %vm786_vm4, %v5071_v9, %v5073_v19 }
 0x694   : > { %5642 = vmatpush1.bf16.msra.mxu0 %v5080_v6 }
 0x696   : > { %v5166_v35 = vpop.permute.xlu0 %5165 }
 0x697   : > { %v5168_v47 = vpop.permute.xlu1 %5167  ;;  %v5172_v52 = vsel %vm697_vm3, %v5164_v4, %v5166_v35 }
 0x698   : > { %5643 = vmatprep.subr.bf16.mxu0 %v5172_v52  ;;  %v5173_v41 = vsel %vm697_vm3, %v5166_v35, %v5168_v47 }
 0x69a   : > { %v5170_v11 = vpop.permute.xlu0 %5169 }
 0x69b   : > { %v5162_v54 = vpop.permute.xlu1 %5161  ;;  %v5174_v16 = vsel %vm697_vm3, %v5168_v47, %v5170_v11 }
 0x69c   : > { %v5171_v3 = vsel %vm697_vm3, %v5162_v54, %v5164_v4  ;;  %5725 = vmatprep.subr.bf16.mxu1 %v5174_v16 }
 0x69d   : > { %5644 = vmatpush1.bf16.msra.mxu0 %v5171_v3  ;;  %5726 = vmatpush1.bf16.msra.mxu1 %v5173_v41 }
 0x69e   : > { %v5255_v34 = vpop.permute.xlu0 %5254 }
 0x69f   : > { %v5257_v45 = vpop.permute.xlu1 %5256 }
 0x6a0   : > { %v5263_v46 = vsel %vm608_vm2, %v5255_v34, %v5257_v45 }
 0x6a1   : > { %5645 = vmatprep.subr.bf16.mxu0 %v5263_v46 }
 0x6a2   : > { %v5259_v49 = vpop.permute.xlu0 %5258 }
 0x6a3   : > { %v5261_v30 = vpop.permute.xlu1 %5260  ;;  %v5264_v5 = vsel %vm608_vm2, %v5257_v45, %v5259_v49 }
 0x6a4   : > { %v5265_v44 = vsel %vm608_vm2, %v5259_v49, %v5261_v30 }
 0x6a5   : > { %5727 = vmatprep.subr.bf16.mxu1 %v5265_v44 }
 0x6a6   : > { %5728 = vmatpush1.bf16.msra.mxu1 %v5264_v5  ;;  %v5253_v7 = vpop.permute.xlu0 %5252 }
 0x6a7   : > { %v5346_v55 = vpop.permute.xlu1 %5345  ;;  %v5262_v26 = vsel %vm608_vm2, %v5253_v7, %v5255_v34 }
 0x6a8   : > { %5646 = vmatpush1.bf16.msra.mxu0 %v5262_v26 }
 0x6aa   : > { %v5348_v36 = vpop.permute.xlu0 %5347 }
 0x6ab   : > { %v5350_v8 = vpop.permute.xlu1 %5349  ;;  %v5354_v25 = vsel %vm519_vm1, %v5346_v55, %v5348_v36 }
 0x6ac   : > { %5647 = vmatprep.subr.bf16.mxu0 %v5354_v25  ;;  %v5355_v42 = vsel %vm519_vm1, %v5348_v36, %v5350_v8 }
 0x6ae   : > { %v5352_v31 = vpop.permute.xlu0 %5351 }
 0x6af   : > { %v5344_v21 = vpop.permute.xlu1 %5343  ;;  %v5356_v14 = vsel %vm519_vm1, %v5350_v8, %v5352_v31 }
 0x6b0   : > { %v5353_v24 = vsel %vm519_vm1, %v5344_v21, %v5346_v55  ;;  %5729 = vmatprep.subr.bf16.mxu1 %v5356_v14 }
 0x6b1   : > { %5648 = vmatpush1.bf16.msra.mxu0 %v5353_v24  ;;  %5730 = vmatpush1.bf16.msra.mxu1 %v5355_v42 }
 0x6b2   : > { %v5437_v57 = vpop.permute.xlu0 %5436 }
 0x6b3   : > { %v5439_v12 = vpop.permute.xlu1 %5438 }
 0x6b4   : > { %v5445_v56 = vsel %vm430_vm0, %v5437_v57, %v5439_v12 }
 0x6b5   : > { %5649 = vmatprep.subr.bf16.mxu0 %v5445_v56 }
 0x6b6   : > { %v5441_v43 = vpop.permute.xlu0 %5440 }
 0x6b7   : > { %v5443_v38 = vpop.permute.xlu1 %5442  ;;  %v5446_v39 = vsel %vm430_vm0, %v5439_v12, %v5441_v43 }
 0x6b8   : > { %v5447_v51 = vsel %vm430_vm0, %v5441_v43, %v5443_v38 }
 0x6b9   : > { %5731 = vmatprep.subr.bf16.mxu1 %v5447_v51 }
 0x6ba   : > { %5732 = vmatpush1.bf16.msra.mxu1 %v5446_v39  ;;  %v5435_v29 = vpop.permute.xlu0 %5434 }
 0x6bb   : > { %v5444_v32 = vsel %vm430_vm0, %v5435_v29, %v5437_v57 }
 0x6bc   : > { %5650 = vmatpush1.bf16.msra.mxu0 %v5444_v32 }
 0x6bd   : > { %5744 = vmatmul.mubr.bf16.vlgmr.msra.gmra.mrb[4].mxu1 %v5891_v17 }
 0x6bf   : > { %5662 = vmatmul.mubr.bf16.vlgmr.msra.gmra.mrb[4].mxu0 %v5891_v17 }
 0x6c8   : > { %v5570_v20 = vpop.permute.xlu1 %5569 }
 0x6cb   : > { %v5760_v40 = vpop.permute.xlu0 %5759 }
 0x6cc   : > { %v5770_v19 = vpop.permute.xlu1 %5769 }
 0x790   : > { %v5745_v28 = vpop.f32.mrb[4].mxu1 }
 0x791   : > { %v5911_v53 = vadd.f32 %v5745_v28, %v5570_v20  ;;  %v5747_v10 = vpop.f32.mrb[5].mxu1 }
 0x792   : > { %v5912_v18 = vadd.f32 %v5747_v10, %v5570_v20  ;;  %v5749_v63 = vpop.f32.mrb[6].mxu1  ;;  %v5663_v61 = vpop.f32.mrb[4].mxu0 }
 0x793   : > { %v5754_v33 = vmax.f32 %v5911_v53, 0.0  ;;  %v5909_v62 = vadd.f32 %v5663_v61, %v5570_v20  ;;  %v5750_v48 = vpop.f32.mrb[7].mxu1  ;;  %v5665_v1 = vpop.f32.mrb[5].mxu0 }
 0x794   : > { %v5755_v13 = vmax.f32 %v5912_v18, 0.0  ;;  %v5910_v2 = vadd.f32 %v5665_v1, %v5570_v20  ;;  %v5667_v58 = vpop.f32.mrb[6].mxu0 }
 0x795   : > { %v5764_v27 = vmul.f32 %v5760_v40, %v5754_v33  ;;  %v5752_v37 = vmax.f32 %v5909_v62, 0.0  ;;  %v5668_v23 = vpop.f32.mrb[7].mxu0 }
 0x796   : > { %v5765_v15 = vmul.f32 %v5760_v40, %v5755_v13  ;;  %v5753_v50 = vmax.f32 %v5910_v2, 0.0 }
 0x797   : > { %v5774_v59 = vadd.f32 %v5770_v19, %v5764_v27  ;;  %v5762_v0 = vmul.f32 %v5760_v40, %v5752_v37 }
 0x798   : > { %v5775_v22 = vadd.f32 %v5770_v19, %v5765_v15  ;;  %v5763_v60 = vmul.f32 %v5760_v40, %v5753_v50 }
 0x799   : > { %5778 = vst [vmem:[%s392_s23 + $0x10] sm:$0xff] %v5774_v59  ;;  %v5772_v9 = vadd.f32 %v5770_v19, %v5762_v0 }
 0x79a   : > { %5779 = vst [vmem:[%s392_s23 + $0x18] sm:$0xff] %v5775_v22  ;;  %v5773_v4 = vadd.f32 %v5770_v19, %v5763_v60 }
 0x79b   : > { %5776 = vst [vmem:[%s392_s23] sm:$0xff] %v5772_v9 }
 0x79c   : > { %5777 = vst [vmem:[%s392_s23 + $0x8] sm:$0xff] %v5773_v4 }
 0x79d   : > { %6094 = shalt.err (!%p6091_p7)
}
 0x79e   : > { %s6095_s11 = scalar_lea.hbm %s9056_s1, 512  ;;  %s6099_s29 = scalar_lea.hbm %s9110_s10, 1024 }
 0x79f   : > { %p6096_p9 = scmp.ne.s32.totalorder %s9056_s1, %s6095_s11  ;;  %p6100_p5 = scmp.lt.u32.totalorder %s9056_s1, %s9110_s10 }
 0x7a0   : > { %p6101_p11 = scmp.lt.u32.totalorder %s6099_s29, %s6095_s11  ;;  %p6103_p4 = scmp.lt.u32.totalorder %s6095_s11, %s9056_s1 }
 0x7a1   : > { %p6097_p2 = pnand %p6096_p9, %p6324_p12 }
 0x7a2   : > { %p6102_p1 = por %p6101_p11, %p6100_p5 }
 0x7a3   : > { %p6098_p0 = pneg %p6097_p2 }
 0x7a4   : > { %p6104_p6 = por %p6103_p4, %p6102_p1 }
 0x7a6   : > { %p6105_p8 = pnand %p6104_p6, %p6098_p0 }
 0x7a8   : > { %6108 = shalt.err (!%p6105_p8)
}
 0x7a9   : > { %5938 = dma.vmem_to_hbm [thread:$0]  (%p6324_p12), %s9058_s18, 512, %s9056_s1, %s5781_s17  }
 0x7aa PF: > { %s9238_s28 = sld [smem:[#allocation13_spill]]  ;;  %s9239_s2 = sld [smem:[#allocation14_spill]] }
 0x7ab   : > { %p9241_p13 = scmp.ge.s32.totalorder %s6151_s16, 2 }
 0x7b0   : > { %s5807_s30 = sand.u32 1, %s9238_s28   ;;  %p9240_p10 = scmp.ne.s32.totalorder %s9239_s2, 0 }
 0x7b1   : > { %s5808_s23 = scalar_lea.sflag [#allocation6], %s5807_s30 }
 0x7b2   : > { %p5949_p3 = pnand %p9241_p13, %p9240_p10 }
 0x7b4   : > { %6134 = dma.done.wait (!%p5949_p3), %s5808_s23, 512  }
 0x7b5   : > { %6136 = vsyncadd (!%p5949_p3), %s5808_s23, 4294966784  ;;  %s9242_s16 = sld [smem:[#allocation15_spill]]  ;;  %s9243_s13 = smov %s6143_s14 }
 0x7b6   : > { %s9244_s14 = smov %s6147_s15  ;;  %s9245_s15 = smov %s6320_s25 }
 0x7bb   : > { %p24_p7 = scmp.ge.s32.totalorder %s9242_s16, 4  }
 0x7bd   :  { %26 = sbr.rel (!%p24_p7) target bundleno = 11 (0xb), region = 134 }
 0x7c4   :  { %5813 = vsyncpa [#allocation5], 1 }
 0x7c5   :  { %5815 = vsyncpa [#allocation5 + $0x1], 1 }
 0x7c6   :  { %5816 = vsyncpa [#allocation8], 1 }
 0x7c7   :  { %5817 = vsyncpa [#allocation6], 1 }
 0x7c8   :  { %5819 = vsyncpa [#allocation6 + $0x1], 1 }

</bundles_post_ra>
